<compile_context>
chip_gen: v5e
topology: v5e:2x2
jax: 0.10.0
libtpu: 0.0.40
codegen_flags: <defaults>
</compile_context>

<pallas_src>
import functools

import jax
import jax.numpy as jnp
from jax.experimental import pallas as pl
from jax.experimental.pallas import tpu as pltpu

EXPANSION = 4  # Bottleneck expansion of resnet101
_VMEM_LIMIT = 32 * 1024 * 1024  # safe on v5e/v6e/v7x

# Static architecture config (kept OUT of the param pytree so the whole forward
# can be a single jit with python-int strides).
_LAYER_CFG = ((64, 3, (1, 1, 1)),
              (128, 4, (2, 2, 2)),
              (256, 23, (2, 2, 2)),
              (512, 3, (2, 2, 2)))


def _round_up(x, m):
    return (x + m - 1) // m * m


def _pick_tk(K, max_tk=2048):
    """Largest K tile (multiple of 128, <= max_tk) that exactly divides
    round_up(K, 128) -> zero extra K padding beyond lane alignment."""
    Kp = _round_up(K, 128)
    f_total = Kp // 128
    best = 128
    for f in range(1, f_total + 1):
        if f_total % f == 0 and f * 128 <= max_tk:
            best = max(best, f * 128)
    return best, Kp


# ---------------------------------------------------------------------------
# Fused matmul + BN-affine (+residual) (+ReLU) Pallas kernel
# ---------------------------------------------------------------------------
def _fused_matmul_kernel(*refs, relu, has_residual):
    if has_residual:
        a_ref, b_ref, s_ref, t_ref, r_ref, o_ref, acc_ref = refs
    else:
        a_ref, b_ref, s_ref, t_ref, o_ref, acc_ref = refs

    @pl.when(pl.program_id(2) == 0)
    def _():
        acc_ref[...] = jnp.zeros_like(acc_ref)

    acc_ref[...] += jnp.dot(a_ref[...], b_ref[...],
                            preferred_element_type=jnp.float32)

    @pl.when(pl.program_id(2) == pl.num_programs(2) - 1)
    def _():
        y = acc_ref[...] * s_ref[...] + t_ref[...]
        if has_residual:
            y = y + r_ref[...].astype(jnp.float32)
        if relu:
            y = jnp.maximum(y, 0.0)
        o_ref[...] = y.astype(o_ref.dtype)


@functools.partial(jax.jit, static_argnames=("relu", "out_dtype"))
def fused_matmul(a, b, scale, shift, residual=None, *, relu=False,
                 out_dtype=jnp.float32):
    """out_dtype( relu?((a @ b) * scale + shift (+ residual)) ).
    a:(M,K), b:(K,N) cast to bf16 for the MXU; f32 accumulation + epilogue;
    scale/shift per output column (f32); residual (M,N) bf16/f32."""
    M, K = a.shape
    K2, Nc = b.shape
    assert K == K2
    a = a.astype(jnp.bfloat16)
    b = b.astype(jnp.bfloat16)

    tm = min(512, _round_up(M, 16))
    tn = min(512, _round_up(Nc, 128))
    tk, Kp = _pick_tk(K)
    Mp, Np = _round_up(M, tm), _round_up(Nc, tn)

    a_p = a if (Mp == M and Kp == K) else jnp.pad(a, ((0, Mp - M), (0, Kp - K)))
    b_p = b if (Kp == K and Np == Nc) else jnp.pad(b, ((0, Kp - K), (0, Np - Nc)))
    s_p = jnp.pad(scale.astype(jnp.float32), (0, Np - Nc)).reshape(1, Np)
    t_p = jnp.pad(shift.astype(jnp.float32), (0, Np - Nc)).reshape(1, Np)

    in_specs = [pl.BlockSpec((tm, tk), lambda i, j, k: (i, k)),
                pl.BlockSpec((tk, tn), lambda i, j, k: (k, j)),
                pl.BlockSpec((1, tn), lambda i, j, k: (0, j)),
                pl.BlockSpec((1, tn), lambda i, j, k: (0, j))]
    operands = [a_p, b_p, s_p, t_p]
    has_residual = residual is not None
    if has_residual:
        r = residual.astype(jnp.bfloat16)
        r_p = r if (Mp == M and Np == Nc) else jnp.pad(
            r, ((0, Mp - M), (0, Np - Nc)))
        in_specs.append(pl.BlockSpec((tm, tn), lambda i, j, k: (i, j)))
        operands.append(r_p)

    out = pl.pallas_call(
        functools.partial(_fused_matmul_kernel, relu=relu,
                          has_residual=has_residual),
        out_shape=jax.ShapeDtypeStruct((Mp, Np), out_dtype),
        grid_spec=pltpu.PrefetchScalarGridSpec(
            num_scalar_prefetch=0,
            grid=(Mp // tm, Np // tn, Kp // tk),
            in_specs=in_specs,
            out_specs=pl.BlockSpec((tm, tn), lambda i, j, k: (i, j)),
            scratch_shapes=[pltpu.VMEM((tm, tn), jnp.float32)]),
        compiler_params=pltpu.CompilerParams(
            dimension_semantics=("parallel", "parallel", "arbitrary"),
            vmem_limit_bytes=_VMEM_LIMIT),
    )(*operands)
    return out[:M, :Nc]


# ---------------------------------------------------------------------------
# Pooling kernels
# ---------------------------------------------------------------------------
def _max3_kernel(a_ref, b_ref, c_ref, o_ref):
    o_ref[...] = jnp.maximum(jnp.maximum(a_ref[...], b_ref[...]), c_ref[...])


@jax.jit
def _pallas_max3(a, b, c):
    M, C = a.shape
    dtype = a.dtype
    Cp = _round_up(C, 128)
    bm = min(1024, _round_up(M, 16))
    Mp = _round_up(M, bm)

    def _pad(t):
        return t if (Mp == M and Cp == C) else jnp.pad(
            t, ((0, Mp - M), (0, Cp - C)))

    out = pl.pallas_call(
        _max3_kernel,
        out_shape=jax.ShapeDtypeStruct((Mp, Cp), dtype),
        grid_spec=pltpu.PrefetchScalarGridSpec(
            num_scalar_prefetch=0,
            grid=(Mp // bm,),
            in_specs=[pl.BlockSpec((bm, Cp), lambda i: (i, 0))] * 3,
            out_specs=pl.BlockSpec((bm, Cp), lambda i: (i, 0))),
        compiler_params=pltpu.CompilerParams(
            dimension_semantics=("parallel",),
            vmem_limit_bytes=_VMEM_LIMIT),
    )(_pad(a), _pad(b), _pad(c))
    return out[:M, :C]


@functools.partial(jax.jit, static_argnames=("axis",))
def _maxpool1d_k3s2p1(x, *, axis):
    """1-D max pool (kernel 3, stride 2, pad 1) along `axis` of an NDHWC tensor."""
    neg = float(jnp.finfo(x.dtype).min)
    L = x.shape[axis]
    Lo = (L + 2 - 3) // 2 + 1
    pad_width = [(0, 0)] * x.ndim
    pad_width[axis] = (1, 1)
    xp = jnp.pad(x, pad_width, constant_values=neg)

    def tap(d):
        idx = [slice(None)] * x.ndim
        idx[axis] = slice(d, d + Lo * 2, 2)
        return xp[tuple(idx)]

    a, b, c = tap(0), tap(1), tap(2)
    out_shape = a.shape
    C = x.shape[-1]
    y = _pallas_max3(a.reshape(-1, C), b.reshape(-1, C), c.reshape(-1, C))
    return y.reshape(out_shape)


def max_pool3d_3x3x3_s2_p1(x):
    """nn.MaxPool3d(kernel_size=3, stride=2, padding=1), computed separably
    (exact for max pooling)."""
    x = _maxpool1d_k3s2p1(x, axis=3)   # W
    x = _maxpool1d_k3s2p1(x, axis=2)   # H
    x = _maxpool1d_k3s2p1(x, axis=1)   # T
    return x


def _avgpool_kernel(x_ref, o_ref, *, inv_len):
    o_ref[...] = jnp.sum(x_ref[...].astype(jnp.float32),
                         axis=1, keepdims=True) * inv_len


@jax.jit
def global_avg_pool(x):
    """AvgPool3d over the entire remaining (T, H, W) window -> (N, C), f32."""
    N, T, H, W, C = x.shape
    L = T * H * W
    x3 = x.reshape(N, L, C)
    Lp, Cp = _round_up(L, 16), _round_up(C, 128)
    x_p = x3 if (Lp == L and Cp == C) else jnp.pad(
        x3, ((0, 0), (0, Lp - L), (0, Cp - C)))
    out = pl.pallas_call(
        functools.partial(_avgpool_kernel, inv_len=1.0 / L),
        out_shape=jax.ShapeDtypeStruct((N, 1, Cp), jnp.float32),
        grid_spec=pltpu.PrefetchScalarGridSpec(
            num_scalar_prefetch=0,
            grid=(N,),
            in_specs=[pl.BlockSpec((1, Lp, Cp), lambda n: (n, 0, 0))],
            out_specs=pl.BlockSpec((1, 1, Cp), lambda n: (n, 0, 0))),
        compiler_params=pltpu.CompilerParams(
            dimension_semantics=("parallel",),
            vmem_limit_bytes=_VMEM_LIMIT),
    )(x_p)
    return out.reshape(N, Cp)[:, :C]


# ---------------------------------------------------------------------------
# Layer wrappers (im2col is JAX glue feeding the fused MXU kernel)
# ---------------------------------------------------------------------------
@functools.partial(jax.jit,
                   static_argnames=("stride", "pad", "relu", "out_dtype"))
def conv3d_bn(x, w, scale, shift, residual=None, *, stride, pad, relu,
              out_dtype=jnp.bfloat16):
    """Bias-free 3-D conv with BN affine (+optional residual-add, +optional ReLU)
    fused into the matmul epilogue.  x: NDHWC; w: (kt,kh,kw,Cin,Cout)."""
    N, T, H, W, Cin = x.shape
    kt, kh, kw, _, Cout = w.shape
    st, sh, sw = stride
    pt, ph, pw = pad
    xb = x.astype(jnp.bfloat16)                     # MXU-native input dtype
    if (pt, ph, pw) != (0, 0, 0):
        xb = jnp.pad(xb, ((0, 0), (pt, pt), (ph, ph), (pw, pw), (0, 0)))
    To = (T + 2 * pt - kt) // st + 1
    Ho = (H + 2 * ph - kh) // sh + 1
    Wo = (W + 2 * pw - kw) // sw + 1
    cols = []
    for dt in range(kt):
        for dh in range(kh):
            for dw in range(kw):
                cols.append(xb[:, dt:dt + To * st:st,
                               dh:dh + Ho * sh:sh,
                               dw:dw + Wo * sw:sw, :])
    patches = cols[0] if len(cols) == 1 else jnp.concatenate(cols, axis=-1)
    M = N * To * Ho * Wo
    K = kt * kh * kw * Cin
    a = patches.reshape(M, K)
    b = w.reshape(K, Cout)
    res2d = None if residual is None else residual.reshape(M, Cout)
    out = fused_matmul(a, b, scale, shift, res2d, relu=relu,
                       out_dtype=out_dtype)
    return out.reshape(N, To, Ho, Wo, Cout)


def bn_scale_shift(bn):
    scale = bn["gamma"] / jnp.sqrt(bn["var"] + 1e-5)
    shift = bn["beta"] - bn["mean"] * scale
    return scale, shift


def linear(x, p, *, relu, out_scale=None, out_shift=None,
           out_dtype=jnp.float32):
    """y = x @ W + b, with an optional fused per-channel affine (used to fold
    the feature BatchNorm1d into fc8) and optional ReLU — all in one kernel."""
    if out_scale is None:
        scale = jnp.ones((p["w"].shape[1],), jnp.float32)
        shift = p["b"]
    else:
        scale = out_scale
        shift = p["b"] * out_scale + out_shift
    return fused_matmul(x, p["w"], scale, shift, relu=relu, out_dtype=out_dtype)


# ---------------------------------------------------------------------------
# ResNet-101 (3D, Bottleneck, shortcut type B) + EncoderResnet3D head
# ---------------------------------------------------------------------------
def bottleneck(x, p, stride):
    s1, t1 = bn_scale_shift(p["bn1"])
    out = conv3d_bn(x, p["w1"], s1, t1, stride=(1, 1, 1), pad=(0, 0, 0), relu=True)
    s2, t2 = bn_scale_shift(p["bn2"])
    out = conv3d_bn(out, p["w2"], s2, t2, stride=stride, pad=(1, 1, 1), relu=True)
    if "w_ds" in p:
        sd, td = bn_scale_shift(p["bn_ds"])
        residual = conv3d_bn(x, p["w_ds"], sd, td, stride=stride,
                             pad=(0, 0, 0), relu=False)
    else:
        residual = x
    s3, t3 = bn_scale_shift(p["bn3"])
    # conv3 + bn3 + residual-add + ReLU fused in one matmul epilogue.
    out = conv3d_bn(out, p["w3"], s3, t3, residual, stride=(1, 1, 1),
                    pad=(0, 0, 0), relu=True)
    return out


@jax.jit
def encoder_resnet3d_forward(params, x_ncdhw):
    """Forward of EncoderResnet3D. x_ncdhw: (N, 3, T, H, W) like PyTorch."""
    x = jnp.transpose(x_ncdhw, (0, 2, 3, 4, 1)).astype(jnp.float32)   # -> NDHWC
    s1, t1 = bn_scale_shift(params["bn1"])
    x = conv3d_bn(x, params["conv1_w"], s1, t1,                       # conv1+bn1+relu
                  stride=(1, 2, 2), pad=(3, 3, 3), relu=True)
    x = max_pool3d_3x3x3_s2_p1(x)                                     # maxpool
    for blocks, (_, _, layer_stride) in zip(params["layers"], _LAYER_CFG):
        for bi, p in enumerate(blocks):                               # layer1..4
            stride = layer_stride if bi == 0 else (1, 1, 1)
            x = bottleneck(x, p, stride)
    pooled = global_avg_pool(x)                       # avgpool + view -> (N, 2048)
    h = linear(pooled, params["fc6"], relu=True,      # relu(fc6)
               out_dtype=jnp.bfloat16)
    # dropout(0.5): inference-mode identity
    h = linear(h, params["fc7"], relu=True,           # relu(fc7)
               out_dtype=jnp.bfloat16)
    # dropout(0.5): inference-mode identity
    bs, bt = bn_scale_shift(params["bn_feat"])
    feature = linear(h, params["fc8"], relu=False,    # fc8 + BatchNorm1d fused
                     out_scale=bs, out_shift=bt)
    out_class = linear(h, params["cls"], relu=False)  # classification (2048->7)
    return feature, out_class


# ---------------------------------------------------------------------------
# Deterministic parameter construction (synthetic; no checkpoint loading)
# ---------------------------------------------------------------------------
class ParamGen:
    def __init__(self, key):
        self._key = key

    def normal(self, shape, std):
        self._key, sub = jax.random.split(self._key)
        return (jax.random.normal(sub, shape, jnp.float32) * std).astype(jnp.float32)


def make_bn(pg, c):
    return dict(gamma=1.0 + 0.1 * pg.normal((c,), 1.0),
                beta=0.1 * pg.normal((c,), 1.0),
                mean=0.1 * pg.normal((c,), 1.0),
                var=1.0 + 0.1 * jnp.abs(pg.normal((c,), 1.0)))


def conv_w(pg, k, cin, cout):
    kt, kh, kw = k
    fan_in = kt * kh * kw * cin
    return pg.normal((kt, kh, kw, cin, cout), (2.0 / fan_in) ** 0.5)


def fc_p(pg, cin, cout):
    return dict(w=pg.normal((cin, cout), (1.0 / cin) ** 0.5),
                b=pg.normal((cout,), 0.01))


def build_params(embed_size, key):
    pg = ParamGen(key)
    params = dict(conv1_w=conv_w(pg, (7, 7, 7), 3, 64), bn1=make_bn(pg, 64))
    inplanes = 64
    layers = []
    # resnet101: Bottleneck blocks [3, 4, 23, 3]
    for planes, nblocks, stride in _LAYER_CFG:
        blocks = []
        for b in range(nblocks):
            s = stride if b == 0 else (1, 1, 1)
            blk = dict(w1=conv_w(pg, (1, 1, 1), inplanes, planes),
                       bn1=make_bn(pg, planes),
                       w2=conv_w(pg, (3, 3, 3), planes, planes),
                       bn2=make_bn(pg, planes),
                       w3=conv_w(pg, (1, 1, 1), planes, planes * EXPANSION),
                       bn3=make_bn(pg, planes * EXPANSION))
            if b == 0 and (s != (1, 1, 1) or inplanes != planes * EXPANSION):
                blk["w_ds"] = conv_w(pg, (1, 1, 1), inplanes, planes * EXPANSION)
                blk["bn_ds"] = make_bn(pg, planes * EXPANSION)
            blocks.append(blk)
            inplanes = planes * EXPANSION
        layers.append(blocks)
    params["layers"] = layers
    params["fc6"] = fc_p(pg, 2048, 2048)
    params["fc7"] = fc_p(pg, 2048, 2048)
    params["fc8"] = fc_p(pg, 2048, embed_size)
    params["bn_feat"] = make_bn(pg, embed_size)
    params["cls"] = fc_p(pg, 2048, 7)
    return params


if __name__ == "__main__":
    key = jax.random.PRNGKey(0)
    pkey, xkey = jax.random.split(key)
    embed_size = 32
    params = build_params(embed_size, pkey)
    # Small but structurally valid input (PyTorch NCDHW):
    # batch=2, channels=3, frames=8, 32x32 spatial.
    x = jax.random.normal(xkey, (2, 3, 8, 32, 32), jnp.float32)
    feature, out_class = encoder_resnet3d_forward(params, x)
    jax.block_until_ready((feature, out_class))
    assert feature.shape == (2, embed_size), feature.shape
    assert out_class.shape == (2, 7), out_class.shape
    assert bool(jnp.all(jnp.isfinite(feature))) and bool(jnp.all(jnp.isfinite(out_class)))
    print("KERNEL_OK")
</pallas_src>

<mosaic_0001>
module attributes {stable_mosaic.version = 11 : i64} {
  func.func @_fused_matmul_kernel(%arg0: i32, %arg1: i32, %arg2: i32, %arg3: memref<512x1152xbf16, #tpu.memory_space<vmem>>, %arg4: memref<1152x128xbf16, #tpu.memory_space<vmem>>, %arg5: memref<1x128xf32, #tpu.memory_space<vmem>>, %arg6: memref<1x128xf32, #tpu.memory_space<vmem>>, %arg7: memref<512x128xbf16, #tpu.memory_space<vmem>>, %arg8: memref<512x128xf32, #tpu.memory_space<vmem>>) attributes {dimension_semantics = [#tpu.dimension_semantics<parallel>, #tpu.dimension_semantics<parallel>, #tpu.dimension_semantics<arbitrary>], iteration_bounds = array<i64: 8, 1, 1>, scalar_prefetch = 0 : i64, scratch_operands = 1 : i64, tpu.core_type = #tpu.core_type<tc>, window_params = [{transform_indices = @transform_0, window_bounds = array<i64: 512, 1152>}, {transform_indices = @transform_1, window_bounds = array<i64: 1152, 128>}, {transform_indices = @transform_2, window_bounds = array<i64: 1, 128>}, {transform_indices = @transform_3, window_bounds = array<i64: 1, 128>}, {transform_indices = @transform_4, window_bounds = array<i64: 512, 128>}]} {
    %c0_i32 = arith.constant 0 : i32
    %0 = arith.cmpi eq, %arg2, %c0_i32 : i32
    %1 = arith.extui %0 : i1 to i32
    %c0_i32_0 = arith.constant 0 : i32
    %2 = arith.cmpi ne, %1, %c0_i32_0 : i32
    scf.if %2 {
      %cst_10 = arith.constant 0.000000e+00 : f32
      %12 = vector.broadcast %cst_10 : f32 to vector<512x128xf32>
      %c0_11 = arith.constant 0 : index
      %c0_12 = arith.constant 0 : index
      %13 = vector.load %arg8[%c0_11, %c0_12] : memref<512x128xf32, #tpu.memory_space<vmem>>, vector<512x128xf32>
      tpu.vector_store %arg8[%c0_11, %c0_12], %12 {strides = array<i32>} : memref<512x128xf32, #tpu.memory_space<vmem>>, vector<512x128xf32>,
    } else {
    }
    %c0 = arith.constant 0 : index
    %c0_1 = arith.constant 0 : index
    %3 = vector.load %arg8[%c0, %c0_1] : memref<512x128xf32, #tpu.memory_space<vmem>>, vector<512x128xf32>
    %c0_2 = arith.constant 0 : index
    %c0_3 = arith.constant 0 : index
    %4 = vector.load %arg3[%c0_2, %c0_3] : memref<512x1152xbf16, #tpu.memory_space<vmem>>, vector<512x1152xbf16>
    %c0_4 = arith.constant 0 : index
    %c0_5 = arith.constant 0 : index
    %5 = vector.load %arg4[%c0_4, %c0_5] : memref<1152x128xbf16, #tpu.memory_space<vmem>>, vector<1152x128xbf16>
    %cst = arith.constant dense<0.000000e+00> : vector<512x128xf32>
    %6 = tpu.matmul %4, %5, %cst {dimension_numbers = #tpu.dot_dimension_numbers<[1], [0], [0], [1], [0, 0, 1, 1], [], []>} : vector<512x1152xbf16>, vector<1152x128xbf16>, vector<512x128xf32> -> vector<512x128xf32>
    %7 = arith.addf %3, %6 : vector<512x128xf32>
    %c0_6 = arith.constant 0 : index
    %c0_7 = arith.constant 0 : index
    %8 = vector.load %arg8[%c0_6, %c0_7] : memref<512x128xf32, #tpu.memory_space<vmem>>, vector<512x128xf32>
    tpu.vector_store %arg8[%c0_6, %c0_7], %7 {strides = array<i32>} : memref<512x128xf32, #tpu.memory_space<vmem>>, vector<512x128xf32>,
    %c0_i32_8 = arith.constant 0 : i32
    %9 = arith.cmpi eq, %arg2, %c0_i32_8 : i32
    %10 = arith.extui %9 : i1 to i32
    %c0_i32_9 = arith.constant 0 : i32
    %11 = arith.cmpi ne, %10, %c0_i32_9 : i32
    scf.if %11 {
      %c0_10 = arith.constant 0 : index
      %c0_11 = arith.constant 0 : index
      %12 = vector.load %arg8[%c0_10, %c0_11] : memref<512x128xf32, #tpu.memory_space<vmem>>, vector<512x128xf32>
      %c0_12 = arith.constant 0 : index
      %c0_13 = arith.constant 0 : index
      %13 = vector.load %arg5[%c0_12, %c0_13] : memref<1x128xf32, #tpu.memory_space<vmem>>, vector<1x128xf32>
      %14 = vector.broadcast %13 : vector<1x128xf32> to vector<512x128xf32>
      %15 = arith.mulf %12, %14 : vector<512x128xf32>
      %c0_14 = arith.constant 0 : index
      %c0_15 = arith.constant 0 : index
      %16 = vector.load %arg6[%c0_14, %c0_15] : memref<1x128xf32, #tpu.memory_space<vmem>>, vector<1x128xf32>
      %17 = vector.broadcast %16 : vector<1x128xf32> to vector<512x128xf32>
      %18 = arith.addf %15, %17 : vector<512x128xf32>
      %cst_16 = arith.constant 0.000000e+00 : f32
      %19 = vector.broadcast %cst_16 : f32 to vector<512x128xf32>
      %20 = arith.maximumf %18, %19 : vector<512x128xf32>
      %21 = arith.truncf %20 : vector<512x128xf32> to vector<512x128xbf16>
      %c0_17 = arith.constant 0 : index
      %c0_18 = arith.constant 0 : index
      %22 = vector.load %arg7[%c0_17, %c0_18] : memref<512x128xbf16, #tpu.memory_space<vmem>>, vector<512x128xbf16>
      tpu.vector_store %arg7[%c0_17, %c0_18], %21 {strides = array<i32>} : memref<512x128xbf16, #tpu.memory_space<vmem>>, vector<512x128xbf16>,
    } else {
    }
    return
  }
  func.func @transform_0(%arg0: i32, %arg1: i32, %arg2: i32) -> (i32, i32) {
    %c0_i32 = arith.constant 0 : i32
    return %arg0, %arg2 : i32, i32
  }
  func.func @transform_1(%arg0: i32, %arg1: i32, %arg2: i32) -> (i32, i32) {
    %c0_i32 = arith.constant 0 : i32
    return %arg2, %arg1 : i32, i32
  }
  func.func @transform_2(%arg0: i32, %arg1: i32, %arg2: i32) -> (i32, i32) {
    %c0_i32 = arith.constant 0 : i32
    %c0_i32_0 = arith.constant 0 : i32
    return %c0_i32, %arg1 : i32, i32
  }
  func.func @transform_3(%arg0: i32, %arg1: i32, %arg2: i32) -> (i32, i32) {
    %c0_i32 = arith.constant 0 : i32
    %c0_i32_0 = arith.constant 0 : i32
    return %c0_i32, %arg1 : i32, i32
  }
  func.func @transform_4(%arg0: i32, %arg1: i32, %arg2: i32) -> (i32, i32) {
    %c0_i32 = arith.constant 0 : i32
    return %arg0, %arg1 : i32, i32
  }
}

</mosaic_0001>

<bundles_post_ra>
// kernel: fused_matmul.1
= control target key start
LH: loop header
LB: loop body
LE: loop exit
PB: predicated region body
PF: predicated region fallthrough
CT: control target
= control target key end

     0   :  { %s7087_s15 = smov 0   ;;  %s7089_s16 = smov 0   ;;  %s8489_s0 = inlined_call_operand.vmem [shape: bf16[4096,1152], index: 0, kind: input, shape index: {}]   ;;  %s8490_s1 = inlined_call_operand.vmem [shape: bf16[1152,128], index: 1, kind: input, shape index: {}]   ;;  %s8491_s2 = inlined_call_operand.vmem [shape: f32[1,128], index: 2, kind: input, shape index: {}]   ;;  %s8492_s3 = inlined_call_operand.vmem [shape: f32[1,128], index: 3, kind: input, shape index: {}]   ;;  %s8493_s4 = inlined_call_operand.vmem [shape: bf16[4096,128], index: 4, kind: output, shape index: {}]  }
   0x1   :  { %s7091_s17 = smov 0  }
   0x2 LB: > { %s33_s18 = sadd.s32 1, %s7056_s16  ;;  %p4985_p0 = scmp.ge.s32.totalorder %s7060_s17, 1  ;;  %s7060_s17 = sphi %s7091_s17, %s14_s17   ;;  %s7056_s16 = sphi %s7089_s16, %s8593_s16   ;;  %s7052_s15 = sphi %s7087_s15, %s8592_s15  }
   0x3   : > { %p35_p1 = scmp.ge.s32.totalorder %s33_s18, 8  ;;  %p224_p2 = scmp.lt.s32.totalorder %s7060_s17, 9 }
   0x5   : > { %s8595_s18 = smov (%p35_p1, %s33_s18), 0  ;;  %p225_p3 = pnand %p4985_p0, %p224_p2 }
   0x7   : > { %228 = sbr.rel (%p225_p3) target bundleno = 1335 (0x537), region = 36 }
   0xc   : > { %v6727_v0 = vld [vmem:[%s8490_s1 + $0x38] sm:$0xff]  ;;  %v6726_v1 = vld [vmem:[%s8490_s1 + $0x30] sm:$0xff]  ;;  %v6725_v2 = vld [vmem:[%s8490_s1 + $0x28] sm:$0xff]  ;;  %s4986_s25 = sshll.u32 %s7052_s15, 6 }
   0xd   : > { %6983 = vmatpush.bf16.msra.mxu1 %v6727_v0  ;;  %6984 = vmatpush.bf16.msra.mxu2 %v6727_v0  ;;  %v6724_v3 = vld [vmem:[%s8490_s1 + $0x20] sm:$0xff]  ;;  %p274_p4 = scmp.lt.s32.totalorder %s4986_s25, 511  ;;  %v6723_v4 = vld [vmem:[%s8490_s1 + $0x18] sm:$0xff]  ;;  %v6722_v5 = vld [vmem:[%s8490_s1 + $0x10] sm:$0xff] }
   0xe   : > { %6985 = vmatpush.bf16.msra.mxu3 %v6727_v0  ;;  %2808 = vmatpush.bf16.msra.mxu0 %v6727_v0  ;;  %v6721_v6 = vld [vmem:[%s8490_s1 + $0x8] sm:$0xff]  ;;  %v6720_v7 = vld [vmem:[%s8490_s1] sm:$0xff]  ;;  %v6743_v16 = vld [vmem:[%s8490_s1 + $0xb8] sm:$0xff] }
   0xf   : > { %s8597_s25 = smov (!%p274_p4, %s4986_s25), 511  ;;  %v6751_v17 = vld [vmem:[%s8490_s1 + $0xf8] sm:$0xff]  ;;  %v6742_v24 = vld [vmem:[%s8490_s1 + $0xb0] sm:$0xff]  ;;  %v6741_v28 = vld [vmem:[%s8490_s1 + $0xa8] sm:$0xff] }
  0x10   : > { %s7007_s6 = smul.u32 36, %s8597_s25  ;;  %v6735_v22 = vld [vmem:[%s8490_s1 + $0x78] sm:$0xff]  ;;  %v6750_v25 = vld [vmem:[%s8490_s1 + $0xf0] sm:$0xff]  ;;  %v6749_v29 = vld [vmem:[%s8490_s1 + $0xe8] sm:$0xff]  ;;  %s4989_s23 = sshll.u32 %s8597_s25, 2 }
  0x11   : > { %6986 = vmatpush.bf16.msra.mxu1 %v6726_v1  ;;  %6987 = vmatpush.bf16.msra.mxu2 %v6726_v1  ;;  %v6759_v23 = vld [vmem:[%s8490_s1 + $0x138] sm:$0xff]  ;;  %v6734_v26 = vld [vmem:[%s8490_s1 + $0x70] sm:$0xff]  ;;  %v6733_v30 = vld [vmem:[%s8490_s1 + $0x68] sm:$0xff]  ;;  %s8073_s27 = scalar_lea.vmem %s8493_s4, %s4989_s23 }
  0x12   : > { %6988 = vmatpush.bf16.msra.mxu3 %v6726_v1  ;;  %2809 = vmatpush.bf16.msra.mxu0 %v6726_v1  ;;  %s7135_s11 = scalar_lea.vmem %s8489_s0, %s7007_s6  ;;  %v6758_v27 = vld [vmem:[%s8490_s1 + $0x130] sm:$0xff]  ;;  %v6757_v31 = vld [vmem:[%s8490_s1 + $0x128] sm:$0xff]  ;;  %v6740_v44 = vld [vmem:[%s8490_s1 + $0xa0] sm:$0xff] }
  0x13   : > { %v5280_v8 = vld [vmem:[%s7135_s11 + $0x240] sm:$0xf]  ;;  %v6508_v9 = vld [vmem:[%s7135_s11 + $0x260] sm:$0xf0]  ;;  %v5316_v32 = vld [vmem:[%s7135_s11 + $0x288] sm:$0xf] }
  0x14   : > { %v5568_v10 = vld [vmem:[%s7135_s11 + $0x480] sm:$0xf]  ;;  %v6580_v11 = vld [vmem:[%s7135_s11 + $0x4a0] sm:$0xf0]  ;;  %v5281_v18 = vor.u32 %v6508_v9, %v5280_v8  ;;  %v6517_v33 = vld [vmem:[%s7135_s11 + $0x2a8] sm:$0xf0] }
  0x15   : > { %6989 = vmatpush.bf16.msra.mxu1 %v6725_v2  ;;  %6990 = vmatpush.bf16.msra.mxu2 %v6725_v2  ;;  %v5856_v12 = vld [vmem:[%s7135_s11 + $0x6c0] sm:$0xf]  ;;  %v6652_v13 = vld [vmem:[%s7135_s11 + $0x6e0] sm:$0xf0]  ;;  %v5569_v19 = vor.u32 %v6580_v11, %v5568_v10  ;;  %v5604_v34 = vld [vmem:[%s7135_s11 + $0x4c8] sm:$0xf]  ;;  %v5317_v40 = vor.u32 %v6517_v33, %v5316_v32 }
  0x16   : > { %6991 = vmatpush.bf16.msra.mxu3 %v6725_v2  ;;  %2810 = vmatpush.bf16.msra.mxu0 %v6725_v2  ;;  %v4992_v14 = vld [vmem:[%s7135_s11] sm:$0xf]  ;;  %v6436_v15 = vld [vmem:[%s7135_s11 + $0x20] sm:$0xf0]  ;;  %v5857_v20 = vor.u32 %v6652_v13, %v5856_v12  ;;  %v6589_v35 = vld [vmem:[%s7135_s11 + $0x4e8] sm:$0xf0] }
  0x17   : > { %v4993_v21 = vor.u32 %v6436_v15, %v4992_v14  ;;  %v5892_v36 = vld [vmem:[%s7135_s11 + $0x708] sm:$0xf]  ;;  %v6661_v37 = vld [vmem:[%s7135_s11 + $0x728] sm:$0xf0]  ;;  %v5605_v41 = vor.u32 %v6589_v35, %v5604_v34  ;;  %v6748_v45 = vld [vmem:[%s8490_s1 + $0xe0] sm:$0xff] }
  0x18   : > { %v5028_v38 = vld [vmem:[%s7135_s11 + $0x48] sm:$0xf]  ;;  %v6445_v39 = vld [vmem:[%s7135_s11 + $0x68] sm:$0xf0]  ;;  %v5893_v42 = vor.u32 %v6661_v37, %v5892_v36  ;;  %v6732_v46 = vld [vmem:[%s8490_s1 + $0x60] sm:$0xff] }
  0x19   : > { %6992 = vmatpush.bf16.msra.mxu1 %v6724_v3  ;;  %6993 = vmatpush.bf16.msra.mxu2 %v6724_v3  ;;  %v5029_v43 = vor.u32 %v6445_v39, %v5028_v38  ;;  %v6756_v47 = vld [vmem:[%s8490_s1 + $0x120] sm:$0xff]  ;;  %v5352_v48 = vld [vmem:[%s7135_s11 + $0x2d0] sm:$0xf]  ;;  %v6526_v49 = vld [vmem:[%s7135_s11 + $0x2f0] sm:$0xf0] }
  0x1a   : > { %6994 = vmatpush.bf16.msra.mxu3 %v6724_v3  ;;  %2811 = vmatpush.bf16.msra.mxu0 %v6724_v3  ;;  %v5640_v50 = vld [vmem:[%s7135_s11 + $0x510] sm:$0xf]  ;;  %v6598_v51 = vld [vmem:[%s7135_s11 + $0x530] sm:$0xf0]  ;;  %v5353_v56 = vor.u32 %v6526_v49, %v5352_v48  ;;  %v6739_v60 = vld [vmem:[%s8490_s1 + $0x98] sm:$0xff] }
  0x1b   : > { %v5928_v52 = vld [vmem:[%s7135_s11 + $0x750] sm:$0xf]  ;;  %v6670_v53 = vld [vmem:[%s7135_s11 + $0x770] sm:$0xf0]  ;;  %v5641_v57 = vor.u32 %v6598_v51, %v5640_v50  ;;  %v6747_v61 = vld [vmem:[%s8490_s1 + $0xd8] sm:$0xff] }
  0x1c   : > { %v5064_v54 = vld [vmem:[%s7135_s11 + $0x90] sm:$0xf]  ;;  %v6454_v55 = vld [vmem:[%s7135_s11 + $0xb0] sm:$0xf0]  ;;  %v5929_v58 = vor.u32 %v6670_v53, %v5928_v52  ;;  %v6731_v62 = vld [vmem:[%s8490_s1 + $0x58] sm:$0xff] }
  0x1d   : > { %6995 = vmatpush.bf16.msra.mxu1 %v6723_v4  ;;  %6996 = vmatpush.bf16.msra.mxu2 %v6723_v4  ;;  %v5065_v59 = vor.u32 %v6454_v55, %v5064_v54  ;;  %v6755_v63 = vld [vmem:[%s8490_s1 + $0x118] sm:$0xff]  ;;  %v6738_v12 = vld [vmem:[%s8490_s1 + $0x90] sm:$0xff]  ;;  %v5460_v32 = vld [vmem:[%s7135_s11 + $0x3a8] sm:$0xf] }
  0x1e   : > { %6997 = vmatpush.bf16.msra.mxu3 %v6723_v4  ;;  %2812 = vmatpush.bf16.msra.mxu0 %v6723_v4  ;;  %v5388_v0 = vld [vmem:[%s7135_s11 + $0x318] sm:$0xf]  ;;  %v6535_v1 = vld [vmem:[%s7135_s11 + $0x338] sm:$0xf0]  ;;  %v6746_v13 = vld [vmem:[%s8490_s1 + $0xd0] sm:$0xff] }
  0x1f   : > { %v5676_v2 = vld [vmem:[%s7135_s11 + $0x558] sm:$0xf]  ;;  %v6607_v3 = vld [vmem:[%s7135_s11 + $0x578] sm:$0xf0]  ;;  %v5389_v8 = vor.u32 %v6535_v1, %v5388_v0  ;;  %v6730_v14 = vld [vmem:[%s8490_s1 + $0x50] sm:$0xff] }
  0x20   : > { %v5964_v4 = vld [vmem:[%s7135_s11 + $0x798] sm:$0xf]  ;;  %v5677_v9 = vor.u32 %v6607_v3, %v5676_v2  ;;  %v6754_v15 = vld [vmem:[%s8490_s1 + $0x110] sm:$0xff]  ;;  %v6553_v33 = vld [vmem:[%s7135_s11 + $0x3c8] sm:$0xf0] }
  0x21   : > { %6998 = vmatpush.bf16.msra.mxu1 %v6722_v5  ;;  %6999 = vmatpush.bf16.msra.mxu2 %v6722_v5  ;;  %v5748_v34 = vld [vmem:[%s7135_s11 + $0x5e8] sm:$0xf]  ;;  %v6625_v35 = vld [vmem:[%s7135_s11 + $0x608] sm:$0xf0]  ;;  %v5496_v48 = vld [vmem:[%s7135_s11 + $0x3f0] sm:$0xf] }
  0x22   : > { %7000 = vmatpush.bf16.msra.mxu3 %v6722_v5  ;;  %2813 = vmatpush.bf16.msra.mxu0 %v6722_v5  ;;  %v6679_v5 = vld [vmem:[%s7135_s11 + $0x7b8] sm:$0xf0]  ;;  %v6036_v36 = vld [vmem:[%s7135_s11 + $0x828] sm:$0xf]  ;;  %v6697_v37 = vld [vmem:[%s7135_s11 + $0x848] sm:$0xf0] }
  0x23   : > { %v5965_v10 = vor.u32 %v6679_v5, %v5964_v4  ;;  %v5172_v38 = vld [vmem:[%s7135_s11 + $0x168] sm:$0xf]  ;;  %v6481_v39 = vld [vmem:[%s7135_s11 + $0x188] sm:$0xf0]  ;;  %v6562_v49 = vld [vmem:[%s7135_s11 + $0x410] sm:$0xf0] }
  0x24   : > { %v5784_v50 = vld [vmem:[%s7135_s11 + $0x630] sm:$0xf]  ;;  %v6634_v51 = vld [vmem:[%s7135_s11 + $0x650] sm:$0xf0]  ;;  %v5532_v0 = vld [vmem:[%s7135_s11 + $0x438] sm:$0xf] }
  0x25   : > { %7001 = vmatpush.bf16.msra.mxu1 %v6721_v6  ;;  %7002 = vmatpush.bf16.msra.mxu2 %v6721_v6  ;;  %v6072_v52 = vld [vmem:[%s7135_s11 + $0x870] sm:$0xf]  ;;  %v6706_v53 = vld [vmem:[%s7135_s11 + $0x890] sm:$0xf0]  ;;  %v6571_v1 = vld [vmem:[%s7135_s11 + $0x458] sm:$0xf0] }
  0x26   : > { %7003 = vmatpush.bf16.msra.mxu3 %v6721_v6  ;;  %2814 = vmatpush.bf16.msra.mxu0 %v6721_v6  ;;  %v5100_v6 = vld [vmem:[%s7135_s11 + $0xd8] sm:$0xf]  ;;  %v5208_v54 = vld [vmem:[%s7135_s11 + $0x1b0] sm:$0xf]  ;;  %v6490_v55 = vld [vmem:[%s7135_s11 + $0x1d0] sm:$0xf0] }
  0x27   : > { %v5820_v2 = vld [vmem:[%s7135_s11 + $0x678] sm:$0xf]  ;;  %v6643_v3 = vld [vmem:[%s7135_s11 + $0x698] sm:$0xf0] }
  0x28   : > { %v6108_v4 = vld [vmem:[%s7135_s11 + $0x8b8] sm:$0xf]  ;;  %v6715_v5 = vld [vmem:[%s7135_s11 + $0x8d8] sm:$0xf0] }
  0x29   : > { %7004 = vmatpush.bf16.msra.mxu1 %v6720_v7  ;;  %7005 = vmatpush.bf16.msra.mxu2 %v6720_v7 }
  0x2a   : > { %7006 = vmatpush.bf16.msra.mxu3 %v6720_v7  ;;  %2815 = vmatpush.bf16.msra.mxu0 %v6720_v7  ;;  %v6463_v7 = vld [vmem:[%s7135_s11 + $0xf8] sm:$0xf0] }
  0x2b   : > { %v5101_v11 = vor.u32 %v6463_v7, %v5100_v6  ;;  %v5244_v6 = vld [vmem:[%s7135_s11 + $0x1f8] sm:$0xf]  ;;  %v6499_v7 = vld [vmem:[%s7135_s11 + $0x218] sm:$0xf0] }
  0x2c   : > { %2856 = vmatmul.bf16.vlgmr.msra.gmra.mxu1 %v5281_v18  ;;  %2896 = vmatmul.bf16.vlgmr.msra.gmra.mxu2 %v5569_v19  ;;  %v5712_v18 = vld [vmem:[%s7135_s11 + $0x5a0] sm:$0xf]  ;;  %v6616_v19 = vld [vmem:[%s7135_s11 + $0x5c0] sm:$0xf0] }
  0x2d   : > { %3146 = vmatpush.bf16.msrb.mxu2 %v6743_v16  ;;  %2936 = vmatmul.bf16.vlgmr.msra.gmra.mxu3 %v5857_v20  ;;  %v5424_v16 = vld [vmem:[%s7135_s11 + $0x360] sm:$0xf] }
  0x2e   : > { %3315 = vmatpush.bf16.msrb.mxu3 %v6751_v17  ;;  %2816 = vmatmul.bf16.vlgmr.msra.gmra.mxu0 %v4993_v21  ;;  %v6544_v17 = vld [vmem:[%s7135_s11 + $0x380] sm:$0xf0]  ;;  %v6000_v20 = vld [vmem:[%s7135_s11 + $0x7e0] sm:$0xf] }
  0x2f   : > { %2977 = vmatpush.bf16.msrb.mxu1 %v6735_v22  ;;  %3484 = vmatpush.bf16.msrb.mxu0 %v6759_v23  ;;  %v6688_v21 = vld [vmem:[%s7135_s11 + $0x800] sm:$0xf0]  ;;  %v5136_v22 = vld [vmem:[%s7135_s11 + $0x120] sm:$0xf] }
  0x30   : > { %v6472_v23 = vld [vmem:[%s7135_s11 + $0x140] sm:$0xf0] }
  0x31   : > { %3147 = vmatpush.bf16.msrb.mxu2 %v6742_v24  ;;  %v5425_v24 = vor.u32 %v6544_v17, %v5424_v16  ;;  %v6433_v16 = vld [vmem:[%s7135_s11 + $0xc] sm:$0xf]  ;;  %v5002_v17 = vld [vmem:[%s7135_s11 + $0x2c] sm:$0xf0] }
  0x32   : > { %3316 = vmatpush.bf16.msrb.mxu3 %v6750_v25  ;;  %v5713_v25 = vor.u32 %v6616_v19, %v5712_v18  ;;  %v5008_v18 = vld [vmem:[%s7135_s11 + $0x10] sm:$0xf]  ;;  %v6438_v19 = vld [vmem:[%s7135_s11 + $0x30] sm:$0xf0] }
  0x33   : > { %2978 = vmatpush.bf16.msrb.mxu1 %v6734_v26  ;;  %3485 = vmatpush.bf16.msrb.mxu0 %v6758_v27  ;;  %v6001_v26 = vor.u32 %v6688_v21, %v6000_v20  ;;  %v5137_v27 = vor.u32 %v6472_v23, %v5136_v22  ;;  %v5005_v23 = vor.u32 %v6433_v16, %v5002_v17  ;;  %v5116_v16 = vld [vmem:[%s7135_s11 + $0xe8] sm:$0xf]  ;;  %v6465_v17 = vld [vmem:[%s7135_s11 + $0x108] sm:$0xf0] }
  0x35   : > { %3148 = vmatpush.bf16.msrb.mxu2 %v6741_v28  ;;  %v6737_v28 = vld [vmem:[%s8490_s1 + $0x88] sm:$0xff] }
  0x36   : > { %3317 = vmatpush.bf16.msrb.mxu3 %v6749_v29  ;;  %v6745_v29 = vld [vmem:[%s8490_s1 + $0xc8] sm:$0xff] }
  0x37   : > { %2979 = vmatpush.bf16.msrb.mxu1 %v6733_v30  ;;  %3486 = vmatpush.bf16.msrb.mxu0 %v6757_v31  ;;  %v6729_v30 = vld [vmem:[%s8490_s1 + $0x48] sm:$0xff] }
  0x38   : > { %v6753_v31 = vld [vmem:[%s8490_s1 + $0x108] sm:$0xff] }
  0x39   : > { %3149 = vmatpush.bf16.msrb.mxu2 %v6740_v44  ;;  %v6736_v44 = vld [vmem:[%s8490_s1 + $0x80] sm:$0xff] }
  0x3a   : > { %3318 = vmatpush.bf16.msrb.mxu3 %v6748_v45  ;;  %v6744_v45 = vld [vmem:[%s8490_s1 + $0xc0] sm:$0xff] }
  0x3b   : > { %2980 = vmatpush.bf16.msrb.mxu1 %v6732_v46  ;;  %3487 = vmatpush.bf16.msrb.mxu0 %v6756_v47  ;;  %v6728_v46 = vld [vmem:[%s8490_s1 + $0x40] sm:$0xff] }
  0x3c   : > { %2861 = vmatmul.bf16.gmra.mxu1 %v5317_v40  ;;  %2901 = vmatmul.bf16.gmra.mxu2 %v5605_v41  ;;  %v5461_v40 = vor.u32 %v6553_v33, %v5460_v32  ;;  %v5749_v41 = vor.u32 %v6625_v35, %v5748_v34  ;;  %v6752_v47 = vld [vmem:[%s8490_s1 + $0x100] sm:$0xff]  ;;  %v5036_v32 = vld [vmem:[%s7135_s11 + $0x50] sm:$0xf]  ;;  %v6446_v33 = vld [vmem:[%s7135_s11 + $0x70] sm:$0xf0] }
  0x3d   : > { %2941 = vmatmul.bf16.gmra.mxu3 %v5893_v42  ;;  %3150 = vmatpush.bf16.msrb.mxu2 %v6739_v60  ;;  %v6037_v42 = vor.u32 %v6697_v37, %v6036_v36  ;;  %v6775_v60 = vld [vmem:[%s8490_s1 + $0x1b8] sm:$0xff]  ;;  %v6442_v34 = vld [vmem:[%s7135_s11 + $0x54] sm:$0xf] }
  0x3e   : > { %2821 = vmatmul.bf16.gmra.mxu0 %v5029_v43  ;;  %3319 = vmatpush.bf16.msrb.mxu3 %v6747_v61  ;;  %v5173_v43 = vor.u32 %v6481_v39, %v5172_v38  ;;  %v6783_v61 = vld [vmem:[%s8490_s1 + $0x1f8] sm:$0xff] }
  0x3f   : > { %2981 = vmatpush.bf16.msrb.mxu1 %v6731_v62  ;;  %3488 = vmatpush.bf16.msrb.mxu0 %v6755_v63  ;;  %v6767_v62 = vld [vmem:[%s8490_s1 + $0x178] sm:$0xff] }
  0x40   : > { %v6791_v63 = vld [vmem:[%s8490_s1 + $0x238] sm:$0xff] }
  0x41   : > { %3151 = vmatpush.bf16.msrb.mxu2 %v6738_v12  ;;  %v6432_v12 = vld [vmem:[%s7135_s11 + $0x4] sm:$0xf]  ;;  %v5038_v35 = vld [vmem:[%s7135_s11 + $0x74] sm:$0xf0]  ;;  %v6447_v37 = vld [vmem:[%s7135_s11 + $0x78] sm:$0xf0] }
  0x42   : > { %3320 = vmatpush.bf16.msrb.mxu3 %v6746_v13  ;;  %v4994_v13 = vld [vmem:[%s7135_s11 + $0x24] sm:$0xf0]  ;;  %v5044_v36 = vld [vmem:[%s7135_s11 + $0x58] sm:$0xf] }
  0x43   : > { %2982 = vmatpush.bf16.msrb.mxu1 %v6730_v14  ;;  %3489 = vmatpush.bf16.msrb.mxu0 %v6754_v15  ;;  %v5000_v14 = vld [vmem:[%s7135_s11 + $0x8] sm:$0xf]  ;;  %v6437_v15 = vld [vmem:[%s7135_s11 + $0x28] sm:$0xf0]  ;;  %v4997_v20 = vor.u32 %v6432_v12, %v4994_v13  ;;  %v5108_v12 = vld [vmem:[%s7135_s11 + $0xe0] sm:$0xf] }
  0x44   : > { %v5001_v21 = vor.u32 %v6437_v15, %v5000_v14  ;;  %v6464_v13 = vld [vmem:[%s7135_s11 + $0x100] sm:$0xf0]  ;;  %v5110_v15 = vld [vmem:[%s7135_s11 + $0x104] sm:$0xf0] }
  0x45   : > { %3152 = vmatpush.bf16.msrb.mxu2 %v6737_v28  ;;  %v6460_v14 = vld [vmem:[%s7135_s11 + $0xe4] sm:$0xf] }
  0x46   : > { %3321 = vmatpush.bf16.msrb.mxu3 %v6745_v29 }
  0x47   : > { %2983 = vmatpush.bf16.msrb.mxu1 %v6729_v30  ;;  %3490 = vmatpush.bf16.msrb.mxu0 %v6753_v31  ;;  %v6441_v30 = vld [vmem:[%s7135_s11 + $0x4c] sm:$0xf]  ;;  %v5030_v31 = vld [vmem:[%s7135_s11 + $0x6c] sm:$0xf0] }
  0x49   : > { %3153 = vmatpush.bf16.msrb.mxu2 %v6736_v44  ;;  %v5045_v44 = vor.u32 %v6447_v37, %v5044_v36  ;;  %v6468_v36 = vld [vmem:[%s7135_s11 + $0x124] sm:$0xf]  ;;  %v5138_v37 = vld [vmem:[%s7135_s11 + $0x144] sm:$0xf0] }
  0x4a   : > { %3322 = vmatpush.bf16.msrb.mxu3 %v6744_v45 }
  0x4b   : > { %2984 = vmatpush.bf16.msrb.mxu1 %v6728_v46  ;;  %3491 = vmatpush.bf16.msrb.mxu0 %v6752_v47 }
  0x4c   : > { %2866 = vmatmul.bf16.gmra.mxu1 %v5353_v56  ;;  %2906 = vmatmul.bf16.gmra.mxu2 %v5641_v57  ;;  %v5497_v56 = vor.u32 %v6562_v49, %v5496_v48  ;;  %v5785_v57 = vor.u32 %v6634_v51, %v5784_v50  ;;  %v6450_v50 = vld [vmem:[%s7135_s11 + $0x94] sm:$0xf]  ;;  %v5066_v51 = vld [vmem:[%s7135_s11 + $0xb4] sm:$0xf0] }
  0x4d   : > { %2946 = vmatmul.bf16.gmra.mxu3 %v5929_v58  ;;  %v6073_v58 = vor.u32 %v6706_v53, %v6072_v52  ;;  %3822 = vmatpush.bf16.msra.mxu2 %v6775_v60  ;;  %v5072_v52 = vld [vmem:[%s7135_s11 + $0x98] sm:$0xf]  ;;  %v6455_v53 = vld [vmem:[%s7135_s11 + $0xb8] sm:$0xf0]  ;;  %v5069_v60 = vor.u32 %v6450_v50, %v5066_v51  ;;  %v5152_v50 = vld [vmem:[%s7135_s11 + $0x130] sm:$0xf] }
  0x4e   : > { %2826 = vmatmul.bf16.gmra.mxu0 %v5065_v59  ;;  %v5209_v59 = vor.u32 %v6490_v55, %v5208_v54  ;;  %3991 = vmatpush.bf16.msra.mxu3 %v6783_v61  ;;  %v6451_v54 = vld [vmem:[%s7135_s11 + $0x9c] sm:$0xf]  ;;  %v5074_v55 = vld [vmem:[%s7135_s11 + $0xbc] sm:$0xf0]  ;;  %v5073_v61 = vor.u32 %v6455_v53, %v5072_v52  ;;  %v6474_v51 = vld [vmem:[%s7135_s11 + $0x150] sm:$0xf0] }
  0x4f   : > { %3653 = vmatpush.bf16.msra.mxu1 %v6767_v62  ;;  %4160 = vmatpush.bf16.msra.mxu0 %v6791_v63  ;;  %v5077_v63 = vor.u32 %v6451_v54, %v5074_v55  ;;  %v5141_v54 = vor.u32 %v6468_v36, %v5138_v37 }
  0x5c   : > { %2871 = vmatmul.bf16.gmra.mxu1 %v5389_v8  ;;  %2911 = vmatmul.bf16.gmra.mxu2 %v5677_v9  ;;  %v5533_v8 = vor.u32 %v6571_v1, %v5532_v0  ;;  %v5821_v9 = vor.u32 %v6643_v3, %v5820_v2  ;;  %v6774_v2 = vld [vmem:[%s8490_s1 + $0x1b0] sm:$0xff] }
  0x5d   : > { %2951 = vmatmul.bf16.gmra.mxu3 %v5965_v10  ;;  %v6109_v10 = vor.u32 %v6715_v5, %v6108_v4  ;;  %v6782_v3 = vld [vmem:[%s8490_s1 + $0x1f0] sm:$0xff]  ;;  %3823 = vmatpush.bf16.msra.mxu2 %v6774_v2 }
  0x5e   : > { %2831 = vmatmul.bf16.gmra.mxu0 %v5101_v11  ;;  %v5245_v11 = vor.u32 %v6499_v7, %v5244_v6  ;;  %3992 = vmatpush.bf16.msra.mxu3 %v6782_v3  ;;  %v6766_v6 = vld [vmem:[%s8490_s1 + $0x170] sm:$0xff] }
  0x5f   : > { %3654 = vmatpush.bf16.msra.mxu1 %v6766_v6  ;;  %v6477_v6 = vld [vmem:[%s7135_s11 + $0x16c] sm:$0xf] }
  0x6c   : > { %2876 = vmatmul.bf16.gmra.mxu1 %v5425_v24  ;;  %2916 = vmatmul.bf16.gmra.mxu2 %v5713_v25  ;;  %v5009_v24 = vor.u32 %v6438_v19, %v5008_v18 }
  0x6d   : > { %2956 = vmatmul.bf16.gmra.mxu3 %v6001_v26 }
  0x6e   : > { %2836 = vmatmul.bf16.gmra.mxu0 %v5137_v27 }
  0x7c   : > { %2881 = vmatmul.bf16.gmra.mxu1 %v5461_v40  ;;  %2921 = vmatmul.bf16.gmra.mxu2 %v5749_v41  ;;  %v5033_v40 = vor.u32 %v6441_v30, %v5030_v31  ;;  %v5037_v41 = vor.u32 %v6446_v33, %v5036_v32  ;;  %v5117_v30 = vor.u32 %v6465_v17, %v5116_v16 }
  0x7d   : > { %2961 = vmatmul.bf16.gmra.mxu3 %v6037_v42 }
  0x7e   : > { %2841 = vmatmul.bf16.gmra.mxu0 %v5173_v43  ;;  %v5041_v43 = vor.u32 %v6442_v34, %v5038_v35 }
  0x8c   : > { %2886 = vmatmul.bf16.gmra.mxu1 %v5497_v56  ;;  %2926 = vmatmul.bf16.gmra.mxu2 %v5785_v57  ;;  %v5080_v56 = vld [vmem:[%s7135_s11 + $0xa0] sm:$0xf]  ;;  %v6456_v57 = vld [vmem:[%s7135_s11 + $0xc0] sm:$0xf0] }
  0x8d   : > { %2966 = vmatmul.bf16.gmra.mxu3 %v6073_v58  ;;  %v5081_v0 = vor.u32 %v6456_v57, %v5080_v56 }
  0x8e   : > { %2846 = vmatmul.bf16.gmra.mxu0 %v5209_v59 }
  0x9c   : > { %2891 = vmatmul.bf16.gmra.mxu1 %v5533_v8  ;;  %2931 = vmatmul.bf16.gmra.mxu2 %v5821_v9  ;;  %v6790_v9 = vld [vmem:[%s8490_s1 + $0x230] sm:$0xff] }
  0x9d   : > { %2971 = vmatmul.bf16.gmra.mxu3 %v6109_v10  ;;  %v6459_v10 = vld [vmem:[%s7135_s11 + $0xdc] sm:$0xf]  ;;  %4161 = vmatpush.bf16.msra.mxu0 %v6790_v9  ;;  %v5174_v9 = vld [vmem:[%s7135_s11 + $0x18c] sm:$0xf0] }
  0x9e   : > { %2851 = vmatmul.bf16.gmra.mxu0 %v5245_v11  ;;  %v5102_v11 = vld [vmem:[%s7135_s11 + $0xfc] sm:$0xf0] }
  0xa9   : > { %v7320_v22 = vpop.f32.mrf.mxu1 }
  0xab   : > { %v7322_v25 = vpop.f32.mrf.mxu0 }
  0xac   : > { %2985 = vmatmul.bf16.vlgmr.msrb.gmra.mxu1 %v4997_v20  ;;  %3154 = vmatmul.bf16.vlgmr.msrb.gmra.mxu2 %v5001_v21  ;;  %v5105_v20 = vor.u32 %v6459_v10, %v5102_v11  ;;  %v5109_v21 = vor.u32 %v6464_v13, %v5108_v12  ;;  %v5180_v10 = vld [vmem:[%s7135_s11 + $0x170] sm:$0xf]  ;;  %v6482_v11 = vld [vmem:[%s7135_s11 + $0x190] sm:$0xf0]  ;;  %v5182_v13 = vld [vmem:[%s7135_s11 + $0x194] sm:$0xf0] }
  0xad   : > { %3323 = vmatmul.bf16.vlgmr.msrb.gmra.mxu3 %v5005_v23  ;;  %v6478_v12 = vld [vmem:[%s7135_s11 + $0x174] sm:$0xf] }
  0xae   : > { %3492 = vmatmul.bf16.vlgmr.msrb.gmra.mxu0 %v5009_v24  ;;  %v5113_v24 = vor.u32 %v6460_v14, %v5110_v15  ;;  %v5188_v14 = vld [vmem:[%s7135_s11 + $0x178] sm:$0xf]  ;;  %v6483_v15 = vld [vmem:[%s7135_s11 + $0x198] sm:$0xf0] }
  0xaf   : > { %v7324_v26 = vpop.f32.mrf.mxu2  ;;  %v5189_v36 = vor.u32 %v6483_v15, %v5188_v14 }
  0xb0   : > { %v7326_v27 = vpop.f32.mrf.mxu3 }
  0xb1   : > { %8494 = vst [vmem:[#allocation3_spill] sm:$0xff] %v7326_v27  ;;  %v7328_v28 = vpop.f32.mrf.mxu1 }
  0xb3   : > { %v7330_v29 = vpop.f32.mrf.mxu0 }
  0xb7   : > { %v7340_v38 = vpop.f32.mrf.mxu2 }
  0xb8   : > { %v7342_v39 = vpop.f32.mrf.mxu3 }
  0xb9   : > { %8495 = vst [vmem:[#allocation4_spill] sm:$0xff] %v7342_v39  ;;  %v7344_v42 = vpop.f32.mrf.mxu1 }
  0xbb   : > { %v7346_v45 = vpop.f32.mrf.mxu0 }
  0xbc   : > { %2990 = vmatmul.bf16.gmra.mxu1 %v5033_v40  ;;  %3159 = vmatmul.bf16.gmra.mxu2 %v5037_v41  ;;  %v5144_v40 = vld [vmem:[%s7135_s11 + $0x128] sm:$0xf]  ;;  %v6473_v41 = vld [vmem:[%s7135_s11 + $0x148] sm:$0xf0] }
  0xbd   : > { %3328 = vmatmul.bf16.gmra.mxu3 %v5041_v43  ;;  %v6469_v43 = vld [vmem:[%s7135_s11 + $0x12c] sm:$0xf]  ;;  %v5145_v55 = vor.u32 %v6473_v41, %v5144_v40 }
  0xbe   : > { %3497 = vmatmul.bf16.gmra.mxu0 %v5045_v44  ;;  %v5146_v44 = vld [vmem:[%s7135_s11 + $0x14c] sm:$0xf0] }
  0xbf   : > { %v7348_v46 = vpop.f32.mrf.mxu2  ;;  %v5149_v57 = vor.u32 %v6469_v43, %v5146_v44 }
  0xc0   : > { %v7350_v47 = vpop.f32.mrf.mxu3 }
  0xc1   : > { %8496 = vst [vmem:[#allocation5_spill] sm:$0xff] %v7350_v47  ;;  %v7352_v48 = vpop.f32.mrf.mxu1 }
  0xc3   : > { %v7354_v49 = vpop.f32.mrf.mxu0 }
  0xc7   : > { %v7364_v58 = vpop.f32.mrf.mxu2 }
  0xc8   : > { %v7366_v59 = vpop.f32.mrf.mxu3 }
  0xc9   : > { %8497 = vst [vmem:[#allocation6_spill] sm:$0xff] %v7366_v59  ;;  %v7368_v62 = vpop.f32.mrf.mxu1 }
  0xcb   : > { %v7370_v1 = vpop.f32.mrf.mxu0 }
  0xcc   : > { %2995 = vmatmul.bf16.gmra.mxu1 %v5069_v60  ;;  %3164 = vmatmul.bf16.gmra.mxu2 %v5073_v61  ;;  %v5153_v60 = vor.u32 %v6474_v51, %v5152_v50  ;;  %v6486_v50 = vld [vmem:[%s7135_s11 + $0x1b4] sm:$0xf]  ;;  %v5210_v51 = vld [vmem:[%s7135_s11 + $0x1d4] sm:$0xf0] }
  0xcd   : > { %3333 = vmatmul.bf16.gmra.mxu3 %v5077_v63 }
  0xce   : > { %3502 = vmatmul.bf16.gmra.mxu0 %v5081_v0 }
  0xcf   : > { %v7378_v4 = vpop.f32.mrf.mxu2 }
  0xd0   : > { %v7380_v5 = vpop.f32.mrf.mxu3 }
  0xd1   : > { %8498 = vst [vmem:[#allocation7_spill] sm:$0xff] %v7380_v5  ;;  %v7385_v7 = vpop.f32.mrf.mxu1  ;;  %v6510_v5 = vld [vmem:[%s7135_s11 + $0x270] sm:$0xf0] }
  0xd3   : > { %v7387_v8 = vpop.f32.mrf.mxu0 }
  0xd7   : > { %v7400_v18 = vpop.f32.mrf.mxu2 }
  0xd8   : > { %v7402_v19 = vpop.f32.mrf.mxu3 }
  0xd9   : > { %8499 = vst [vmem:[#allocation8_spill] sm:$0xff] %v7402_v19  ;;  %v7404_v23 = vpop.f32.mrf.mxu1  ;;  %v5296_v19 = vld [vmem:[%s7135_s11 + $0x250] sm:$0xf] }
  0xda   : > { %v5297_v47 = vor.u32 %v6510_v5, %v5296_v19  ;;  %v6513_v5 = vld [vmem:[%s7135_s11 + $0x28c] sm:$0xf]  ;;  %v5318_v19 = vld [vmem:[%s7135_s11 + $0x2ac] sm:$0xf0] }
  0xdb   : > { %v7406_v31 = vpop.f32.mrf.mxu0 }
  0xdc   : > { %3000 = vmatmul.bf16.gmra.mxu1 %v5105_v20  ;;  %3169 = vmatmul.bf16.gmra.mxu2 %v5109_v21  ;;  %v5177_v20 = vor.u32 %v6477_v6, %v5174_v9  ;;  %v5181_v21 = vor.u32 %v6482_v11, %v5180_v10  ;;  %v5224_v6 = vld [vmem:[%s7135_s11 + $0x1c0] sm:$0xf]  ;;  %v6492_v9 = vld [vmem:[%s7135_s11 + $0x1e0] sm:$0xf0] }
  0xdd   : > { %3338 = vmatmul.bf16.gmra.mxu3 %v5113_v24 }
  0xde   : > { %3507 = vmatmul.bf16.gmra.mxu0 %v5117_v30  ;;  %v5185_v30 = vor.u32 %v6478_v12, %v5182_v13  ;;  %v5213_v12 = vor.u32 %v6486_v50, %v5210_v51 }
  0xdf   : > { %v7408_v32 = vpop.f32.mrf.mxu2 }
  0xe0   : > { %v7410_v33 = vpop.f32.mrf.mxu3 }
  0xe1   : > { %8500 = vst [vmem:[#allocation9_spill] sm:$0xff] %v7410_v33  ;;  %v7412_v34 = vpop.f32.mrf.mxu1  ;;  %v5290_v33 = vld [vmem:[%s7135_s11 + $0x26c] sm:$0xf0] }
  0xe3   : > { %v7414_v35 = vpop.f32.mrf.mxu0 }
  0xe7   : > { %v7424_v52 = vpop.f32.mrf.mxu2 }
  0xe8   : > { %v7426_v53 = vpop.f32.mrf.mxu3 }
  0xe9   : > { %8501 = vst [vmem:[#allocation10_spill] sm:$0xff] %v7426_v53  ;;  %v7428_v56 = vpop.f32.mrf.mxu1 }
  0xeb   : > { %v7430_v61 = vpop.f32.mrf.mxu0 }
  0xec   : > { %3005 = vmatmul.bf16.gmra.mxu1 %v5141_v54  ;;  %3174 = vmatmul.bf16.gmra.mxu2 %v5145_v55  ;;  %v5216_v54 = vld [vmem:[%s7135_s11 + $0x1b8] sm:$0xf]  ;;  %v6491_v55 = vld [vmem:[%s7135_s11 + $0x1d8] sm:$0xf0] }
  0xed   : > { %3343 = vmatmul.bf16.gmra.mxu3 %v5149_v57  ;;  %v6487_v57 = vld [vmem:[%s7135_s11 + $0x1bc] sm:$0xf]  ;;  %v5217_v13 = vor.u32 %v6491_v55, %v5216_v54 }
  0xee   : > { %3512 = vmatmul.bf16.gmra.mxu0 %v5153_v60  ;;  %v5218_v60 = vld [vmem:[%s7135_s11 + $0x1dc] sm:$0xf0] }
  0xef   : > { %v7432_v63 = vpop.f32.mrf.mxu2  ;;  %v5221_v15 = vor.u32 %v6487_v57, %v5218_v60  ;;  %v6765_v57 = vld [vmem:[%s8490_s1 + $0x168] sm:$0xff] }
  0xf0   : > { %v7434_v0 = vpop.f32.mrf.mxu3  ;;  %v6789_v60 = vld [vmem:[%s8490_s1 + $0x228] sm:$0xff]  ;;  %3655 = vmatpush.bf16.msra.mxu1 %v6765_v57 }
  0xf1   : > { %8502 = vst [vmem:[#allocation11_spill] sm:$0xff] %v7434_v0  ;;  %v7436_v2 = vpop.f32.mrf.mxu1  ;;  %4162 = vmatpush.bf16.msra.mxu0 %v6789_v60 }
  0xf3   : > { %v7438_v3 = vpop.f32.mrf.mxu0 }
  0xf7   : > { %v7448_v16 = vpop.f32.mrf.mxu2 }
  0xf8   : > { %v7450_v17 = vpop.f32.mrf.mxu3 }
  0xf9   : > { %8503 = vst [vmem:[#allocation12_spill] sm:$0xff] %v7450_v17  ;;  %v7452_v24 = vpop.f32.mrf.mxu1 }
  0xfb   : > { %v7454_v37 = vpop.f32.mrf.mxu0 }
  0xfc   : > { %3010 = vmatmul.bf16.gmra.mxu1 %v5177_v20  ;;  %3179 = vmatmul.bf16.gmra.mxu2 %v5181_v21  ;;  %v5225_v20 = vor.u32 %v6492_v9, %v5224_v6  ;;  %v6495_v6 = vld [vmem:[%s7135_s11 + $0x1fc] sm:$0xf]  ;;  %v5246_v9 = vld [vmem:[%s7135_s11 + $0x21c] sm:$0xf0] }
  0xfd   : > { %3348 = vmatmul.bf16.gmra.mxu3 %v5185_v30  ;;  %v6773_v30 = vld [vmem:[%s8490_s1 + $0x1a8] sm:$0xff] }
  0xfe   : > { %3517 = vmatmul.bf16.gmra.mxu0 %v5189_v36  ;;  %v6781_v36 = vld [vmem:[%s8490_s1 + $0x1e8] sm:$0xff]  ;;  %3824 = vmatpush.bf16.msra.mxu2 %v6773_v30 }
  0xff   : > { %v7456_v40 = vpop.f32.mrf.mxu2  ;;  %3993 = vmatpush.bf16.msra.mxu3 %v6781_v36  ;;  %v5260_v30 = vld [vmem:[%s7135_s11 + $0x208] sm:$0xf]  ;;  %v6501_v36 = vld [vmem:[%s7135_s11 + $0x228] sm:$0xf0] }
 0x100   : > { %v7458_v41 = vpop.f32.mrf.mxu3  ;;  %v5261_v60 = vor.u32 %v6501_v36, %v5260_v30  ;;  %v6509_v30 = vld [vmem:[%s7135_s11 + $0x268] sm:$0xf0] }
 0x101   : > { %8504 = vst [vmem:[#allocation13_spill] sm:$0xff] %v7458_v41  ;;  %v7460_v43 = vpop.f32.mrf.mxu1  ;;  %v5249_v41 = vor.u32 %v6495_v6, %v5246_v9  ;;  %v6505_v36 = vld [vmem:[%s7135_s11 + $0x24c] sm:$0xf] }
 0x102   : > { %v5293_v59 = vor.u32 %v6505_v36, %v5290_v33 }
 0x103   : > { %v7462_v44 = vpop.f32.mrf.mxu0 }
 0x107   : > { %v7472_v10 = vpop.f32.mrf.mxu2 }
 0x108   : > { %8505 = vst [vmem:[#allocation14_spill] sm:$0xff] %v7472_v10  ;;  %v7474_v11 = vpop.f32.mrf.mxu3 }
 0x109   : > { %8506 = vst [vmem:[#allocation15_spill] sm:$0xff] %v7474_v11  ;;  %v7476_v14 = vpop.f32.mrf.mxu1 }
 0x10b   : > { %v7478_v21 = vpop.f32.mrf.mxu0 }
 0x10c   : > { %3015 = vmatmul.bf16.gmra.mxu1 %v5213_v12  ;;  %3184 = vmatmul.bf16.gmra.mxu2 %v5217_v13  ;;  %v5252_v12 = vld [vmem:[%s7135_s11 + $0x200] sm:$0xf]  ;;  %v6500_v13 = vld [vmem:[%s7135_s11 + $0x220] sm:$0xf0] }
 0x10d   : > { %3353 = vmatmul.bf16.gmra.mxu3 %v5221_v15  ;;  %v6496_v15 = vld [vmem:[%s7135_s11 + $0x204] sm:$0xf]  ;;  %v5253_v17 = vor.u32 %v6500_v13, %v5252_v12 }
 0x10e   : > { %3522 = vmatmul.bf16.gmra.mxu0 %v5225_v20  ;;  %v5254_v20 = vld [vmem:[%s7135_s11 + $0x224] sm:$0xf0]  ;;  %v6504_v13 = vld [vmem:[%s7135_s11 + $0x244] sm:$0xf] }
 0x10f   : > { %v7486_v50 = vpop.f32.mrf.mxu2  ;;  %v5257_v57 = vor.u32 %v6496_v15, %v5254_v20  ;;  %v5282_v15 = vld [vmem:[%s7135_s11 + $0x264] sm:$0xf0] }
 0x110   : > { %8507 = vst [vmem:[#allocation16_spill] sm:$0xff] %v7486_v50  ;;  %v7488_v51 = vpop.f32.mrf.mxu3  ;;  %v5288_v20 = vld [vmem:[%s7135_s11 + $0x248] sm:$0xf] }
 0x111   : > { %8508 = vst [vmem:[#allocation17_spill] sm:$0xff] %v7488_v51  ;;  %v7490_v54 = vpop.f32.mrf.mxu1 }
 0x113   : > { %v7492_v55 = vpop.f32.mrf.mxu0 }
 0x117   : > { %v7508_v51 = vpop.f32.mrf.mxu2 }
 0x118   : > { %8509 = vst [vmem:[#allocation18_spill] sm:$0xff] %v7508_v51  ;;  %v7510_v11 = vpop.f32.mrf.mxu3  ;;  %v6519_v51 = vld [vmem:[%s7135_s11 + $0x2b8] sm:$0xf0] }
 0x119   : > { %8510 = vst [vmem:[#allocation19_spill] sm:$0xff] %v7510_v11  ;;  %v7512_v0 = vpop.f32.mrf.mxu1 }
 0x11b   : > { %v7514_v53 = vpop.f32.mrf.mxu0 }
 0x11c   : > { %3020 = vmatmul.bf16.gmra.mxu1 %v5249_v41  ;;  %3189 = vmatmul.bf16.gmra.mxu2 %v5253_v17 }
 0x11d   : > { %3358 = vmatmul.bf16.gmra.mxu3 %v5257_v57  ;;  %v5285_v57 = vor.u32 %v6504_v13, %v5282_v15 }
 0x11e   : > { %3527 = vmatmul.bf16.gmra.mxu0 %v5261_v60  ;;  %v5289_v60 = vor.u32 %v6509_v30, %v5288_v20 }
 0x11f   : > { %v7516_v11 = vpop.f32.mrf.mxu2 }
 0x120   : > { %8511 = vst [vmem:[#allocation20_spill] sm:$0xff] %v7516_v11  ;;  %v7518_v6 = vpop.f32.mrf.mxu3  ;;  %v5332_v11 = vld [vmem:[%s7135_s11 + $0x298] sm:$0xf] }
 0x121   : > { %8512 = vst [vmem:[#allocation21_spill] sm:$0xff] %v7518_v6  ;;  %v7520_v9 = vpop.f32.mrf.mxu1 }
 0x123   : > { %v7522_v12 = vpop.f32.mrf.mxu0 }
 0x127   : > { %v7532_v41 = vpop.f32.mrf.mxu2 }
 0x128   : > { %8513 = vst [vmem:[#allocation22_spill] sm:$0xff] %v7532_v41  ;;  %v7534_v17 = vpop.f32.mrf.mxu3  ;;  %v6518_v41 = vld [vmem:[%s7135_s11 + $0x2b0] sm:$0xf0] }
 0x129   : > { %8514 = vst [vmem:[#allocation23_spill] sm:$0xff] %v7534_v17  ;;  %v2986_v6 = vpop.f32.mrf.mxu1 }
 0x12a   : > { %v2987_v27 = vadd.f32 %v2986_v6, %v7322_v25 }
 0x12b   : > { %v3493_v39 = vpop.f32.mrf.mxu0 }
 0x12c   : > { %3025 = vmatmul.bf16.gmra.mxu1 %v5285_v57  ;;  %3194 = vmatmul.bf16.gmra.mxu2 %v5289_v60  ;;  %v5324_v57 = vld [vmem:[%s7135_s11 + $0x290] sm:$0xf]  ;;  %v6514_v60 = vld [vmem:[%s7135_s11 + $0x294] sm:$0xf] }
 0x12d   : > { %3363 = vmatmul.bf16.gmra.mxu3 %v5293_v59 }
 0x12e   : > { %3532 = vmatmul.bf16.gmra.mxu0 %v5297_v47  ;;  %v5326_v47 = vld [vmem:[%s7135_s11 + $0x2b4] sm:$0xf0] }
 0x12f   : > { %v3155_v13 = vpop.f32.mrf.mxu2 }
 0x130   : > { %v3156_v15 = vadd.f32 %v3155_v13, %v2987_v27  ;;  %v3324_v20 = vpop.f32.mrf.mxu3  ;;  %v5321_v27 = vor.u32 %v6513_v5, %v5318_v19  ;;  %v5325_v13 = vor.u32 %v6518_v41, %v5324_v57  ;;  %v6522_v57 = vld [vmem:[%s7135_s11 + $0x2d4] sm:$0xf] }
 0x131   : > { %v2988_v30 = vpop.f32.mrf.mxu1 }
 0x132   : > { %v3325_v17 = vadd.f32 %v3324_v20, %v3156_v15  ;;  %v2989_v59 = vadd.f32 %v2988_v30, %v7330_v29  ;;  %v5329_v15 = vor.u32 %v6514_v60, %v5326_v47  ;;  %v5333_v20 = vor.u32 %v6519_v51, %v5332_v11  ;;  %v5354_v60 = vld [vmem:[%s7135_s11 + $0x2f4] sm:$0xf0] }
 0x133   : > { %v3495_v33 = vpop.f32.mrf.mxu0  ;;  %v5360_v47 = vld [vmem:[%s7135_s11 + $0x2d8] sm:$0xf] }
 0x134   : > { %v7539_v36 = vadd.f32 %v3493_v39, %v3325_v17 }
 0x136   : > { %8515 = vst [vmem:[#allocation24_spill] sm:$0xff] %v7539_v36 }
 0x137   : > { %v3157_v25 = vpop.f32.mrf.mxu2 }
 0x138   : > { %v3158_v6 = vadd.f32 %v3157_v25, %v2989_v59  ;;  %v3326_v50 = vpop.f32.mrf.mxu3  ;;  %v6523_v25 = vld [vmem:[%s7135_s11 + $0x2dc] sm:$0xf] }
 0x139   : > { %v2991_v10 = vpop.f32.mrf.mxu1 }
 0x13a   : > { %v3327_v39 = vadd.f32 %v3326_v50, %v3158_v6  ;;  %v2992_v41 = vadd.f32 %v2991_v10, %v7346_v45 }
 0x13b   : > { %v3498_v17 = vpop.f32.mrf.mxu0 }
 0x13c   : > { %3030 = vmatmul.bf16.gmra.mxu1 %v5321_v27  ;;  %3199 = vmatmul.bf16.gmra.mxu2 %v5325_v13  ;;  %v7548_v29 = vadd.f32 %v3495_v33, %v3327_v39  ;;  %v6527_v33 = vld [vmem:[%s7135_s11 + $0x2f8] sm:$0xf0]  ;;  %v5362_v27 = vld [vmem:[%s7135_s11 + $0x2fc] sm:$0xf0]  ;;  %v5357_v39 = vor.u32 %v6522_v57, %v5354_v60 }
 0x13d   : > { %3368 = vmatmul.bf16.gmra.mxu3 %v5329_v15  ;;  %v5368_v13 = vld [vmem:[%s7135_s11 + $0x2e0] sm:$0xf]  ;;  %v6528_v15 = vld [vmem:[%s7135_s11 + $0x300] sm:$0xf0] }
 0x13e   : > { %8516 = vst [vmem:[#allocation25_spill] sm:$0xff] %v7548_v29  ;;  %3537 = vmatmul.bf16.gmra.mxu0 %v5333_v20 }
 0x13f   : > { %v3160_v30 = vpop.f32.mrf.mxu2 }
 0x140   : > { %v3161_v5 = vadd.f32 %v3160_v30, %v2992_v41  ;;  %v3329_v11 = vpop.f32.mrf.mxu3  ;;  %v5361_v41 = vor.u32 %v6527_v33, %v5360_v47 }
 0x141   : > { %v2993_v51 = vpop.f32.mrf.mxu1 }
 0x142   : > { %v3330_v50 = vadd.f32 %v3329_v11, %v3161_v5  ;;  %v2994_v6 = vadd.f32 %v2993_v51, %v7354_v49  ;;  %v5365_v5 = vor.u32 %v6523_v25, %v5362_v27  ;;  %v5369_v11 = vor.u32 %v6528_v15, %v5368_v13  ;;  %v6772_v49 = vld [vmem:[%s8490_s1 + $0x1a0] sm:$0xff] }
 0x143   : > { %v3500_v19 = vpop.f32.mrf.mxu0  ;;  %v6780_v51 = vld [vmem:[%s8490_s1 + $0x1e0] sm:$0xff]  ;;  %3825 = vmatpush.bf16.msra.mxu2 %v6772_v49 }
 0x144   : > { %v7553_v59 = vadd.f32 %v3498_v17, %v3330_v50  ;;  %3994 = vmatpush.bf16.msra.mxu3 %v6780_v51  ;;  %v6764_v25 = vld [vmem:[%s8490_s1 + $0x160] sm:$0xff] }
 0x145   : > { %v5390_v27 = vld [vmem:[%s7135_s11 + $0x33c] sm:$0xf0]  ;;  %3656 = vmatpush.bf16.msra.mxu1 %v6764_v25 }
 0x146   : > { %v5396_v15 = vld [vmem:[%s7135_s11 + $0x320] sm:$0xf] }
 0x147   : > { %v3162_v45 = vpop.f32.mrf.mxu2 }
 0x148   : > { %v3163_v10 = vadd.f32 %v3162_v45, %v2994_v6  ;;  %v3331_v20 = vpop.f32.mrf.mxu3  ;;  %v6531_v6 = vld [vmem:[%s7135_s11 + $0x31c] sm:$0xf]  ;;  %v6536_v45 = vld [vmem:[%s7135_s11 + $0x340] sm:$0xf0] }
 0x149   : > { %v2996_v30 = vpop.f32.mrf.mxu1  ;;  %v5393_v51 = vor.u32 %v6531_v6, %v5390_v27 }
 0x14a   : > { %v3332_v29 = vadd.f32 %v3331_v20, %v3163_v10  ;;  %v2997_v50 = vadd.f32 %v2996_v30, %v7370_v1  ;;  %v6788_v1 = vld [vmem:[%s8490_s1 + $0x220] sm:$0xff]  ;;  %v6537_v30 = vld [vmem:[%s7135_s11 + $0x348] sm:$0xf0] }
 0x14b   : > { %v3503_v36 = vpop.f32.mrf.mxu0  ;;  %4163 = vmatpush.bf16.msra.mxu0 %v6788_v1  ;;  %v6532_v10 = vld [vmem:[%s7135_s11 + $0x324] sm:$0xf] }
 0x14c   : > { %3035 = vmatmul.bf16.gmra.mxu1 %v5357_v39  ;;  %3204 = vmatmul.bf16.gmra.mxu2 %v5361_v41  ;;  %v7562_v17 = vadd.f32 %v3500_v19, %v3332_v29  ;;  %v5398_v39 = vld [vmem:[%s7135_s11 + $0x344] sm:$0xf0] }
 0x14d   : > { %3373 = vmatmul.bf16.gmra.mxu3 %v5365_v5  ;;  %v5404_v41 = vld [vmem:[%s7135_s11 + $0x328] sm:$0xf] }
 0x14e   : > { %3542 = vmatmul.bf16.gmra.mxu0 %v5369_v11 }
 0x14f   : > { %v3165_v57 = vpop.f32.mrf.mxu2 }
 0x150   : > { %v3166_v29 = vadd.f32 %v3165_v57, %v2997_v50  ;;  %v3334_v19 = vpop.f32.mrf.mxu3  ;;  %v5397_v50 = vor.u32 %v6536_v45, %v5396_v15 }
 0x151   : > { %v2998_v60 = vpop.f32.mrf.mxu1 }
 0x152   : > { %v3335_v47 = vadd.f32 %v3334_v19, %v3166_v29  ;;  %v2999_v20 = vadd.f32 %v2998_v60, %v7387_v8  ;;  %v5401_v29 = vor.u32 %v6532_v10, %v5398_v39  ;;  %v5405_v19 = vor.u32 %v6537_v30, %v5404_v41  ;;  %v6540_v10 = vld [vmem:[%s7135_s11 + $0x364] sm:$0xf]  ;;  %v5432_v41 = vld [vmem:[%s7135_s11 + $0x368] sm:$0xf]  ;;  %v6541_v30 = vld [vmem:[%s7135_s11 + $0x36c] sm:$0xf] }
 0x153   : > { %v3505_v33 = vpop.f32.mrf.mxu0 }
 0x154   : > { %v7579_v13 = vadd.f32 %v3503_v36, %v3335_v47 }
 0x157   : > { %v3167_v5 = vpop.f32.mrf.mxu2 }
 0x158   : > { %v3168_v11 = vadd.f32 %v3167_v5, %v2999_v20  ;;  %v3336_v49 = vpop.f32.mrf.mxu3  ;;  %v5426_v20 = vld [vmem:[%s7135_s11 + $0x384] sm:$0xf0] }
 0x159   : > { %v3001_v57 = vpop.f32.mrf.mxu1 }
 0x15a   : > { %v3337_v36 = vadd.f32 %v3336_v49, %v3168_v11  ;;  %v3002_v60 = vadd.f32 %v3001_v57, %v7406_v31  ;;  %v5434_v11 = vld [vmem:[%s7135_s11 + $0x38c] sm:$0xf0] }
 0x15b   : > { %v3508_v47 = vpop.f32.mrf.mxu0  ;;  %v5440_v49 = vld [vmem:[%s7135_s11 + $0x370] sm:$0xf] }
 0x15c   : > { %3040 = vmatmul.bf16.gmra.mxu1 %v5393_v51  ;;  %3209 = vmatmul.bf16.gmra.mxu2 %v5397_v50  ;;  %v7588_v8 = vadd.f32 %v3505_v33, %v3337_v36  ;;  %v6545_v33 = vld [vmem:[%s7135_s11 + $0x388] sm:$0xf0]  ;;  %v6546_v51 = vld [vmem:[%s7135_s11 + $0x390] sm:$0xf0] }
 0x15d   : > { %3378 = vmatmul.bf16.gmra.mxu3 %v5401_v29  ;;  %v5429_v29 = vor.u32 %v6540_v10, %v5426_v20 }
 0x15e   : > { %3547 = vmatmul.bf16.gmra.mxu0 %v5405_v19  ;;  %v5433_v19 = vor.u32 %v6545_v33, %v5432_v41 }
 0x15f   : > { %v3170_v25 = vpop.f32.mrf.mxu2 }
 0x160   : > { %v3171_v1 = vadd.f32 %v3170_v25, %v3002_v60  ;;  %v3339_v6 = vpop.f32.mrf.mxu3  ;;  %v5437_v60 = vor.u32 %v6541_v30, %v5434_v11  ;;  %v5441_v25 = vor.u32 %v6546_v51, %v5440_v49  ;;  %v6549_v30 = vld [vmem:[%s7135_s11 + $0x3ac] sm:$0xf]  ;;  %v5468_v49 = vld [vmem:[%s7135_s11 + $0x3b0] sm:$0xf]  ;;  %v6550_v51 = vld [vmem:[%s7135_s11 + $0x3b4] sm:$0xf] }
 0x161   : > { %v3003_v27 = vpop.f32.mrf.mxu1 }
 0x162   : > { %v3340_v15 = vadd.f32 %v3339_v6, %v3171_v1  ;;  %v3004_v5 = vadd.f32 %v3003_v27, %v7414_v35 }
 0x163   : > { %v3510_v45 = vpop.f32.mrf.mxu0 }
 0x164   : > { %v7593_v39 = vadd.f32 %v3508_v47, %v3340_v15 }
 0x167   : > { %v3172_v31 = vpop.f32.mrf.mxu2 }
 0x168   : > { %v3173_v50 = vadd.f32 %v3172_v31, %v3004_v5  ;;  %v3341_v57 = vpop.f32.mrf.mxu3  ;;  %v5462_v5 = vld [vmem:[%s7135_s11 + $0x3cc] sm:$0xf0] }
 0x169   : > { %v3006_v36 = vpop.f32.mrf.mxu1 }
 0x16a   : > { %v3342_v47 = vadd.f32 %v3341_v57, %v3173_v50  ;;  %v3007_v6 = vadd.f32 %v3006_v36, %v7430_v61  ;;  %v5470_v50 = vld [vmem:[%s7135_s11 + $0x3d4] sm:$0xf0] }
 0x16b   : > { %v3513_v1 = vpop.f32.mrf.mxu0  ;;  %v5476_v57 = vld [vmem:[%s7135_s11 + $0x3b8] sm:$0xf] }
 0x16c   : > { %3045 = vmatmul.bf16.gmra.mxu1 %v5429_v29  ;;  %3214 = vmatmul.bf16.gmra.mxu2 %v5433_v19  ;;  %v7602_v35 = vadd.f32 %v3510_v45, %v3342_v47  ;;  %v6554_v45 = vld [vmem:[%s7135_s11 + $0x3d0] sm:$0xf0]  ;;  %v6555_v29 = vld [vmem:[%s7135_s11 + $0x3d8] sm:$0xf0] }
 0x16d   : > { %3383 = vmatmul.bf16.gmra.mxu3 %v5437_v60  ;;  %v5465_v60 = vor.u32 %v6549_v30, %v5462_v5 }
 0x16e   : > { %3552 = vmatmul.bf16.gmra.mxu0 %v5441_v25  ;;  %v5469_v25 = vor.u32 %v6554_v45, %v5468_v49 }
 0x16f   : > { %v3175_v27 = vpop.f32.mrf.mxu2 }
 0x170   : > { %v3176_v15 = vadd.f32 %v3175_v27, %v3007_v6  ;;  %v3344_v10 = vpop.f32.mrf.mxu3  ;;  %v5473_v6 = vor.u32 %v6550_v51, %v5470_v50  ;;  %v5477_v27 = vor.u32 %v6555_v29, %v5476_v57  ;;  %v6558_v51 = vld [vmem:[%s7135_s11 + $0x3f4] sm:$0xf]  ;;  %v5504_v57 = vld [vmem:[%s7135_s11 + $0x3f8] sm:$0xf]  ;;  %v6559_v29 = vld [vmem:[%s7135_s11 + $0x3fc] sm:$0xf] }
 0x171   : > { %v3008_v20 = vpop.f32.mrf.mxu1 }
 0x172   : > { %v3345_v41 = vadd.f32 %v3344_v10, %v3176_v15  ;;  %v3009_v31 = vadd.f32 %v3008_v20, %v7438_v3 }
 0x173   : > { %v3515_v33 = vpop.f32.mrf.mxu0 }
 0x174   : > { %v7607_v11 = vadd.f32 %v3513_v1, %v3345_v41 }
 0x177   : > { %v3177_v61 = vpop.f32.mrf.mxu2 }
 0x178   : > { %v3178_v19 = vadd.f32 %v3177_v61, %v3009_v31  ;;  %v3346_v36 = vpop.f32.mrf.mxu3  ;;  %v5498_v31 = vld [vmem:[%s7135_s11 + $0x414] sm:$0xf0] }
 0x179   : > { %v3011_v47 = vpop.f32.mrf.mxu1 }
 0x17a   : > { %v3347_v1 = vadd.f32 %v3346_v36, %v3178_v19  ;;  %v3012_v10 = vadd.f32 %v3011_v47, %v7454_v37  ;;  %v5506_v19 = vld [vmem:[%s7135_s11 + $0x41c] sm:$0xf0] }
 0x17b   : > { %v3518_v15 = vpop.f32.mrf.mxu0  ;;  %v5512_v36 = vld [vmem:[%s7135_s11 + $0x400] sm:$0xf] }
 0x17c   : > { %3050 = vmatmul.bf16.gmra.mxu1 %v5465_v60  ;;  %3219 = vmatmul.bf16.gmra.mxu2 %v5469_v25  ;;  %v7616_v3 = vadd.f32 %v3515_v33, %v3347_v1  ;;  %v6563_v33 = vld [vmem:[%s7135_s11 + $0x418] sm:$0xf0]  ;;  %v6564_v60 = vld [vmem:[%s7135_s11 + $0x420] sm:$0xf0] }
 0x17d   : > { %3388 = vmatmul.bf16.gmra.mxu3 %v5473_v6  ;;  %v5501_v6 = vor.u32 %v6558_v51, %v5498_v31 }
 0x17e   : > { %3557 = vmatmul.bf16.gmra.mxu0 %v5477_v27  ;;  %v5505_v27 = vor.u32 %v6563_v33, %v5504_v57 }
 0x17f   : > { %v3180_v20 = vpop.f32.mrf.mxu2 }
 0x180   : > { %v3181_v41 = vadd.f32 %v3180_v20, %v3012_v10  ;;  %v3349_v30 = vpop.f32.mrf.mxu3  ;;  %v5509_v10 = vor.u32 %v6559_v29, %v5506_v19  ;;  %v5513_v20 = vor.u32 %v6564_v60, %v5512_v36  ;;  %v6567_v19 = vld [vmem:[%s7135_s11 + $0x43c] sm:$0xf]  ;;  %v5534_v36 = vld [vmem:[%s7135_s11 + $0x45c] sm:$0xf0] }
 0x181   : > { %v3013_v5 = vpop.f32.mrf.mxu1 }
 0x182   : > { %v3350_v49 = vadd.f32 %v3349_v30, %v3181_v41  ;;  %v3014_v61 = vadd.f32 %v3013_v5, %v7462_v44  ;;  %v6771_v44 = vld [vmem:[%s8490_s1 + $0x198] sm:$0xff] }
 0x183   : > { %v3520_v45 = vpop.f32.mrf.mxu0  ;;  %v6779_v5 = vld [vmem:[%s8490_s1 + $0x1d8] sm:$0xff]  ;;  %3826 = vmatpush.bf16.msra.mxu2 %v6771_v44 }
 0x184   : > { %v7621_v50 = vadd.f32 %v3518_v15, %v3350_v49  ;;  %3995 = vmatpush.bf16.msra.mxu3 %v6779_v5  ;;  %v5537_v5 = vor.u32 %v6567_v19, %v5534_v36 }
 0x187   : > { %v3182_v37 = vpop.f32.mrf.mxu2 }
 0x188   : > { %v3183_v25 = vadd.f32 %v3182_v37, %v3014_v61  ;;  %v3351_v47 = vpop.f32.mrf.mxu3  ;;  %v6763_v61 = vld [vmem:[%s8490_s1 + $0x158] sm:$0xff]  ;;  %v5540_v37 = vld [vmem:[%s7135_s11 + $0x440] sm:$0xf] }
 0x189   : > { %v3016_v1 = vpop.f32.mrf.mxu1  ;;  %3657 = vmatpush.bf16.msra.mxu1 %v6763_v61 }
 0x18a   : > { %v3352_v41 = vadd.f32 %v3351_v47, %v3183_v25  ;;  %v3017_v49 = vadd.f32 %v3016_v1, %v7478_v21  ;;  %v6787_v21 = vld [vmem:[%s8490_s1 + $0x218] sm:$0xff]  ;;  %v6572_v25 = vld [vmem:[%s7135_s11 + $0x460] sm:$0xf0]  ;;  %v5548_v1 = vld [vmem:[%s7135_s11 + $0x448] sm:$0xf] }
 0x18b   : > { %v3523_v30 = vpop.f32.mrf.mxu0  ;;  %4164 = vmatpush.bf16.msra.mxu0 %v6787_v21  ;;  %v6568_v47 = vld [vmem:[%s7135_s11 + $0x444] sm:$0xf] }
 0x18c   : > { %3055 = vmatmul.bf16.gmra.mxu1 %v5501_v6  ;;  %3224 = vmatmul.bf16.gmra.mxu2 %v5505_v27  ;;  %v7630_v15 = vadd.f32 %v3520_v45, %v3352_v41  ;;  %v5542_v27 = vld [vmem:[%s7135_s11 + $0x464] sm:$0xf0] }
 0x18d   : > { %3393 = vmatmul.bf16.gmra.mxu3 %v5509_v10  ;;  %v6573_v10 = vld [vmem:[%s7135_s11 + $0x468] sm:$0xf0] }
 0x18e   : > { %3562 = vmatmul.bf16.gmra.mxu0 %v5513_v20 }
 0x18f   : > { %v3185_v51 = vpop.f32.mrf.mxu2 }
 0x190   : > { %v3186_v45 = vadd.f32 %v3185_v51, %v3017_v49  ;;  %v3354_v31 = vpop.f32.mrf.mxu3  ;;  %v5541_v49 = vor.u32 %v6572_v25, %v5540_v37 }
 0x191   : > { %v3018_v57 = vpop.f32.mrf.mxu1 }
 0x192   : > { %v3355_v33 = vadd.f32 %v3354_v31, %v3186_v45  ;;  %v3019_v6 = vadd.f32 %v3018_v57, %v7492_v55  ;;  %v5545_v45 = vor.u32 %v6568_v47, %v5542_v27  ;;  %v5549_v31 = vor.u32 %v6573_v10, %v5548_v1  ;;  %v6576_v47 = vld [vmem:[%s7135_s11 + $0x484] sm:$0xf]  ;;  %v5576_v1 = vld [vmem:[%s7135_s11 + $0x488] sm:$0xf]  ;;  %v6577_v10 = vld [vmem:[%s7135_s11 + $0x48c] sm:$0xf] }
 0x193   : > { %v3525_v29 = vpop.f32.mrf.mxu0 }
 0x194   : > { %v7647_v60 = vadd.f32 %v3523_v30, %v3355_v33 }
 0x197   : > { %v3187_v20 = vpop.f32.mrf.mxu2 }
 0x198   : > { %v3188_v41 = vadd.f32 %v3187_v20, %v3019_v6  ;;  %v3356_v44 = vpop.f32.mrf.mxu3  ;;  %v5570_v6 = vld [vmem:[%s7135_s11 + $0x4a4] sm:$0xf0] }
 0x199   : > { %v3021_v51 = vpop.f32.mrf.mxu1 }
 0x19a   : > { %v3357_v30 = vadd.f32 %v3356_v44, %v3188_v41  ;;  %v3022_v57 = vadd.f32 %v3021_v51, %v7514_v53  ;;  %v5578_v41 = vld [vmem:[%s7135_s11 + $0x4ac] sm:$0xf0] }
 0x19b   : > { %v3528_v33 = vpop.f32.mrf.mxu0  ;;  %v5584_v44 = vld [vmem:[%s7135_s11 + $0x490] sm:$0xf] }
 0x19c   : > { %3060 = vmatmul.bf16.gmra.mxu1 %v5537_v5  ;;  %3229 = vmatmul.bf16.gmra.mxu2 %v5541_v49  ;;  %v7656_v55 = vadd.f32 %v3525_v29, %v3357_v30  ;;  %v6581_v29 = vld [vmem:[%s7135_s11 + $0x4a8] sm:$0xf0]  ;;  %v6582_v5 = vld [vmem:[%s7135_s11 + $0x4b0] sm:$0xf0] }
 0x19d   : > { %3398 = vmatmul.bf16.gmra.mxu3 %v5545_v45  ;;  %v5573_v45 = vor.u32 %v6576_v47, %v5570_v6 }
 0x19e   : > { %3567 = vmatmul.bf16.gmra.mxu0 %v5549_v31  ;;  %v5577_v31 = vor.u32 %v6581_v29, %v5576_v1 }
 0x19f   : > { %v3190_v61 = vpop.f32.mrf.mxu2 }
 0x1a0   : > { %v3191_v21 = vadd.f32 %v3190_v61, %v3022_v57  ;;  %v3359_v19 = vpop.f32.mrf.mxu3  ;;  %v5581_v57 = vor.u32 %v6577_v10, %v5578_v41  ;;  %v5585_v61 = vor.u32 %v6582_v5, %v5584_v44  ;;  %v6585_v10 = vld [vmem:[%s7135_s11 + $0x4cc] sm:$0xf]  ;;  %v5612_v44 = vld [vmem:[%s7135_s11 + $0x4d0] sm:$0xf]  ;;  %v6586_v5 = vld [vmem:[%s7135_s11 + $0x4d4] sm:$0xf] }
 0x1a1   : > { %v3023_v36 = vpop.f32.mrf.mxu1 }
 0x1a2   : > { %v3360_v37 = vadd.f32 %v3359_v19, %v3191_v21  ;;  %v3024_v20 = vadd.f32 %v3023_v36, %v7522_v12 }
 0x1a3   : > { %v3530_v25 = vpop.f32.mrf.mxu0 }
 0x1a4   : > { %v7661_v27 = vadd.f32 %v3528_v33, %v3360_v37 }
 0x1a7   : > { %v3192_v53 = vpop.f32.mrf.mxu2 }
 0x1a8   : > { %v3193_v49 = vadd.f32 %v3192_v53, %v3024_v20  ;;  %v3361_v51 = vpop.f32.mrf.mxu3  ;;  %v5606_v20 = vld [vmem:[%s7135_s11 + $0x4ec] sm:$0xf0] }
 0x1a9   : > { %v3026_v30 = vpop.f32.mrf.mxu1 }
 0x1aa   : > { %v3362_v33 = vadd.f32 %v3361_v51, %v3193_v49  ;;  %v3027_v19 = vadd.f32 %v3026_v30, %v7320_v22  ;;  %v5614_v49 = vld [vmem:[%s7135_s11 + $0x4f4] sm:$0xf0] }
 0x1ab   : > { %v3533_v21 = vpop.f32.mrf.mxu0  ;;  %v5620_v51 = vld [vmem:[%s7135_s11 + $0x4d8] sm:$0xf] }
 0x1ac   : > { %3065 = vmatmul.bf16.gmra.mxu1 %v5573_v45  ;;  %3234 = vmatmul.bf16.gmra.mxu2 %v5577_v31  ;;  %v7670_v12 = vadd.f32 %v3530_v25, %v3362_v33  ;;  %v6590_v25 = vld [vmem:[%s7135_s11 + $0x4f0] sm:$0xf0]  ;;  %v6591_v45 = vld [vmem:[%s7135_s11 + $0x4f8] sm:$0xf0] }
 0x1ad   : > { %3403 = vmatmul.bf16.gmra.mxu3 %v5581_v57  ;;  %v5609_v57 = vor.u32 %v6585_v10, %v5606_v20 }
 0x1ae   : > { %3572 = vmatmul.bf16.gmra.mxu0 %v5585_v61  ;;  %v5613_v61 = vor.u32 %v6590_v25, %v5612_v44 }
 0x1af   : > { %v3195_v36 = vpop.f32.mrf.mxu2 }
 0x1b0   : > { %v3196_v37 = vadd.f32 %v3195_v36, %v3027_v19  ;;  %v3364_v47 = vpop.f32.mrf.mxu3  ;;  %v5617_v19 = vor.u32 %v6586_v5, %v5614_v49  ;;  %v5621_v36 = vor.u32 %v6591_v45, %v5620_v51  ;;  %v6594_v5 = vld [vmem:[%s7135_s11 + $0x514] sm:$0xf]  ;;  %v5648_v51 = vld [vmem:[%s7135_s11 + $0x518] sm:$0xf]  ;;  %v6595_v45 = vld [vmem:[%s7135_s11 + $0x51c] sm:$0xf] }
 0x1b1   : > { %v3028_v6 = vpop.f32.mrf.mxu1 }
 0x1b2   : > { %v3365_v1 = vadd.f32 %v3364_v47, %v3196_v37  ;;  %v3029_v53 = vadd.f32 %v3028_v6, %v7328_v28 }
 0x1b3   : > { %v3535_v29 = vpop.f32.mrf.mxu0 }
 0x1b4   : > { %v7675_v41 = vadd.f32 %v3533_v21, %v3365_v1 }
 0x1b7   : > { %v3197_v22 = vpop.f32.mrf.mxu2 }
 0x1b8   : > { %v3198_v31 = vadd.f32 %v3197_v22, %v3029_v53  ;;  %v3366_v30 = vpop.f32.mrf.mxu3  ;;  %v5642_v53 = vld [vmem:[%s7135_s11 + $0x534] sm:$0xf0] }
 0x1b9   : > { %v3031_v33 = vpop.f32.mrf.mxu1 }
 0x1ba   : > { %v3367_v21 = vadd.f32 %v3366_v30, %v3198_v31  ;;  %v3032_v47 = vadd.f32 %v3031_v33, %v7344_v42  ;;  %v5650_v31 = vld [vmem:[%s7135_s11 + $0x53c] sm:$0xf0] }
 0x1bb   : > { %v3538_v37 = vpop.f32.mrf.mxu0  ;;  %v5656_v30 = vld [vmem:[%s7135_s11 + $0x520] sm:$0xf] }
 0x1bc   : > { %3070 = vmatmul.bf16.gmra.mxu1 %v5609_v57  ;;  %3239 = vmatmul.bf16.gmra.mxu2 %v5613_v61  ;;  %v7684_v28 = vadd.f32 %v3535_v29, %v3367_v21  ;;  %v6599_v29 = vld [vmem:[%s7135_s11 + $0x538] sm:$0xf0]  ;;  %v6600_v57 = vld [vmem:[%s7135_s11 + $0x540] sm:$0xf0] }
 0x1bd   : > { %3408 = vmatmul.bf16.gmra.mxu3 %v5617_v19  ;;  %v5645_v19 = vor.u32 %v6594_v5, %v5642_v53 }
 0x1be   : > { %3577 = vmatmul.bf16.gmra.mxu0 %v5621_v36  ;;  %v5649_v36 = vor.u32 %v6599_v29, %v5648_v51 }
 0x1bf   : > { %v3200_v6 = vpop.f32.mrf.mxu2 }
 0x1c0   : > { %v3201_v1 = vadd.f32 %v3200_v6, %v3032_v47  ;;  %v3369_v10 = vpop.f32.mrf.mxu3  ;;  %v5653_v47 = vor.u32 %v6595_v45, %v5650_v31  ;;  %v5657_v6 = vor.u32 %v6600_v57, %v5656_v30  ;;  %v6603_v31 = vld [vmem:[%s7135_s11 + $0x55c] sm:$0xf]  ;;  %v5678_v30 = vld [vmem:[%s7135_s11 + $0x57c] sm:$0xf0] }
 0x1c1   : > { %v3033_v20 = vpop.f32.mrf.mxu1 }
 0x1c2   : > { %v3370_v44 = vadd.f32 %v3369_v10, %v3201_v1  ;;  %v3034_v22 = vadd.f32 %v3033_v20, %v7352_v48  ;;  %v6770_v48 = vld [vmem:[%s8490_s1 + $0x190] sm:$0xff] }
 0x1c3   : > { %v3540_v25 = vpop.f32.mrf.mxu0  ;;  %v6778_v20 = vld [vmem:[%s8490_s1 + $0x1d0] sm:$0xff]  ;;  %3827 = vmatpush.bf16.msra.mxu2 %v6770_v48 }
 0x1c4   : > { %v7689_v49 = vadd.f32 %v3538_v37, %v3370_v44  ;;  %3996 = vmatpush.bf16.msra.mxu3 %v6778_v20  ;;  %v5681_v20 = vor.u32 %v6603_v31, %v5678_v30 }
 0x1c7   : > { %v3202_v42 = vpop.f32.mrf.mxu2 }
 0x1c8   : > { %v3203_v61 = vadd.f32 %v3202_v42, %v3034_v22  ;;  %v3371_v33 = vpop.f32.mrf.mxu3  ;;  %v6762_v22 = vld [vmem:[%s8490_s1 + $0x150] sm:$0xff]  ;;  %v5684_v42 = vld [vmem:[%s7135_s11 + $0x560] sm:$0xf] }
 0x1c9   : > { %v3036_v21 = vpop.f32.mrf.mxu1  ;;  %3658 = vmatpush.bf16.msra.mxu1 %v6762_v22 }
 0x1ca   : > { %v3372_v1 = vadd.f32 %v3371_v33, %v3203_v61  ;;  %v3037_v44 = vadd.f32 %v3036_v21, %v7368_v62  ;;  %v6786_v62 = vld [vmem:[%s8490_s1 + $0x210] sm:$0xff]  ;;  %v6608_v61 = vld [vmem:[%s7135_s11 + $0x580] sm:$0xf0]  ;;  %v5692_v21 = vld [vmem:[%s7135_s11 + $0x568] sm:$0xf] }
 0x1cb   : > { %v3543_v10 = vpop.f32.mrf.mxu0  ;;  %4165 = vmatpush.bf16.msra.mxu0 %v6786_v62  ;;  %v6604_v33 = vld [vmem:[%s7135_s11 + $0x564] sm:$0xf] }
 0x1cc   : > { %3075 = vmatmul.bf16.gmra.mxu1 %v5645_v19  ;;  %3244 = vmatmul.bf16.gmra.mxu2 %v5649_v36  ;;  %v7698_v37 = vadd.f32 %v3540_v25, %v3372_v1  ;;  %v5686_v36 = vld [vmem:[%s7135_s11 + $0x584] sm:$0xf0] }
 0x1cd   : > { %3413 = vmatmul.bf16.gmra.mxu3 %v5653_v47  ;;  %v6609_v47 = vld [vmem:[%s7135_s11 + $0x588] sm:$0xf0] }
 0x1ce   : > { %3582 = vmatmul.bf16.gmra.mxu0 %v5657_v6 }
 0x1cf   : > { %v3205_v5 = vpop.f32.mrf.mxu2 }
 0x1d0   : > { %v3206_v25 = vadd.f32 %v3205_v5, %v3037_v44  ;;  %v3374_v53 = vpop.f32.mrf.mxu3  ;;  %v5685_v44 = vor.u32 %v6608_v61, %v5684_v42 }
 0x1d1   : > { %v3038_v51 = vpop.f32.mrf.mxu1 }
 0x1d2   : > { %v3375_v29 = vadd.f32 %v3374_v53, %v3206_v25  ;;  %v3039_v19 = vadd.f32 %v3038_v51, %v7385_v7  ;;  %v5689_v25 = vor.u32 %v6604_v33, %v5686_v36  ;;  %v5693_v53 = vor.u32 %v6609_v47, %v5692_v21  ;;  %v6612_v33 = vld [vmem:[%s7135_s11 + $0x5a4] sm:$0xf]  ;;  %v5720_v21 = vld [vmem:[%s7135_s11 + $0x5a8] sm:$0xf]  ;;  %v6613_v47 = vld [vmem:[%s7135_s11 + $0x5ac] sm:$0xf] }
 0x1d3   : > { %v3545_v45 = vpop.f32.mrf.mxu0 }
 0x1d4   : > { %v7715_v57 = vadd.f32 %v3543_v10, %v3375_v29 }
 0x1d7   : > { %v3207_v6 = vpop.f32.mrf.mxu2 }
 0x1d8   : > { %v3208_v1 = vadd.f32 %v3207_v6, %v3039_v19  ;;  %v3376_v48 = vpop.f32.mrf.mxu3  ;;  %v5714_v19 = vld [vmem:[%s7135_s11 + $0x5c4] sm:$0xf0] }
 0x1d9   : > { %v3041_v5 = vpop.f32.mrf.mxu1 }
 0x1da   : > { %v3377_v10 = vadd.f32 %v3376_v48, %v3208_v1  ;;  %v3042_v51 = vadd.f32 %v3041_v5, %v7404_v23  ;;  %v5722_v1 = vld [vmem:[%s7135_s11 + $0x5cc] sm:$0xf0] }
 0x1db   : > { %v3548_v29 = vpop.f32.mrf.mxu0  ;;  %v5728_v48 = vld [vmem:[%s7135_s11 + $0x5b0] sm:$0xf] }
 0x1dc   : > { %3080 = vmatmul.bf16.gmra.mxu1 %v5681_v20  ;;  %3249 = vmatmul.bf16.gmra.mxu2 %v5685_v44  ;;  %v7724_v7 = vadd.f32 %v3545_v45, %v3377_v10  ;;  %v6617_v45 = vld [vmem:[%s7135_s11 + $0x5c8] sm:$0xf0]  ;;  %v6618_v20 = vld [vmem:[%s7135_s11 + $0x5d0] sm:$0xf0] }
 0x1dd   : > { %3418 = vmatmul.bf16.gmra.mxu3 %v5689_v25  ;;  %v5717_v25 = vor.u32 %v6612_v33, %v5714_v19 }
 0x1de   : > { %3587 = vmatmul.bf16.gmra.mxu0 %v5693_v53  ;;  %v5721_v53 = vor.u32 %v6617_v45, %v5720_v21 }
 0x1df   : > { %v3210_v22 = vpop.f32.mrf.mxu2 }
 0x1e0   : > { %v3211_v62 = vadd.f32 %v3210_v22, %v3042_v51  ;;  %v3379_v31 = vpop.f32.mrf.mxu3  ;;  %v5725_v51 = vor.u32 %v6613_v47, %v5722_v1  ;;  %v5729_v22 = vor.u32 %v6618_v20, %v5728_v48  ;;  %v6621_v47 = vld [vmem:[%s7135_s11 + $0x5ec] sm:$0xf]  ;;  %v5756_v48 = vld [vmem:[%s7135_s11 + $0x5f0] sm:$0xf]  ;;  %v6622_v20 = vld [vmem:[%s7135_s11 + $0x5f4] sm:$0xf] }
 0x1e1   : > { %v3043_v30 = vpop.f32.mrf.mxu1 }
 0x1e2   : > { %v3380_v42 = vadd.f32 %v3379_v31, %v3211_v62  ;;  %v3044_v6 = vadd.f32 %v3043_v30, %v7412_v34 }
 0x1e3   : > { %v3550_v61 = vpop.f32.mrf.mxu0 }
 0x1e4   : > { %v7729_v36 = vadd.f32 %v3548_v29, %v3380_v42 }
 0x1e7   : > { %v3212_v23 = vpop.f32.mrf.mxu2 }
 0x1e8   : > { %v3213_v44 = vadd.f32 %v3212_v23, %v3044_v6  ;;  %v3381_v5 = vpop.f32.mrf.mxu3  ;;  %v5750_v6 = vld [vmem:[%s7135_s11 + $0x60c] sm:$0xf0] }
 0x1e9   : > { %v3046_v10 = vpop.f32.mrf.mxu1 }
 0x1ea   : > { %v3382_v29 = vadd.f32 %v3381_v5, %v3213_v44  ;;  %v3047_v31 = vadd.f32 %v3046_v10, %v7428_v56  ;;  %v5758_v44 = vld [vmem:[%s7135_s11 + $0x614] sm:$0xf0] }
 0x1eb   : > { %v3553_v62 = vpop.f32.mrf.mxu0  ;;  %v5764_v5 = vld [vmem:[%s7135_s11 + $0x5f8] sm:$0xf] }
 0x1ec   : > { %3085 = vmatmul.bf16.gmra.mxu1 %v5717_v25  ;;  %3254 = vmatmul.bf16.gmra.mxu2 %v5721_v53  ;;  %v7738_v34 = vadd.f32 %v3550_v61, %v3382_v29  ;;  %v6626_v61 = vld [vmem:[%s7135_s11 + $0x610] sm:$0xf0]  ;;  %v6627_v25 = vld [vmem:[%s7135_s11 + $0x618] sm:$0xf0] }
 0x1ed   : > { %3423 = vmatmul.bf16.gmra.mxu3 %v5725_v51  ;;  %v5753_v51 = vor.u32 %v6621_v47, %v5750_v6 }
 0x1ee   : > { %3592 = vmatmul.bf16.gmra.mxu0 %v5729_v22  ;;  %v5757_v22 = vor.u32 %v6626_v61, %v5756_v48 }
 0x1ef   : > { %v3215_v30 = vpop.f32.mrf.mxu2 }
 0x1f0   : > { %v3216_v42 = vadd.f32 %v3215_v30, %v3047_v31  ;;  %v3384_v33 = vpop.f32.mrf.mxu3  ;;  %v5761_v31 = vor.u32 %v6622_v20, %v5758_v44  ;;  %v5765_v30 = vor.u32 %v6627_v25, %v5764_v5  ;;  %v6630_v20 = vld [vmem:[%s7135_s11 + $0x634] sm:$0xf]  ;;  %v5792_v5 = vld [vmem:[%s7135_s11 + $0x638] sm:$0xf]  ;;  %v6631_v25 = vld [vmem:[%s7135_s11 + $0x63c] sm:$0xf] }
 0x1f1   : > { %v3048_v19 = vpop.f32.mrf.mxu1 }
 0x1f2   : > { %v3385_v21 = vadd.f32 %v3384_v33, %v3216_v42  ;;  %v3049_v23 = vadd.f32 %v3048_v19, %v7436_v2 }
 0x1f3   : > { %v3555_v45 = vpop.f32.mrf.mxu0 }
 0x1f4   : > { %v7743_v1 = vadd.f32 %v3553_v62, %v3385_v21 }
 0x1f7   : > { %v3217_v56 = vpop.f32.mrf.mxu2 }
 0x1f8   : > { %v3218_v53 = vadd.f32 %v3217_v56, %v3049_v23  ;;  %v3386_v10 = vpop.f32.mrf.mxu3  ;;  %v5786_v23 = vld [vmem:[%s7135_s11 + $0x654] sm:$0xf0] }
 0x1f9   : > { %v3051_v29 = vpop.f32.mrf.mxu1 }
 0x1fa   : > { %v3387_v62 = vadd.f32 %v3386_v10, %v3218_v53  ;;  %v3052_v33 = vadd.f32 %v3051_v29, %v7452_v24  ;;  %v5794_v53 = vld [vmem:[%s7135_s11 + $0x65c] sm:$0xf0] }
 0x1fb   : > { %v3558_v42 = vpop.f32.mrf.mxu0  ;;  %v5800_v10 = vld [vmem:[%s7135_s11 + $0x640] sm:$0xf] }
 0x1fc   : > { %3090 = vmatmul.bf16.gmra.mxu1 %v5753_v51  ;;  %3259 = vmatmul.bf16.gmra.mxu2 %v5757_v22  ;;  %v7752_v2 = vadd.f32 %v3555_v45, %v3387_v62  ;;  %v6635_v45 = vld [vmem:[%s7135_s11 + $0x658] sm:$0xf0]  ;;  %v6636_v51 = vld [vmem:[%s7135_s11 + $0x660] sm:$0xf0] }
 0x1fd   : > { %3428 = vmatmul.bf16.gmra.mxu3 %v5761_v31  ;;  %v5789_v31 = vor.u32 %v6630_v20, %v5786_v23 }
 0x1fe   : > { %3597 = vmatmul.bf16.gmra.mxu0 %v5765_v30  ;;  %v5793_v30 = vor.u32 %v6635_v45, %v5792_v5 }
 0x1ff   : > { %v3220_v19 = vpop.f32.mrf.mxu2 }
 0x200   : > { %v3221_v21 = vadd.f32 %v3220_v19, %v3052_v33  ;;  %v3389_v47 = vpop.f32.mrf.mxu3  ;;  %v5797_v33 = vor.u32 %v6631_v25, %v5794_v53  ;;  %v5801_v19 = vor.u32 %v6636_v51, %v5800_v10  ;;  %v6639_v53 = vld [vmem:[%s7135_s11 + $0x67c] sm:$0xf]  ;;  %v5822_v10 = vld [vmem:[%s7135_s11 + $0x69c] sm:$0xf0] }
 0x201   : > { %v3053_v6 = vpop.f32.mrf.mxu1 }
 0x202   : > { %v3390_v48 = vadd.f32 %v3389_v47, %v3221_v21  ;;  %v3054_v56 = vadd.f32 %v3053_v6, %v7460_v43  ;;  %v6769_v43 = vld [vmem:[%s8490_s1 + $0x188] sm:$0xff] }
 0x203   : > { %v3560_v61 = vpop.f32.mrf.mxu0  ;;  %v6777_v6 = vld [vmem:[%s8490_s1 + $0x1c8] sm:$0xff]  ;;  %3828 = vmatpush.bf16.msra.mxu2 %v6769_v43 }
 0x204   : > { %v7757_v44 = vadd.f32 %v3558_v42, %v3390_v48  ;;  %3997 = vmatpush.bf16.msra.mxu3 %v6777_v6  ;;  %v5825_v6 = vor.u32 %v6639_v53, %v5822_v10 }
 0x207   : > { %v3222_v24 = vpop.f32.mrf.mxu2 }
 0x208   : > { %v3223_v22 = vadd.f32 %v3222_v24, %v3054_v56  ;;  %v3391_v29 = vpop.f32.mrf.mxu3  ;;  %v6761_v56 = vld [vmem:[%s8490_s1 + $0x148] sm:$0xff]  ;;  %v5828_v24 = vld [vmem:[%s7135_s11 + $0x680] sm:$0xf] }
 0x209   : > { %v3056_v62 = vpop.f32.mrf.mxu1  ;;  %3659 = vmatpush.bf16.msra.mxu1 %v6761_v56 }
 0x20a   : > { %v3392_v21 = vadd.f32 %v3391_v29, %v3223_v22  ;;  %v3057_v48 = vadd.f32 %v3056_v62, %v7476_v14  ;;  %v6785_v14 = vld [vmem:[%s8490_s1 + $0x208] sm:$0xff]  ;;  %v6644_v22 = vld [vmem:[%s7135_s11 + $0x6a0] sm:$0xf0] }
 0x20b   : > { %v3563_v47 = vpop.f32.mrf.mxu0  ;;  %4166 = vmatpush.bf16.msra.mxu0 %v6785_v14  ;;  %v6640_v29 = vld [vmem:[%s7135_s11 + $0x684] sm:$0xf]  ;;  %v5836_v62 = vld [vmem:[%s7135_s11 + $0x688] sm:$0xf] }
 0x20c   : > { %3095 = vmatmul.bf16.gmra.mxu1 %v5789_v31  ;;  %3264 = vmatmul.bf16.gmra.mxu2 %v5793_v30  ;;  %v7766_v42 = vadd.f32 %v3560_v61, %v3392_v21  ;;  %v5830_v30 = vld [vmem:[%s7135_s11 + $0x6a4] sm:$0xf0] }
 0x20d   : > { %3433 = vmatmul.bf16.gmra.mxu3 %v5797_v33  ;;  %v6645_v33 = vld [vmem:[%s7135_s11 + $0x6a8] sm:$0xf0] }
 0x20e   : > { %3602 = vmatmul.bf16.gmra.mxu0 %v5801_v19 }
 0x20f   : > { %v3225_v20 = vpop.f32.mrf.mxu2 }
 0x210   : > { %v3226_v61 = vadd.f32 %v3225_v20, %v3057_v48  ;;  %v3394_v23 = vpop.f32.mrf.mxu3  ;;  %v5829_v48 = vor.u32 %v6644_v22, %v5828_v24 }
 0x211   : > { %v3058_v5 = vpop.f32.mrf.mxu1 }
 0x212   : > { %v3395_v45 = vadd.f32 %v3394_v23, %v3226_v61  ;;  %v3059_v31 = vadd.f32 %v3058_v5, %v7490_v54  ;;  %v5833_v61 = vor.u32 %v6640_v29, %v5830_v30  ;;  %v5837_v23 = vor.u32 %v6645_v33, %v5836_v62  ;;  %v6648_v29 = vld [vmem:[%s7135_s11 + $0x6c4] sm:$0xf]  ;;  %v5864_v62 = vld [vmem:[%s7135_s11 + $0x6c8] sm:$0xf]  ;;  %v6649_v33 = vld [vmem:[%s7135_s11 + $0x6cc] sm:$0xf] }
 0x213   : > { %v3565_v25 = vpop.f32.mrf.mxu0 }
 0x214   : > { %v7783_v51 = vadd.f32 %v3563_v47, %v3395_v45 }
 0x217   : > { %v3227_v19 = vpop.f32.mrf.mxu2 }
 0x218   : > { %v3228_v21 = vadd.f32 %v3227_v19, %v3059_v31  ;;  %v3396_v43 = vpop.f32.mrf.mxu3  ;;  %v5858_v31 = vld [vmem:[%s7135_s11 + $0x6e4] sm:$0xf0] }
 0x219   : > { %v3061_v20 = vpop.f32.mrf.mxu1 }
 0x21a   : > { %v3397_v47 = vadd.f32 %v3396_v43, %v3228_v21  ;;  %v3062_v5 = vadd.f32 %v3061_v20, %v7512_v0  ;;  %v5866_v21 = vld [vmem:[%s7135_s11 + $0x6ec] sm:$0xf0] }
 0x21b   : > { %v3568_v45 = vpop.f32.mrf.mxu0  ;;  %v5872_v43 = vld [vmem:[%s7135_s11 + $0x6d0] sm:$0xf] }
 0x21c   : > { %3100 = vmatmul.bf16.gmra.mxu1 %v5825_v6  ;;  %3269 = vmatmul.bf16.gmra.mxu2 %v5829_v48  ;;  %v7792_v54 = vadd.f32 %v3565_v25, %v3397_v47  ;;  %v6653_v25 = vld [vmem:[%s7135_s11 + $0x6e8] sm:$0xf0]  ;;  %v6654_v6 = vld [vmem:[%s7135_s11 + $0x6f0] sm:$0xf0] }
 0x21d   : > { %3438 = vmatmul.bf16.gmra.mxu3 %v5833_v61  ;;  %v5861_v61 = vor.u32 %v6648_v29, %v5858_v31 }
 0x21e   : > { %3607 = vmatmul.bf16.gmra.mxu0 %v5837_v23  ;;  %v5865_v23 = vor.u32 %v6653_v25, %v5864_v62 }
 0x21f   : > { %v3230_v56 = vpop.f32.mrf.mxu2 }
 0x220   : > { %v3231_v14 = vadd.f32 %v3230_v56, %v3062_v5  ;;  %v3399_v53 = vpop.f32.mrf.mxu3  ;;  %v5869_v5 = vor.u32 %v6649_v33, %v5866_v21  ;;  %v5873_v56 = vor.u32 %v6654_v6, %v5872_v43  ;;  %v6657_v33 = vld [vmem:[%s7135_s11 + $0x70c] sm:$0xf]  ;;  %v5900_v43 = vld [vmem:[%s7135_s11 + $0x710] sm:$0xf]  ;;  %v6658_v6 = vld [vmem:[%s7135_s11 + $0x714] sm:$0xf] }
 0x221   : > { %v3063_v10 = vpop.f32.mrf.mxu1 }
 0x222   : > { %v3400_v24 = vadd.f32 %v3399_v53, %v3231_v14  ;;  %v3064_v19 = vadd.f32 %v3063_v10, %v7520_v9 }
 0x223   : > { %v3570_v22 = vpop.f32.mrf.mxu0 }
 0x224   : > { %v7797_v30 = vadd.f32 %v3568_v45, %v3400_v24 }
 0x227   : > { %v3232_v0 = vpop.f32.mrf.mxu2 }
 0x228   : > { %v3233_v48 = vadd.f32 %v3232_v0, %v3064_v19  ;;  %v3401_v20 = vpop.f32.mrf.mxu3  ;;  %v5894_v19 = vld [vmem:[%s7135_s11 + $0x72c] sm:$0xf0] }
 0x229   : > { %v3066_v47 = vpop.f32.mrf.mxu1 }
 0x22a   : > { %v3402_v45 = vadd.f32 %v3401_v20, %v3233_v48  ;;  %v3067_v53 = vadd.f32 %v3066_v47, %v7324_v26  ;;  %v5902_v48 = vld [vmem:[%s7135_s11 + $0x734] sm:$0xf0] }
 0x22b   : > { %v3573_v14 = vpop.f32.mrf.mxu0  ;;  %v5908_v20 = vld [vmem:[%s7135_s11 + $0x718] sm:$0xf] }
 0x22c   : > { %3105 = vmatmul.bf16.gmra.mxu1 %v5861_v61  ;;  %3274 = vmatmul.bf16.gmra.mxu2 %v5865_v23  ;;  %v7806_v9 = vadd.f32 %v3570_v22, %v3402_v45  ;;  %v6662_v22 = vld [vmem:[%s7135_s11 + $0x730] sm:$0xf0]  ;;  %v6663_v61 = vld [vmem:[%s7135_s11 + $0x738] sm:$0xf0] }
 0x22d   : > { %3443 = vmatmul.bf16.gmra.mxu3 %v5869_v5  ;;  %v5897_v5 = vor.u32 %v6657_v33, %v5894_v19 }
 0x22e   : > { %3612 = vmatmul.bf16.gmra.mxu0 %v5873_v56  ;;  %v5901_v56 = vor.u32 %v6662_v22, %v5900_v43 }
 0x22f   : > { %v3235_v10 = vpop.f32.mrf.mxu2 }
 0x230   : > { %v3236_v24 = vadd.f32 %v3235_v10, %v3067_v53  ;;  %v3404_v29 = vpop.f32.mrf.mxu3  ;;  %v5905_v53 = vor.u32 %v6658_v6, %v5902_v48  ;;  %v5909_v10 = vor.u32 %v6663_v61, %v5908_v20  ;;  %v6666_v6 = vld [vmem:[%s7135_s11 + $0x754] sm:$0xf]  ;;  %v5936_v20 = vld [vmem:[%s7135_s11 + $0x758] sm:$0xf]  ;;  %v6667_v61 = vld [vmem:[%s7135_s11 + $0x75c] sm:$0xf] }
 0x231   : > { %v3068_v31 = vpop.f32.mrf.mxu1 }
 0x232   : > { %v3405_v62 = vadd.f32 %v3404_v29, %v3236_v24  ;;  %v3069_v0 = vadd.f32 %v3068_v31, %v7340_v38 }
 0x233   : > { %v3575_v25 = vpop.f32.mrf.mxu0 }
 0x234   : > { %v7811_v21 = vadd.f32 %v3573_v14, %v3405_v62 }
 0x237   : > { %v3237_v26 = vpop.f32.mrf.mxu2 }
 0x238   : > { %v3238_v23 = vadd.f32 %v3237_v26, %v3069_v0  ;;  %v3406_v47 = vpop.f32.mrf.mxu3  ;;  %v5930_v0 = vld [vmem:[%s7135_s11 + $0x774] sm:$0xf0] }
 0x239   : > { %v3071_v45 = vpop.f32.mrf.mxu1 }
 0x23a   : > { %v3407_v14 = vadd.f32 %v3406_v47, %v3238_v23  ;;  %v3072_v29 = vadd.f32 %v3071_v45, %v7348_v46  ;;  %v5938_v23 = vld [vmem:[%s7135_s11 + $0x77c] sm:$0xf0] }
 0x23b   : > { %v3578_v24 = vpop.f32.mrf.mxu0  ;;  %v5944_v47 = vld [vmem:[%s7135_s11 + $0x760] sm:$0xf] }
 0x23c   : > { %3110 = vmatmul.bf16.gmra.mxu1 %v5897_v5  ;;  %3279 = vmatmul.bf16.gmra.mxu2 %v5901_v56  ;;  %v7820_v38 = vadd.f32 %v3575_v25, %v3407_v14  ;;  %v6671_v25 = vld [vmem:[%s7135_s11 + $0x778] sm:$0xf0]  ;;  %v6672_v5 = vld [vmem:[%s7135_s11 + $0x780] sm:$0xf0] }
 0x23d   : > { %3448 = vmatmul.bf16.gmra.mxu3 %v5905_v53  ;;  %v5933_v53 = vor.u32 %v6666_v6, %v5930_v0 }
 0x23e   : > { %3617 = vmatmul.bf16.gmra.mxu0 %v5909_v10  ;;  %v5937_v10 = vor.u32 %v6671_v25, %v5936_v20 }
 0x23f   : > { %v3240_v31 = vpop.f32.mrf.mxu2 }
 0x240   : > { %v3241_v62 = vadd.f32 %v3240_v31, %v3072_v29  ;;  %v3409_v33 = vpop.f32.mrf.mxu3  ;;  %v5941_v29 = vor.u32 %v6667_v61, %v5938_v23  ;;  %v5945_v31 = vor.u32 %v6672_v5, %v5944_v47  ;;  %v6675_v23 = vld [vmem:[%s7135_s11 + $0x79c] sm:$0xf]  ;;  %v5966_v47 = vld [vmem:[%s7135_s11 + $0x7bc] sm:$0xf0] }
 0x241   : > { %v3073_v19 = vpop.f32.mrf.mxu1 }
 0x242   : > { %v3410_v43 = vadd.f32 %v3409_v33, %v3241_v62  ;;  %v3074_v26 = vadd.f32 %v3073_v19, %v7364_v58  ;;  %v6768_v58 = vld [vmem:[%s8490_s1 + $0x180] sm:$0xff] }
 0x243   : > { %v3580_v22 = vpop.f32.mrf.mxu0  ;;  %v6776_v19 = vld [vmem:[%s8490_s1 + $0x1c0] sm:$0xff]  ;;  %3829 = vmatpush.bf16.msra.mxu2 %v6768_v58 }
 0x244   : > { %v7825_v48 = vadd.f32 %v3578_v24, %v3410_v43  ;;  %3998 = vmatpush.bf16.msra.mxu3 %v6776_v19  ;;  %v5969_v19 = vor.u32 %v6675_v23, %v5966_v47 }
 0x247   : > { %v3242_v46 = vpop.f32.mrf.mxu2 }
 0x248   : > { %v3243_v56 = vadd.f32 %v3242_v46, %v3074_v26  ;;  %v3411_v45 = vpop.f32.mrf.mxu3  ;;  %v6760_v26 = vld [vmem:[%s8490_s1 + $0x140] sm:$0xff] }
 0x249   : > { %v3076_v14 = vpop.f32.mrf.mxu1  ;;  %3660 = vmatpush.bf16.msra.mxu1 %v6760_v26  ;;  %v5972_v46 = vld [vmem:[%s7135_s11 + $0x7a0] sm:$0xf] }
 0x24a   : > { %v3412_v62 = vadd.f32 %v3411_v45, %v3243_v56  ;;  %v3077_v43 = vadd.f32 %v3076_v14, %v7378_v4  ;;  %v6784_v4 = vld [vmem:[%s8490_s1 + $0x200] sm:$0xff]  ;;  %v5980_v14 = vld [vmem:[%s7135_s11 + $0x7a8] sm:$0xf] }
 0x24b   : > { %v3583_v33 = vpop.f32.mrf.mxu0  ;;  %4167 = vmatpush.bf16.msra.mxu0 %v6784_v4  ;;  %v6680_v56 = vld [vmem:[%s7135_s11 + $0x7c0] sm:$0xf0] }
 0x24c   : > { %3115 = vmatmul.bf16.gmra.mxu1 %v5933_v53  ;;  %3284 = vmatmul.bf16.gmra.mxu2 %v5937_v10  ;;  %v7834_v24 = vadd.f32 %v3580_v22, %v3412_v62  ;;  %v6676_v45 = vld [vmem:[%s7135_s11 + $0x7a4] sm:$0xf]  ;;  %v5974_v10 = vld [vmem:[%s7135_s11 + $0x7c4] sm:$0xf0] }
 0x24d   : > { %3453 = vmatmul.bf16.gmra.mxu3 %v5941_v29  ;;  %v6681_v29 = vld [vmem:[%s7135_s11 + $0x7c8] sm:$0xf0] }
 0x24e   : > { %3622 = vmatmul.bf16.gmra.mxu0 %v5945_v31 }
 0x24f   : > { %v3245_v6 = vpop.f32.mrf.mxu2 }
 0x250   : > { %v3246_v22 = vadd.f32 %v3245_v6, %v3077_v43  ;;  %v3414_v0 = vpop.f32.mrf.mxu3  ;;  %v5973_v43 = vor.u32 %v6680_v56, %v5972_v46 }
 0x251   : > { %v3078_v20 = vpop.f32.mrf.mxu1 }
 0x252   : > { %v3415_v25 = vadd.f32 %v3414_v0, %v3246_v22  ;;  %v3079_v53 = vadd.f32 %v3078_v20, %v7400_v18  ;;  %v5977_v22 = vor.u32 %v6676_v45, %v5974_v10  ;;  %v5981_v0 = vor.u32 %v6681_v29, %v5980_v14  ;;  %v6684_v45 = vld [vmem:[%s7135_s11 + $0x7e4] sm:$0xf]  ;;  %v6008_v14 = vld [vmem:[%s7135_s11 + $0x7e8] sm:$0xf]  ;;  %v6685_v29 = vld [vmem:[%s7135_s11 + $0x7ec] sm:$0xf] }
 0x253   : > { %v3585_v61 = vpop.f32.mrf.mxu0 }
 0x254   : > { %v7851_v5 = vadd.f32 %v3583_v33, %v3415_v25 }
 0x257   : > { %v3247_v31 = vpop.f32.mrf.mxu2 }
 0x258   : > { %v3248_v62 = vadd.f32 %v3247_v31, %v3079_v53  ;;  %v3416_v58 = vpop.f32.mrf.mxu3  ;;  %v6002_v53 = vld [vmem:[%s7135_s11 + $0x804] sm:$0xf0] }
 0x259   : > { %v3081_v6 = vpop.f32.mrf.mxu1 }
 0x25a   : > { %v3417_v33 = vadd.f32 %v3416_v58, %v3248_v62  ;;  %v3082_v20 = vadd.f32 %v3081_v6, %v7408_v32  ;;  %v6010_v62 = vld [vmem:[%s7135_s11 + $0x80c] sm:$0xf0] }
 0x25b   : > { %v3588_v25 = vpop.f32.mrf.mxu0  ;;  %v6016_v58 = vld [vmem:[%s7135_s11 + $0x7f0] sm:$0xf] }
 0x25c   : > { %3120 = vmatmul.bf16.gmra.mxu1 %v5969_v19  ;;  %3289 = vmatmul.bf16.gmra.mxu2 %v5973_v43  ;;  %v7860_v18 = vadd.f32 %v3585_v61, %v3417_v33  ;;  %v6689_v61 = vld [vmem:[%s7135_s11 + $0x808] sm:$0xf0]  ;;  %v6690_v19 = vld [vmem:[%s7135_s11 + $0x810] sm:$0xf0] }
 0x25d   : > { %3458 = vmatmul.bf16.gmra.mxu3 %v5977_v22  ;;  %v6005_v22 = vor.u32 %v6684_v45, %v6002_v53 }
 0x25e   : > { %3627 = vmatmul.bf16.gmra.mxu0 %v5981_v0  ;;  %v6009_v0 = vor.u32 %v6689_v61, %v6008_v14 }
 0x25f   : > { %v3250_v26 = vpop.f32.mrf.mxu2 }
 0x260   : > { %v3251_v4 = vadd.f32 %v3250_v26, %v3082_v20  ;;  %v3419_v23 = vpop.f32.mrf.mxu3  ;;  %v6013_v20 = vor.u32 %v6685_v29, %v6010_v62  ;;  %v6017_v26 = vor.u32 %v6690_v19, %v6016_v58  ;;  %v6693_v29 = vld [vmem:[%s7135_s11 + $0x82c] sm:$0xf]  ;;  %v6044_v58 = vld [vmem:[%s7135_s11 + $0x830] sm:$0xf]  ;;  %v6694_v19 = vld [vmem:[%s7135_s11 + $0x834] sm:$0xf] }
 0x261   : > { %v3083_v47 = vpop.f32.mrf.mxu1 }
 0x262   : > { %v3420_v46 = vadd.f32 %v3419_v23, %v3251_v4  ;;  %v3084_v31 = vadd.f32 %v3083_v47, %v7424_v52 }
 0x263   : > { %v3590_v56 = vpop.f32.mrf.mxu0 }
 0x264   : > { %v7865_v10 = vadd.f32 %v3588_v25, %v3420_v46 }
 0x266   : > { %8517 = vst [vmem:[#allocation26_spill] sm:$0xff] %v7865_v10 }
 0x267   : > { %v3252_v32 = vpop.f32.mrf.mxu2 }
 0x268   : > { %v3253_v43 = vadd.f32 %v3252_v32, %v3084_v31  ;;  %v3421_v6 = vpop.f32.mrf.mxu3  ;;  %v6038_v31 = vld [vmem:[%s7135_s11 + $0x84c] sm:$0xf0] }
 0x269   : > { %v3086_v33 = vpop.f32.mrf.mxu1 }
 0x26a   : > { %v3422_v25 = vadd.f32 %v3421_v6, %v3253_v43  ;;  %v3087_v23 = vadd.f32 %v3086_v33, %v7432_v63  ;;  %v6046_v43 = vld [vmem:[%s7135_s11 + $0x854] sm:$0xf0] }
 0x26b   : > { %v3593_v4 = vpop.f32.mrf.mxu0  ;;  %v6052_v6 = vld [vmem:[%s7135_s11 + $0x838] sm:$0xf] }
 0x26c   : > { %3125 = vmatmul.bf16.gmra.mxu1 %v6005_v22  ;;  %3294 = vmatmul.bf16.gmra.mxu2 %v6009_v0  ;;  %v7874_v52 = vadd.f32 %v3590_v56, %v3422_v25  ;;  %v6698_v56 = vld [vmem:[%s7135_s11 + $0x850] sm:$0xf0]  ;;  %v6699_v22 = vld [vmem:[%s7135_s11 + $0x858] sm:$0xf0] }
 0x26d   : > { %3463 = vmatmul.bf16.gmra.mxu3 %v6013_v20  ;;  %v6041_v20 = vor.u32 %v6693_v29, %v6038_v31 }
 0x26e   : > { %8518 = vst [vmem:[#allocation27_spill] sm:$0xff] %v7874_v52  ;;  %3632 = vmatmul.bf16.gmra.mxu0 %v6017_v26  ;;  %v6045_v26 = vor.u32 %v6698_v56, %v6044_v58 }
 0x26f   : > { %v3255_v47 = vpop.f32.mrf.mxu2 }
 0x270   : > { %v3256_v46 = vadd.f32 %v3255_v47, %v3087_v23  ;;  %v3424_v45 = vpop.f32.mrf.mxu3  ;;  %v6049_v23 = vor.u32 %v6694_v19, %v6046_v43  ;;  %v6053_v47 = vor.u32 %v6699_v22, %v6052_v6  ;;  %v6702_v19 = vld [vmem:[%s7135_s11 + $0x874] sm:$0xf]  ;;  %v6080_v6 = vld [vmem:[%s7135_s11 + $0x878] sm:$0xf]  ;;  %v6703_v22 = vld [vmem:[%s7135_s11 + $0x87c] sm:$0xf] }
 0x271   : > { %v3088_v53 = vpop.f32.mrf.mxu1 }
 0x272   : > { %v3425_v14 = vadd.f32 %v3424_v45, %v3256_v46  ;;  %v3089_v32 = vadd.f32 %v3088_v53, %v7448_v16 }
 0x273   : > { %v3595_v61 = vpop.f32.mrf.mxu0 }
 0x274   : > { %v7879_v62 = vadd.f32 %v3593_v4, %v3425_v14 }
 0x276   : > { %8519 = vst [vmem:[#allocation28_spill] sm:$0xff] %v7879_v62 }
 0x277   : > { %v3257_v63 = vpop.f32.mrf.mxu2 }
 0x278   : > { %v3258_v0 = vadd.f32 %v3257_v63, %v3089_v32  ;;  %v3426_v33 = vpop.f32.mrf.mxu3  ;;  %v6074_v32 = vld [vmem:[%s7135_s11 + $0x894] sm:$0xf0] }
 0x279   : > { %v3091_v25 = vpop.f32.mrf.mxu1  ;;  %v8522_v63 = vld [vmem:[#allocation14_spill] sm:$0xff] }
 0x27a   : > { %v3427_v4 = vadd.f32 %v3426_v33, %v3258_v0  ;;  %v3092_v45 = vadd.f32 %v3091_v25, %v7456_v40  ;;  %v6082_v33 = vld [vmem:[%s7135_s11 + $0x89c] sm:$0xf0] }
 0x27b   : > { %v3598_v46 = vpop.f32.mrf.mxu0 }
 0x27c   : > { %3130 = vmatmul.bf16.gmra.mxu1 %v6041_v20  ;;  %3299 = vmatmul.bf16.gmra.mxu2 %v6045_v26  ;;  %v7888_v16 = vadd.f32 %v3595_v61, %v3427_v4  ;;  %v6707_v61 = vld [vmem:[%s7135_s11 + $0x898] sm:$0xf0]  ;;  %v6088_v20 = vld [vmem:[%s7135_s11 + $0x880] sm:$0xf]  ;;  %v6708_v26 = vld [vmem:[%s7135_s11 + $0x8a0] sm:$0xf0] }
 0x27d   : > { %3468 = vmatmul.bf16.gmra.mxu3 %v6049_v23  ;;  %v6081_v4 = vor.u32 %v6707_v61, %v6080_v6 }
 0x27e   : > { %8520 = vst [vmem:[#allocation29_spill] sm:$0xff] %v7888_v16  ;;  %3637 = vmatmul.bf16.gmra.mxu0 %v6053_v47  ;;  %v6077_v47 = vor.u32 %v6702_v19, %v6074_v32 }
 0x27f   : > { %v3260_v53 = vpop.f32.mrf.mxu2 }
 0x280   : > { %v3261_v14 = vadd.f32 %v3260_v53, %v3092_v45  ;;  %v3429_v29 = vpop.f32.mrf.mxu3  ;;  %v6085_v53 = vor.u32 %v6703_v22, %v6082_v33  ;;  %v6711_v33 = vld [vmem:[%s7135_s11 + $0x8bc] sm:$0xf] }
 0x281   : > { %v3093_v31 = vpop.f32.mrf.mxu1 }
 0x282   : > { %v3430_v58 = vadd.f32 %v3429_v29, %v3261_v14  ;;  %v3094_v0 = vadd.f32 %v3093_v31, %v8522_v63  ;;  %v6089_v14 = vor.u32 %v6708_v26, %v6088_v20  ;;  %v6110_v20 = vld [vmem:[%s7135_s11 + $0x8dc] sm:$0xf0] }
 0x283   : > { %v3600_v56 = vpop.f32.mrf.mxu0 }
 0x284   : > { %v7893_v43 = vadd.f32 %v3598_v46, %v3430_v58  ;;  %v8524_v58 = vld [vmem:[#allocation16_spill] sm:$0xff] }
 0x286   : > { %8521 = vst [vmem:[#allocation30_spill] sm:$0xff] %v7893_v43 }
 0x287   : > { %v3262_v40 = vpop.f32.mrf.mxu2 }
 0x288   : > { %v3263_v25 = vadd.f32 %v3262_v40, %v3094_v0  ;;  %v3431_v23 = vpop.f32.mrf.mxu3  ;;  %v6116_v40 = vld [vmem:[%s7135_s11 + $0x8c0] sm:$0xf] }
 0x289   : > { %v3096_v45 = vpop.f32.mrf.mxu1 }
 0x28a   : > { %v3432_v46 = vadd.f32 %v3431_v23, %v3263_v25  ;;  %v3097_v19 = vadd.f32 %v3096_v45, %v8524_v58  ;;  %v6712_v25 = vld [vmem:[%s7135_s11 + $0x8c4] sm:$0xf]  ;;  %v8526_v23 = vld [vmem:[#allocation18_spill] sm:$0xff] }
 0x28b   : > { %v3603_v29 = vpop.f32.mrf.mxu0 }
 0x28c   : > { %3135 = vmatmul.bf16.gmra.mxu1 %v6077_v47  ;;  %3304 = vmatmul.bf16.gmra.mxu2 %v6081_v4  ;;  %v7902_v31 = vadd.f32 %v3600_v56, %v3432_v46  ;;  %v6716_v56 = vld [vmem:[%s7135_s11 + $0x8e0] sm:$0xf0]  ;;  %v6118_v4 = vld [vmem:[%s7135_s11 + $0x8e4] sm:$0xf0] }
 0x28d   : > { %3473 = vmatmul.bf16.gmra.mxu3 %v6085_v53  ;;  %v6124_v53 = vld [vmem:[%s7135_s11 + $0x8c8] sm:$0xf] }
 0x28e   : > { %8523 = vst [vmem:[#allocation14_spill] sm:$0xff] %v7902_v31  ;;  %3642 = vmatmul.bf16.gmra.mxu0 %v6089_v14  ;;  %v6717_v14 = vld [vmem:[%s7135_s11 + $0x8e8] sm:$0xf0] }
 0x28f   : > { %v3265_v32 = vpop.f32.mrf.mxu2 }
 0x290   : > { %v3266_v6 = vadd.f32 %v3265_v32, %v3097_v19  ;;  %v3434_v61 = vpop.f32.mrf.mxu3  ;;  %v6113_v19 = vor.u32 %v6711_v33, %v6110_v20  ;;  %v6117_v32 = vor.u32 %v6716_v56, %v6116_v40 }
 0x291   : > { %v3098_v22 = vpop.f32.mrf.mxu1 }
 0x292   : > { %v3435_v63 = vadd.f32 %v3434_v61, %v3266_v6  ;;  %v3099_v47 = vadd.f32 %v3098_v22, %v8526_v23  ;;  %v6121_v6 = vor.u32 %v6712_v25, %v6118_v4  ;;  %v6125_v61 = vor.u32 %v6717_v14, %v6124_v53  ;;  %v8528_v23 = vld [vmem:[#allocation20_spill] sm:$0xff]  ;;  %v6434_v53 = vld [vmem:[%s7135_s11 + $0x14] sm:$0xf]  ;;  %v5010_v14 = vld [vmem:[%s7135_s11 + $0x34] sm:$0xf0] }
 0x293   : > { %v3605_v0 = vpop.f32.mrf.mxu0 }
 0x294   : > { %v7907_v26 = vadd.f32 %v3603_v29, %v3435_v63 }
 0x296   : > { %8525 = vst [vmem:[#allocation16_spill] sm:$0xff] %v7907_v26 }
 0x297   : > { %v3267_v45 = vpop.f32.mrf.mxu2 }
 0x298   : > { %v3268_v46 = vadd.f32 %v3267_v45, %v3099_v47  ;;  %v3436_v58 = vpop.f32.mrf.mxu3 }
 0x299   : > { %v3101_v31 = vpop.f32.mrf.mxu1 }
 0x29a   : > { %v3437_v29 = vadd.f32 %v3436_v58, %v3268_v46  ;;  %v3102_v33 = vadd.f32 %v3101_v31, %v8528_v23  ;;  %v5016_v46 = vld [vmem:[%s7135_s11 + $0x18] sm:$0xf]  ;;  %v6435_v58 = vld [vmem:[%s7135_s11 + $0x1c] sm:$0xf] }
 0x29b   : > { %v3608_v63 = vpop.f32.mrf.mxu0 }
 0x29c   : > { %3140 = vmatmul.bf16.gmra.mxu1 %v6113_v19  ;;  %3309 = vmatmul.bf16.gmra.mxu2 %v6117_v32  ;;  %v7916_v22 = vadd.f32 %v3605_v0, %v3437_v29  ;;  %v6439_v0 = vld [vmem:[%s7135_s11 + $0x38] sm:$0xf0]  ;;  %v6440_v29 = vld [vmem:[%s7135_s11 + $0x40] sm:$0xf0] }
 0x29d   : > { %3478 = vmatmul.bf16.gmra.mxu3 %v6121_v6  ;;  %v8530_v19 = vld [vmem:[#allocation22_spill] sm:$0xff]  ;;  %v5018_v6 = vld [vmem:[%s7135_s11 + $0x3c] sm:$0xf0] }
 0x29e   : > { %8527 = vst [vmem:[#allocation18_spill] sm:$0xff] %v7916_v22  ;;  %3647 = vmatmul.bf16.gmra.mxu0 %v6125_v61  ;;  %v5024_v61 = vld [vmem:[%s7135_s11 + $0x20] sm:$0xf] }
 0x29f   : > { %v3270_v20 = vpop.f32.mrf.mxu2 }
 0x2a0   : > { %v3271_v40 = vadd.f32 %v3270_v20, %v3102_v33  ;;  %v3439_v56 = vpop.f32.mrf.mxu3  ;;  %v5013_v33 = vor.u32 %v6434_v53, %v5010_v14  ;;  %v5017_v20 = vor.u32 %v6439_v0, %v5016_v46 }
 0x2a1   : > { %v3103_v25 = vpop.f32.mrf.mxu1 }
 0x2a2   : > { %v3440_v47 = vadd.f32 %v3439_v56, %v3271_v40  ;;  %v3104_v32 = vadd.f32 %v3103_v25, %v8530_v19  ;;  %v5021_v40 = vor.u32 %v6435_v58, %v5018_v6  ;;  %v5025_v56 = vor.u32 %v6440_v29, %v5024_v61  ;;  %v8532_v19 = vld [vmem:[#allocation3_spill] sm:$0xff]  ;;  %v6443_v6 = vld [vmem:[%s7135_s11 + $0x5c] sm:$0xf] }
 0x2a3   : > { %v3610_v4 = vpop.f32.mrf.mxu0  ;;  %v5046_v61 = vld [vmem:[%s7135_s11 + $0x7c] sm:$0xf0] }
 0x2a4   : > { %v7921_v45 = vadd.f32 %v3608_v63, %v3440_v47 }
 0x2a6   : > { %8529 = vst [vmem:[#allocation20_spill] sm:$0xff] %v7921_v45 }
 0x2a7   : > { %v3272_v31 = vpop.f32.mrf.mxu2 }
 0x2a8   : > { %v3273_v23 = vadd.f32 %v3272_v31, %v3104_v32  ;;  %v3441_v22 = vpop.f32.mrf.mxu3  ;;  %v5052_v31 = vld [vmem:[%s7135_s11 + $0x60] sm:$0xf] }
 0x2a9   : > { %v3106_v26 = vpop.f32.mrf.mxu1 }
 0x2aa   : > { %v3442_v63 = vadd.f32 %v3441_v22, %v3273_v23  ;;  %v3107_v53 = vadd.f32 %v3106_v26, %v8532_v19  ;;  %v6444_v23 = vld [vmem:[%s7135_s11 + $0x64] sm:$0xf] }
 0x2ab   : > { %v3613_v47 = vpop.f32.mrf.mxu0 }
 0x2ac   : > { %3661 = vmatmul.bf16.vlgmr.msra.gmra.mxu1 %v5013_v33  ;;  %3830 = vmatmul.bf16.vlgmr.msra.gmra.mxu2 %v5017_v20  ;;  %v7930_v25 = vadd.f32 %v3610_v4, %v3442_v63  ;;  %v6448_v4 = vld [vmem:[%s7135_s11 + $0x80] sm:$0xf0]  ;;  %v8534_v33 = vld [vmem:[#allocation4_spill] sm:$0xff] }
 0x2ad   : > { %3999 = vmatmul.bf16.vlgmr.msra.gmra.mxu3 %v5021_v40  ;;  %v5054_v40 = vld [vmem:[%s7135_s11 + $0x84] sm:$0xf0]  ;;  %v6449_v63 = vld [vmem:[%s7135_s11 + $0x88] sm:$0xf0] }
 0x2ae   : > { %8531 = vst [vmem:[#allocation22_spill] sm:$0xff] %v7930_v25  ;;  %4168 = vmatmul.bf16.vlgmr.msra.gmra.mxu0 %v5025_v56  ;;  %v5060_v56 = vld [vmem:[%s7135_s11 + $0x68] sm:$0xf] }
 0x2af   : > { %v3275_v14 = vpop.f32.mrf.mxu2 }
 0x2b0   : > { %v3276_v46 = vadd.f32 %v3275_v14, %v3107_v53  ;;  %v3444_v0 = vpop.f32.mrf.mxu3  ;;  %v5049_v53 = vor.u32 %v6443_v6, %v5046_v61  ;;  %v5053_v14 = vor.u32 %v6448_v4, %v5052_v31 }
 0x2b1   : > { %v3108_v58 = vpop.f32.mrf.mxu1 }
 0x2b2   : > { %v3445_v22 = vadd.f32 %v3444_v0, %v3276_v46  ;;  %v3109_v20 = vadd.f32 %v3108_v58, %v8534_v33  ;;  %v5057_v46 = vor.u32 %v6444_v23, %v5054_v40  ;;  %v5061_v0 = vor.u32 %v6449_v63, %v5060_v56  ;;  %v8536_v33 = vld [vmem:[#allocation5_spill] sm:$0xff]  ;;  %v6452_v40 = vld [vmem:[%s7135_s11 + $0xa4] sm:$0xf]  ;;  %v5082_v56 = vld [vmem:[%s7135_s11 + $0xc4] sm:$0xf0] }
 0x2b3   : > { %v3615_v32 = vpop.f32.mrf.mxu0 }
 0x2b4   : > { %v7935_v29 = vadd.f32 %v3613_v47, %v3445_v22 }
 0x2b6   : > { %8533 = vst [vmem:[#allocation3_spill] sm:$0xff] %v7935_v29 }
 0x2b7   : > { %v3277_v26 = vpop.f32.mrf.mxu2 }
 0x2b8   : > { %v3278_v19 = vadd.f32 %v3277_v26, %v3109_v20  ;;  %v3446_v25 = vpop.f32.mrf.mxu3  ;;  %v5088_v26 = vld [vmem:[%s7135_s11 + $0xa8] sm:$0xf] }
 0x2b9   : > { %v3111_v45 = vpop.f32.mrf.mxu1 }
 0x2ba   : > { %v3447_v47 = vadd.f32 %v3446_v25, %v3278_v19  ;;  %v3112_v6 = vadd.f32 %v3111_v45, %v8536_v33  ;;  %v6453_v19 = vld [vmem:[%s7135_s11 + $0xac] sm:$0xf] }
 0x2bb   : > { %v3618_v22 = vpop.f32.mrf.mxu0 }
 0x2bc   : > { %3666 = vmatmul.bf16.gmra.mxu1 %v5049_v53  ;;  %3835 = vmatmul.bf16.gmra.mxu2 %v5053_v14  ;;  %v7944_v58 = vadd.f32 %v3615_v32, %v3447_v47  ;;  %v6457_v32 = vld [vmem:[%s7135_s11 + $0xc8] sm:$0xf0]  ;;  %v8538_v53 = vld [vmem:[#allocation6_spill] sm:$0xff]  ;;  %v6458_v47 = vld [vmem:[%s7135_s11 + $0xd0] sm:$0xf0] }
 0x2bd   : > { %4004 = vmatmul.bf16.gmra.mxu3 %v5057_v46  ;;  %v5090_v46 = vld [vmem:[%s7135_s11 + $0xcc] sm:$0xf0] }
 0x2be   : > { %8535 = vst [vmem:[#allocation4_spill] sm:$0xff] %v7944_v58  ;;  %4173 = vmatmul.bf16.gmra.mxu0 %v5061_v0  ;;  %v5096_v0 = vld [vmem:[%s7135_s11 + $0xb0] sm:$0xf] }
 0x2bf   : > { %v3280_v61 = vpop.f32.mrf.mxu2 }
 0x2c0   : > { %v3281_v31 = vadd.f32 %v3280_v61, %v3112_v6  ;;  %v3449_v4 = vpop.f32.mrf.mxu3  ;;  %v5085_v6 = vor.u32 %v6452_v40, %v5082_v56  ;;  %v5089_v61 = vor.u32 %v6457_v32, %v5088_v26 }
 0x2c1   : > { %v3113_v23 = vpop.f32.mrf.mxu1 }
 0x2c2   : > { %v3450_v25 = vadd.f32 %v3449_v4, %v3281_v31  ;;  %v3114_v14 = vadd.f32 %v3113_v23, %v8538_v53  ;;  %v5093_v31 = vor.u32 %v6453_v19, %v5090_v46  ;;  %v5097_v4 = vor.u32 %v6458_v47, %v5096_v0  ;;  %v8540_v53 = vld [vmem:[#allocation7_spill] sm:$0xff]  ;;  %v6461_v46 = vld [vmem:[%s7135_s11 + $0xec] sm:$0xf]  ;;  %v5118_v0 = vld [vmem:[%s7135_s11 + $0x10c] sm:$0xf0] }
 0x2c3   : > { %v3620_v20 = vpop.f32.mrf.mxu0 }
 0x2c4   : > { %v7949_v63 = vadd.f32 %v3618_v22, %v3450_v25 }
 0x2c6   : > { %8537 = vst [vmem:[#allocation5_spill] sm:$0xff] %v7949_v63 }
 0x2c7   : > { %v3282_v45 = vpop.f32.mrf.mxu2 }
 0x2c8   : > { %v3283_v33 = vadd.f32 %v3282_v45, %v3114_v14  ;;  %v3451_v58 = vpop.f32.mrf.mxu3  ;;  %v5124_v45 = vld [vmem:[%s7135_s11 + $0xf0] sm:$0xf] }
 0x2c9   : > { %v3116_v29 = vpop.f32.mrf.mxu1 }
 0x2ca   : > { %v3452_v22 = vadd.f32 %v3451_v58, %v3283_v33  ;;  %v3117_v40 = vadd.f32 %v3116_v29, %v8540_v53  ;;  %v6462_v33 = vld [vmem:[%s7135_s11 + $0xf4] sm:$0xf] }
 0x2cb   : > { %v3623_v25 = vpop.f32.mrf.mxu0 }
 0x2cc   : > { %3671 = vmatmul.bf16.gmra.mxu1 %v5085_v6  ;;  %3840 = vmatmul.bf16.gmra.mxu2 %v5089_v61  ;;  %v7958_v23 = vadd.f32 %v3620_v20, %v3452_v22  ;;  %v6466_v20 = vld [vmem:[%s7135_s11 + $0x110] sm:$0xf0]  ;;  %v8542_v6 = vld [vmem:[#allocation8_spill] sm:$0xff]  ;;  %v6467_v22 = vld [vmem:[%s7135_s11 + $0x118] sm:$0xf0] }
 0x2cd   : > { %4009 = vmatmul.bf16.gmra.mxu3 %v5093_v31  ;;  %v5126_v31 = vld [vmem:[%s7135_s11 + $0x114] sm:$0xf0] }
 0x2ce   : > { %8539 = vst [vmem:[#allocation6_spill] sm:$0xff] %v7958_v23  ;;  %4178 = vmatmul.bf16.gmra.mxu0 %v5097_v4  ;;  %v5132_v4 = vld [vmem:[%s7135_s11 + $0xf8] sm:$0xf] }
 0x2cf   : > { %v3285_v56 = vpop.f32.mrf.mxu2 }
 0x2d0   : > { %v3286_v26 = vadd.f32 %v3285_v56, %v3117_v40  ;;  %v3454_v32 = vpop.f32.mrf.mxu3  ;;  %v5121_v40 = vor.u32 %v6461_v46, %v5118_v0  ;;  %v5125_v56 = vor.u32 %v6466_v20, %v5124_v45 }
 0x2d1   : > { %v3118_v19 = vpop.f32.mrf.mxu1 }
 0x2d2   : > { %v3455_v58 = vadd.f32 %v3454_v32, %v3286_v26  ;;  %v3119_v61 = vadd.f32 %v3118_v19, %v8542_v6  ;;  %v5129_v26 = vor.u32 %v6462_v33, %v5126_v31  ;;  %v5133_v32 = vor.u32 %v6467_v22, %v5132_v4  ;;  %v8544_v6 = vld [vmem:[#allocation9_spill] sm:$0xff]  ;;  %v5154_v4 = vld [vmem:[%s7135_s11 + $0x154] sm:$0xf0] }
 0x2d3   : > { %v3625_v14 = vpop.f32.mrf.mxu0  ;;  %v6470_v31 = vld [vmem:[%s7135_s11 + $0x134] sm:$0xf] }
 0x2d4   : > { %v7963_v47 = vadd.f32 %v3623_v25, %v3455_v58 }
 0x2d6   : > { %8541 = vst [vmem:[#allocation7_spill] sm:$0xff] %v7963_v47 }
 0x2d7   : > { %v3287_v29 = vpop.f32.mrf.mxu2 }
 0x2d8   : > { %v3288_v53 = vadd.f32 %v3287_v29, %v3119_v61  ;;  %v3456_v23 = vpop.f32.mrf.mxu3  ;;  %v5160_v29 = vld [vmem:[%s7135_s11 + $0x138] sm:$0xf] }
 0x2d9   : > { %v3121_v63 = vpop.f32.mrf.mxu1 }
 0x2da   : > { %v3457_v25 = vadd.f32 %v3456_v23, %v3288_v53  ;;  %v3122_v46 = vadd.f32 %v3121_v63, %v8544_v6  ;;  %v6471_v53 = vld [vmem:[%s7135_s11 + $0x13c] sm:$0xf] }
 0x2db   : > { %v3628_v58 = vpop.f32.mrf.mxu0 }
 0x2dc   : > { %3676 = vmatmul.bf16.gmra.mxu1 %v5121_v40  ;;  %3845 = vmatmul.bf16.gmra.mxu2 %v5125_v56  ;;  %v7972_v19 = vadd.f32 %v3625_v14, %v3457_v25  ;;  %v6475_v14 = vld [vmem:[%s7135_s11 + $0x158] sm:$0xf0]  ;;  %v6476_v25 = vld [vmem:[%s7135_s11 + $0x160] sm:$0xf0] }
 0x2dd   : > { %4014 = vmatmul.bf16.gmra.mxu3 %v5129_v26  ;;  %v8546_v40 = vld [vmem:[#allocation10_spill] sm:$0xff]  ;;  %v5162_v26 = vld [vmem:[%s7135_s11 + $0x15c] sm:$0xf0] }
 0x2de   : > { %8543 = vst [vmem:[#allocation8_spill] sm:$0xff] %v7972_v19  ;;  %4183 = vmatmul.bf16.gmra.mxu0 %v5133_v32  ;;  %v5168_v32 = vld [vmem:[%s7135_s11 + $0x140] sm:$0xf] }
 0x2df   : > { %v3290_v0 = vpop.f32.mrf.mxu2 }
 0x2e0   : > { %v3291_v45 = vadd.f32 %v3290_v0, %v3122_v46  ;;  %v3459_v20 = vpop.f32.mrf.mxu3  ;;  %v5157_v46 = vor.u32 %v6470_v31, %v5154_v4  ;;  %v5161_v0 = vor.u32 %v6475_v14, %v5160_v29 }
 0x2e1   : > { %v3123_v33 = vpop.f32.mrf.mxu1 }
 0x2e2   : > { %v3460_v23 = vadd.f32 %v3459_v20, %v3291_v45  ;;  %v3124_v56 = vadd.f32 %v3123_v33, %v8546_v40  ;;  %v5165_v45 = vor.u32 %v6471_v53, %v5162_v26  ;;  %v5169_v20 = vor.u32 %v6476_v25, %v5168_v32  ;;  %v8548_v40 = vld [vmem:[#allocation11_spill] sm:$0xff]  ;;  %v6479_v26 = vld [vmem:[%s7135_s11 + $0x17c] sm:$0xf] }
 0x2e3   : > { %v3630_v61 = vpop.f32.mrf.mxu0  ;;  %v5190_v32 = vld [vmem:[%s7135_s11 + $0x19c] sm:$0xf0] }
 0x2e4   : > { %v7977_v22 = vadd.f32 %v3628_v58, %v3460_v23 }
 0x2e6   : > { %8545 = vst [vmem:[#allocation9_spill] sm:$0xff] %v7977_v22 }
 0x2e7   : > { %v3292_v63 = vpop.f32.mrf.mxu2 }
 0x2e8   : > { %v3293_v6 = vadd.f32 %v3292_v63, %v3124_v56  ;;  %v3461_v19 = vpop.f32.mrf.mxu3  ;;  %v5196_v63 = vld [vmem:[%s7135_s11 + $0x180] sm:$0xf] }
 0x2e9   : > { %v3126_v47 = vpop.f32.mrf.mxu1 }
 0x2ea   : > { %v3462_v58 = vadd.f32 %v3461_v19, %v3293_v6  ;;  %v3127_v31 = vadd.f32 %v3126_v47, %v8548_v40  ;;  %v6480_v6 = vld [vmem:[%s7135_s11 + $0x184] sm:$0xf] }
 0x2eb   : > { %v3633_v23 = vpop.f32.mrf.mxu0 }
 0x2ec   : > { %3681 = vmatmul.bf16.gmra.mxu1 %v5157_v46  ;;  %3850 = vmatmul.bf16.gmra.mxu2 %v5161_v0  ;;  %v7986_v33 = vadd.f32 %v3630_v61, %v3462_v58  ;;  %v6484_v61 = vld [vmem:[%s7135_s11 + $0x1a0] sm:$0xf0]  ;;  %v8550_v46 = vld [vmem:[#allocation12_spill] sm:$0xff] }
 0x2ed   : > { %4019 = vmatmul.bf16.gmra.mxu3 %v5165_v45  ;;  %v5198_v45 = vld [vmem:[%s7135_s11 + $0x1a4] sm:$0xf0]  ;;  %v6485_v58 = vld [vmem:[%s7135_s11 + $0x1a8] sm:$0xf0] }
 0x2ee   : > { %8547 = vst [vmem:[#allocation10_spill] sm:$0xff] %v7986_v33  ;;  %4188 = vmatmul.bf16.gmra.mxu0 %v5169_v20  ;;  %v5204_v20 = vld [vmem:[%s7135_s11 + $0x188] sm:$0xf] }
 0x2ef   : > { %v3295_v4 = vpop.f32.mrf.mxu2 }
 0x2f0   : > { %v3296_v29 = vadd.f32 %v3295_v4, %v3127_v31  ;;  %v3464_v14 = vpop.f32.mrf.mxu3  ;;  %v5193_v31 = vor.u32 %v6479_v26, %v5190_v32  ;;  %v5197_v4 = vor.u32 %v6484_v61, %v5196_v63 }
 0x2f1   : > { %v3128_v53 = vpop.f32.mrf.mxu1 }
 0x2f2   : > { %v3465_v19 = vadd.f32 %v3464_v14, %v3296_v29  ;;  %v3129_v0 = vadd.f32 %v3128_v53, %v8550_v46  ;;  %v5201_v29 = vor.u32 %v6480_v6, %v5198_v45  ;;  %v5205_v14 = vor.u32 %v6485_v58, %v5204_v20  ;;  %v8552_v46 = vld [vmem:[#allocation13_spill] sm:$0xff]  ;;  %v6488_v45 = vld [vmem:[%s7135_s11 + $0x1c4] sm:$0xf]  ;;  %v5226_v20 = vld [vmem:[%s7135_s11 + $0x1e4] sm:$0xf0] }
 0x2f3   : > { %v3635_v56 = vpop.f32.mrf.mxu0 }
 0x2f4   : > { %v7991_v25 = vadd.f32 %v3633_v23, %v3465_v19 }
 0x2f6   : > { %8549 = vst [vmem:[#allocation11_spill] sm:$0xff] %v7991_v25 }
 0x2f7   : > { %v3297_v47 = vpop.f32.mrf.mxu2 }
 0x2f8   : > { %v3298_v40 = vadd.f32 %v3297_v47, %v3129_v0  ;;  %v3466_v33 = vpop.f32.mrf.mxu3  ;;  %v5232_v47 = vld [vmem:[%s7135_s11 + $0x1c8] sm:$0xf] }
 0x2f9   : > { %v3131_v22 = vpop.f32.mrf.mxu1 }
 0x2fa   : > { %v3467_v23 = vadd.f32 %v3466_v33, %v3298_v40  ;;  %v3132_v26 = vadd.f32 %v3131_v22, %v8552_v46  ;;  %v6489_v40 = vld [vmem:[%s7135_s11 + $0x1cc] sm:$0xf] }
 0x2fb   : > { %v3638_v19 = vpop.f32.mrf.mxu0 }
 0x2fc   : > { %3686 = vmatmul.bf16.gmra.mxu1 %v5193_v31  ;;  %3855 = vmatmul.bf16.gmra.mxu2 %v5197_v4  ;;  %v8000_v53 = vadd.f32 %v3635_v56, %v3467_v23  ;;  %v6493_v56 = vld [vmem:[%s7135_s11 + $0x1e8] sm:$0xf0]  ;;  %v8554_v31 = vld [vmem:[#allocation15_spill] sm:$0xff]  ;;  %v6494_v23 = vld [vmem:[%s7135_s11 + $0x1f0] sm:$0xf0] }
 0x2fd   : > { %4024 = vmatmul.bf16.gmra.mxu3 %v5201_v29  ;;  %v5234_v29 = vld [vmem:[%s7135_s11 + $0x1ec] sm:$0xf0] }
 0x2fe   : > { %8551 = vst [vmem:[#allocation12_spill] sm:$0xff] %v8000_v53  ;;  %4193 = vmatmul.bf16.gmra.mxu0 %v5205_v14  ;;  %v5240_v14 = vld [vmem:[%s7135_s11 + $0x1d0] sm:$0xf] }
 0x2ff   : > { %v3300_v32 = vpop.f32.mrf.mxu2 }
 0x300   : > { %v3301_v63 = vadd.f32 %v3300_v32, %v3132_v26  ;;  %v3469_v61 = vpop.f32.mrf.mxu3  ;;  %v5229_v26 = vor.u32 %v6488_v45, %v5226_v20  ;;  %v5233_v32 = vor.u32 %v6493_v56, %v5232_v47 }
 0x301   : > { %v3133_v6 = vpop.f32.mrf.mxu1 }
 0x302   : > { %v3470_v33 = vadd.f32 %v3469_v61, %v3301_v63  ;;  %v3134_v4 = vadd.f32 %v3133_v6, %v8554_v31  ;;  %v5237_v63 = vor.u32 %v6489_v40, %v5234_v29  ;;  %v5241_v61 = vor.u32 %v6494_v23, %v5240_v14  ;;  %v8556_v31 = vld [vmem:[#allocation17_spill] sm:$0xff]  ;;  %v6497_v29 = vld [vmem:[%s7135_s11 + $0x20c] sm:$0xf] }
 0x303   : > { %v3640_v0 = vpop.f32.mrf.mxu0  ;;  %v5262_v14 = vld [vmem:[%s7135_s11 + $0x22c] sm:$0xf0] }
 0x304   : > { %v8005_v58 = vadd.f32 %v3638_v19, %v3470_v33 }
 0x306   : > { %8553 = vst [vmem:[#allocation13_spill] sm:$0xff] %v8005_v58 }
 0x307   : > { %v3302_v22 = vpop.f32.mrf.mxu2 }
 0x308   : > { %v3303_v46 = vadd.f32 %v3302_v22, %v3134_v4  ;;  %v3471_v53 = vpop.f32.mrf.mxu3  ;;  %v5268_v22 = vld [vmem:[%s7135_s11 + $0x210] sm:$0xf] }
 0x309   : > { %v3136_v25 = vpop.f32.mrf.mxu1 }
 0x30a   : > { %v3472_v19 = vadd.f32 %v3471_v53, %v3303_v46  ;;  %v3137_v45 = vadd.f32 %v3136_v25, %v8556_v31  ;;  %v6498_v46 = vld [vmem:[%s7135_s11 + $0x214] sm:$0xf] }
 0x30b   : > { %v3643_v33 = vpop.f32.mrf.mxu0 }
 0x30c   : > { %3691 = vmatmul.bf16.gmra.mxu1 %v5229_v26  ;;  %3860 = vmatmul.bf16.gmra.mxu2 %v5233_v32  ;;  %v8014_v6 = vadd.f32 %v3640_v0, %v3472_v19  ;;  %v6502_v0 = vld [vmem:[%s7135_s11 + $0x230] sm:$0xf0]  ;;  %v8558_v26 = vld [vmem:[#allocation19_spill] sm:$0xff]  ;;  %v6503_v19 = vld [vmem:[%s7135_s11 + $0x238] sm:$0xf0] }
 0x30d   : > { %4029 = vmatmul.bf16.gmra.mxu3 %v5237_v63  ;;  %v5270_v63 = vld [vmem:[%s7135_s11 + $0x234] sm:$0xf0] }
 0x30e   : > { %8555 = vst [vmem:[#allocation15_spill] sm:$0xff] %v8014_v6  ;;  %4198 = vmatmul.bf16.gmra.mxu0 %v5241_v61  ;;  %v5276_v61 = vld [vmem:[%s7135_s11 + $0x218] sm:$0xf] }
 0x30f   : > { %v3305_v20 = vpop.f32.mrf.mxu2 }
 0x310   : > { %v3306_v47 = vadd.f32 %v3305_v20, %v3137_v45  ;;  %v3474_v56 = vpop.f32.mrf.mxu3  ;;  %v5265_v45 = vor.u32 %v6497_v29, %v5262_v14  ;;  %v5269_v20 = vor.u32 %v6502_v0, %v5268_v22 }
 0x311   : > { %v3138_v40 = vpop.f32.mrf.mxu1 }
 0x312   : > { %v3475_v53 = vadd.f32 %v3474_v56, %v3306_v47  ;;  %v3139_v32 = vadd.f32 %v3138_v40, %v8558_v26  ;;  %v5273_v47 = vor.u32 %v6498_v46, %v5270_v63  ;;  %v5277_v56 = vor.u32 %v6503_v19, %v5276_v61  ;;  %v8560_v26 = vld [vmem:[#allocation21_spill] sm:$0xff]  ;;  %v5298_v61 = vld [vmem:[%s7135_s11 + $0x274] sm:$0xf0] }
 0x313   : > { %v3645_v4 = vpop.f32.mrf.mxu0  ;;  %v6506_v63 = vld [vmem:[%s7135_s11 + $0x254] sm:$0xf] }
 0x314   : > { %v8019_v23 = vadd.f32 %v3643_v33, %v3475_v53 }
 0x316   : > { %8557 = vst [vmem:[#allocation17_spill] sm:$0xff] %v8019_v23 }
 0x317   : > { %v3307_v25 = vpop.f32.mrf.mxu2 }
 0x318   : > { %v3308_v31 = vadd.f32 %v3307_v25, %v3139_v32  ;;  %v3476_v6 = vpop.f32.mrf.mxu3  ;;  %v5304_v25 = vld [vmem:[%s7135_s11 + $0x258] sm:$0xf] }
 0x319   : > { %v3141_v58 = vpop.f32.mrf.mxu1 }
 0x31a   : > { %v3477_v33 = vadd.f32 %v3476_v6, %v3308_v31  ;;  %v3142_v29 = vadd.f32 %v3141_v58, %v8560_v26  ;;  %v6507_v31 = vld [vmem:[%s7135_s11 + $0x25c] sm:$0xf] }
 0x31b   : > { %v3648_v53 = vpop.f32.mrf.mxu0 }
 0x31c   : > { %3696 = vmatmul.bf16.gmra.mxu1 %v5265_v45  ;;  %3865 = vmatmul.bf16.gmra.mxu2 %v5269_v20  ;;  %v8028_v40 = vadd.f32 %v3645_v4, %v3477_v33  ;;  %v6511_v4 = vld [vmem:[%s7135_s11 + $0x278] sm:$0xf0]  ;;  %v8562_v45 = vld [vmem:[#allocation23_spill] sm:$0xff] }
 0x31d   : > { %4034 = vmatmul.bf16.gmra.mxu3 %v5273_v47  ;;  %v5306_v47 = vld [vmem:[%s7135_s11 + $0x27c] sm:$0xf0]  ;;  %v6512_v33 = vld [vmem:[%s7135_s11 + $0x280] sm:$0xf0] }
 0x31e   : > { %8559 = vst [vmem:[#allocation19_spill] sm:$0xff] %v8028_v40  ;;  %4203 = vmatmul.bf16.gmra.mxu0 %v5277_v56  ;;  %v5312_v56 = vld [vmem:[%s7135_s11 + $0x260] sm:$0xf] }
 0x31f   : > { %v3310_v14 = vpop.f32.mrf.mxu2 }
 0x320   : > { %v3311_v22 = vadd.f32 %v3310_v14, %v3142_v29  ;;  %v3479_v0 = vpop.f32.mrf.mxu3  ;;  %v5301_v29 = vor.u32 %v6506_v63, %v5298_v61  ;;  %v5305_v14 = vor.u32 %v6511_v4, %v5304_v25 }
 0x321   : > { %v3143_v46 = vpop.f32.mrf.mxu1 }
 0x322   : > { %v3480_v6 = vadd.f32 %v3479_v0, %v3311_v22  ;;  %v3144_v20 = vadd.f32 %v3143_v46, %v8562_v45  ;;  %v5309_v22 = vor.u32 %v6507_v31, %v5306_v47  ;;  %v5313_v0 = vor.u32 %v6512_v33, %v5312_v56  ;;  %v5340_v47 = vld [vmem:[%s7135_s11 + $0x2a0] sm:$0xf]  ;;  %v6520_v56 = vld [vmem:[%s7135_s11 + $0x2c0] sm:$0xf0] }
 0x323   : > { %v3650_v32 = vpop.f32.mrf.mxu0  ;;  %v6516_v33 = vld [vmem:[%s7135_s11 + $0x2a4] sm:$0xf] }
 0x324   : > { %v8033_v19 = vadd.f32 %v3648_v53, %v3480_v6  ;;  %v8564_v6 = vld [vmem:[#allocation24_spill] sm:$0xff] }
 0x326   : > { %8561 = vst [vmem:[#allocation21_spill] sm:$0xff] %v8033_v19 }
 0x327   : > { %v3312_v58 = vpop.f32.mrf.mxu2 }
 0x328   : > { %v3313_v26 = vadd.f32 %v3312_v58, %v3144_v20  ;;  %v3481_v40 = vpop.f32.mrf.mxu3  ;;  %v8048_v20 = vld [vmem:[%s8491_s2] ss:$0 sm:$0xff] }
 0x329   : > { %v3662_v23 = vpop.f32.mrf.mxu1 }
 0x32a   : > { %v3482_v43 = vadd.f32 %v3481_v40, %v3313_v26  ;;  %v3663_v63 = vadd.f32 %v3662_v23, %v8564_v6  ;;  %v8565_v23 = vld [vmem:[#allocation25_spill] sm:$0xff] }
 0x32b   : > { %v4169_v53 = vpop.f32.mrf.mxu0 }
 0x32c   : > { %3701 = vmatmul.bf16.gmra.mxu1 %v5301_v29  ;;  %3870 = vmatmul.bf16.gmra.mxu2 %v5305_v14  ;;  %v8042_v46 = vadd.f32 %v3650_v32, %v3482_v43  ;;  %v6515_v43 = vld [vmem:[%s7135_s11 + $0x29c] sm:$0xf]  ;;  %v5334_v32 = vld [vmem:[%s7135_s11 + $0x2bc] sm:$0xf0]  ;;  %v5342_v29 = vld [vmem:[%s7135_s11 + $0x2c4] sm:$0xf0] }
 0x32d   : > { %4039 = vmatmul.bf16.gmra.mxu3 %v5309_v22  ;;  %v5348_v14 = vld [vmem:[%s7135_s11 + $0x2a8] sm:$0xf]  ;;  %v6521_v22 = vld [vmem:[%s7135_s11 + $0x2c8] sm:$0xf0] }
 0x32e   : > { %8563 = vst [vmem:[#allocation23_spill] sm:$0xff] %v8042_v46  ;;  %4208 = vmatmul.bf16.gmra.mxu0 %v5313_v0  ;;  %v5345_v46 = vor.u32 %v6516_v33, %v5342_v29  ;;  %v5349_v19 = vor.u32 %v6521_v22, %v5348_v14  ;;  %v6524_v14 = vld [vmem:[%s7135_s11 + $0x2e4] sm:$0xf]  ;;  %v5370_v22 = vld [vmem:[%s7135_s11 + $0x304] sm:$0xf0] }
 0x32f   : > { %v3831_v61 = vpop.f32.mrf.mxu2 }
 0x330   : > { %v3832_v25 = vadd.f32 %v3831_v61, %v3663_v63  ;;  %v4000_v4 = vpop.f32.mrf.mxu3  ;;  %v5337_v61 = vor.u32 %v6515_v43, %v5334_v32 }
 0x331   : > { %v3664_v40 = vpop.f32.mrf.mxu1 }
 0x332   : > { %v4001_v31 = vadd.f32 %v4000_v4, %v3832_v25  ;;  %v3665_v26 = vadd.f32 %v3664_v40, %v8565_v23  ;;  %v5341_v25 = vor.u32 %v6520_v56, %v5340_v47 }
 0x333   : > { %v4171_v45 = vpop.f32.mrf.mxu0 }
 0x334   : > { %v4170_v58 = vadd.f32 %v4169_v53, %v4001_v31  ;;  %v8063_v53 = vld [vmem:[%s8492_s3] ss:$0 sm:$0xff] }
 0x336   : > { %v4528_v16 = vmul.f32 %v8048_v20, %v4170_v58 }
 0x337   : > { %v3833_v0 = vpop.f32.mrf.mxu2 }
 0x338   : > { %v3834_v6 = vadd.f32 %v3833_v0, %v3665_v26  ;;  %v4002_v63 = vpop.f32.mrf.mxu3  ;;  %v4596_v43 = vadd.f32 %v8063_v53, %v4528_v16  ;;  %v5376_v0 = vld [vmem:[%s7135_s11 + $0x2e8] sm:$0xf] }
 0x339   : > { %v3667_v4 = vpop.f32.mrf.mxu1 }
 0x33a   : > { %v4003_v40 = vadd.f32 %v4002_v63, %v3834_v6  ;;  %v3668_v47 = vadd.f32 %v3667_v4, %v7553_v59  ;;  %v6529_v6 = vld [vmem:[%s7135_s11 + $0x308] sm:$0xf0]  ;;  %v5378_v4 = vld [vmem:[%s7135_s11 + $0x30c] sm:$0xf0] }
 0x33b   : > { %v4174_v31 = vpop.f32.mrf.mxu0  ;;  %v6525_v63 = vld [vmem:[%s7135_s11 + $0x2ec] sm:$0xf] }
 0x33c   : > { %v4172_v23 = vadd.f32 %v4171_v45, %v4003_v40  ;;  %3706 = vmatmul.bf16.gmra.mxu1 %v5337_v61  ;;  %3875 = vmatmul.bf16.gmra.mxu2 %v5341_v25  ;;  %v5384_v40 = vld [vmem:[%s7135_s11 + $0x2f0] sm:$0xf] }
 0x33d   : > { %4044 = vmatmul.bf16.gmra.mxu3 %v5345_v46 }
 0x33e   : > { %4213 = vmatmul.bf16.gmra.mxu0 %v5349_v19  ;;  %v4529_v32 = vmul.f32 %v8048_v20, %v4172_v23  ;;  %v4660_v19 = vmax.f32 %v4596_v43, 0.0  ;;  %v6530_v23 = vld [vmem:[%s7135_s11 + $0x310] sm:$0xf0] }
 0x33f   : > { %v3836_v56 = vpop.f32.mrf.mxu2 }
 0x340   : > { %v4597_v33 = vadd.f32 %v8063_v53, %v4529_v32  ;;  %v3837_v45 = vadd.f32 %v3836_v56, %v3668_v47  ;;  %v4005_v58 = vpop.f32.mrf.mxu3  ;;  %v5373_v56 = vor.u32 %v6524_v14, %v5370_v22 }
 0x341   : > { %v3669_v46 = vpop.f32.mrf.mxu1 }
 0x342   : > { %v4661_v16 = vmax.f32 %v4597_v33, 0.0  ;;  %v4006_v26 = vadd.f32 %v4005_v58, %v3837_v45  ;;  %v3670_v25 = vadd.f32 %v3669_v46, %v7562_v17  ;;  %v5377_v33 = vor.u32 %v6529_v6, %v5376_v0 }
 0x343   : > { %v4176_v29 = vpop.f32.mrf.mxu0  ;;  %v5381_v58 = vor.u32 %v6525_v63, %v5378_v4  ;;  %v5412_v4 = vld [vmem:[%s7135_s11 + $0x330] sm:$0xf] }
 0x344   : > { %v6795_v59 = vpack.c.bf16 %v4661_v16, %v4660_v19  ;;  %v4175_v61 = vadd.f32 %v4174_v31, %v4006_v26  ;;  %v5385_v19 = vor.u32 %v6530_v23, %v5384_v40  ;;  %v6538_v40 = vld [vmem:[%s7135_s11 + $0x350] sm:$0xf0]  ;;  %v5414_v23 = vld [vmem:[%s7135_s11 + $0x354] sm:$0xf0] }
 0x346   : > { %6796 = vst [vmem:[%s8073_s27] sm:$0xff] %v6795_v59   ;;  %v4530_v16 = vmul.f32 %v8048_v20, %v4175_v61 }
 0x347   : > { %v3838_v43 = vpop.f32.mrf.mxu2 }
 0x348   : > { %v3839_v32 = vadd.f32 %v3838_v43, %v3670_v25  ;;  %v4007_v47 = vpop.f32.mrf.mxu3  ;;  %v4598_v17 = vadd.f32 %v8063_v53, %v4530_v16  ;;  %v6533_v25 = vld [vmem:[%s7135_s11 + $0x32c] sm:$0xf]  ;;  %v5413_v16 = vor.u32 %v6538_v40, %v5412_v4 }
 0x349   : > { %v3672_v45 = vpop.f32.mrf.mxu1 }
 0x34a   : > { %v4008_v62 = vadd.f32 %v4007_v47, %v3839_v32  ;;  %v3673_v46 = vadd.f32 %v3672_v45, %v7579_v13  ;;  %v4662_v22 = vmax.f32 %v4598_v17, 0.0  ;;  %v6534_v13 = vld [vmem:[%s7135_s11 + $0x334] sm:$0xf]  ;;  %v5420_v47 = vld [vmem:[%s7135_s11 + $0x338] sm:$0xf] }
 0x34b   : > { %v4179_v52 = vpop.f32.mrf.mxu0 }
 0x34c   : > { %v4177_v10 = vadd.f32 %v4176_v29, %v4008_v62  ;;  %3711 = vmatmul.bf16.gmra.mxu1 %v5373_v56  ;;  %3880 = vmatmul.bf16.gmra.mxu2 %v5377_v33  ;;  %v6539_v56 = vld [vmem:[%s7135_s11 + $0x358] sm:$0xf0] }
 0x34d   : > { %4049 = vmatmul.bf16.gmra.mxu3 %v5381_v58 }
 0x34e   : > { %4218 = vmatmul.bf16.gmra.mxu0 %v5385_v19  ;;  %v4531_v31 = vmul.f32 %v8048_v20, %v4177_v10  ;;  %v5406_v10 = vld [vmem:[%s7135_s11 + $0x34c] sm:$0xf0] }
 0x34f   : > { %v3841_v26 = vpop.f32.mrf.mxu2  ;;  %v5409_v19 = vor.u32 %v6533_v25, %v5406_v10 }
 0x350   : > { %v4599_v62 = vadd.f32 %v8063_v53, %v4531_v31  ;;  %v3842_v29 = vadd.f32 %v3841_v26, %v3673_v46  ;;  %v4010_v59 = vpop.f32.mrf.mxu3  ;;  %v5417_v31 = vor.u32 %v6534_v13, %v5414_v23  ;;  %v5421_v46 = vor.u32 %v6539_v56, %v5420_v47  ;;  %v6542_v23 = vld [vmem:[%s7135_s11 + $0x374] sm:$0xf]  ;;  %v6547_v47 = vld [vmem:[%s7135_s11 + $0x398] sm:$0xf0]  ;;  %v5450_v56 = vld [vmem:[%s7135_s11 + $0x39c] sm:$0xf0] }
 0x351   : > { %v3674_v14 = vpop.f32.mrf.mxu1 }
 0x352   : > { %v4663_v0 = vmax.f32 %v4599_v62, 0.0  ;;  %v4011_v6 = vadd.f32 %v4010_v59, %v3842_v29  ;;  %v3675_v32 = vadd.f32 %v3674_v14, %v7588_v8 }
 0x353   : > { %v4181_v63 = vpop.f32.mrf.mxu0 }
 0x354   : > { %v6800_v61 = vpack.c.bf16 %v4663_v0, %v4662_v22  ;;  %v4180_v43 = vadd.f32 %v4179_v52, %v4011_v6 }
 0x356   : > { %6952 = vst [vmem:[%s8073_s27 + $0x8] sm:$0xff] %v6800_v61   ;;  %v4532_v26 = vmul.f32 %v8048_v20, %v4180_v43  ;;  %v5442_v43 = vld [vmem:[%s7135_s11 + $0x394] sm:$0xf0] }
 0x357   : > { %v3843_v33 = vpop.f32.mrf.mxu2 }
 0x358   : > { %v3844_v45 = vadd.f32 %v3843_v33, %v3675_v32  ;;  %v4012_v58 = vpop.f32.mrf.mxu3  ;;  %v4600_v8 = vadd.f32 %v8063_v53, %v4532_v26  ;;  %v5448_v32 = vld [vmem:[%s7135_s11 + $0x378] sm:$0xf] }
 0x359   : > { %v3677_v17 = vpop.f32.mrf.mxu1  ;;  %v5449_v26 = vor.u32 %v6547_v47, %v5448_v32  ;;  %v6551_v47 = vld [vmem:[%s7135_s11 + $0x3bc] sm:$0xf] }
 0x35a   : > { %v4013_v62 = vadd.f32 %v4012_v58, %v3844_v45  ;;  %v3678_v14 = vadd.f32 %v3677_v17, %v7593_v39  ;;  %v4664_v25 = vmax.f32 %v4600_v8, 0.0  ;;  %v6543_v39 = vld [vmem:[%s7135_s11 + $0x37c] sm:$0xf]  ;;  %v5456_v58 = vld [vmem:[%s7135_s11 + $0x380] sm:$0xf] }
 0x35b   : > { %v4184_v29 = vpop.f32.mrf.mxu0 }
 0x35c   : > { %v4182_v59 = vadd.f32 %v4181_v63, %v4013_v62  ;;  %3716 = vmatmul.bf16.gmra.mxu1 %v5409_v19  ;;  %3885 = vmatmul.bf16.gmra.mxu2 %v5413_v16  ;;  %v6548_v19 = vld [vmem:[%s7135_s11 + $0x3a0] sm:$0xf0] }
 0x35d   : > { %4054 = vmatmul.bf16.gmra.mxu3 %v5417_v31  ;;  %v5457_v8 = vor.u32 %v6548_v19, %v5456_v58 }
 0x35e   : > { %4223 = vmatmul.bf16.gmra.mxu0 %v5421_v46  ;;  %v4533_v52 = vmul.f32 %v8048_v20, %v4182_v59  ;;  %v5445_v46 = vor.u32 %v6542_v23, %v5442_v43  ;;  %v5453_v59 = vor.u32 %v6543_v39, %v5450_v56  ;;  %v5478_v39 = vld [vmem:[%s7135_s11 + $0x3dc] sm:$0xf0] }
 0x35f   : > { %v3846_v22 = vpop.f32.mrf.mxu2  ;;  %v5484_v56 = vld [vmem:[%s7135_s11 + $0x3c0] sm:$0xf] }
 0x360   : > { %v4601_v0 = vadd.f32 %v8063_v53, %v4533_v52  ;;  %v3847_v6 = vadd.f32 %v3846_v22, %v3678_v14  ;;  %v4015_v63 = vpop.f32.mrf.mxu3 }
 0x361   : > { %v3679_v61 = vpop.f32.mrf.mxu1 }
 0x362   : > { %v4665_v10 = vmax.f32 %v4601_v0, 0.0  ;;  %v4016_v4 = vadd.f32 %v4015_v63, %v3847_v6  ;;  %v3680_v45 = vadd.f32 %v3679_v61, %v7602_v35 }
 0x363   : > { %v4186_v40 = vpop.f32.mrf.mxu0 }
 0x364   : > { %v6805_v13 = vpack.c.bf16 %v4665_v10, %v4664_v25  ;;  %v4185_v33 = vadd.f32 %v4184_v29, %v4016_v4 }
 0x366   : > { %6953 = vst [vmem:[%s8073_s27 + $0x10] sm:$0xff] %v6805_v13   ;;  %v4534_v52 = vmul.f32 %v8048_v20, %v4185_v33  ;;  %v6556_v33 = vld [vmem:[%s7135_s11 + $0x3e0] sm:$0xf0] }
 0x367   : > { %v3848_v16 = vpop.f32.mrf.mxu2 }
 0x368   : > { %v3849_v17 = vadd.f32 %v3848_v16, %v3680_v45  ;;  %v4017_v31 = vpop.f32.mrf.mxu3  ;;  %v4602_v35 = vadd.f32 %v8063_v53, %v4534_v52  ;;  %v5486_v45 = vld [vmem:[%s7135_s11 + $0x3e4] sm:$0xf0] }
 0x369   : > { %v3682_v62 = vpop.f32.mrf.mxu1  ;;  %v5492_v16 = vld [vmem:[%s7135_s11 + $0x3c8] sm:$0xf] }
 0x36a   : > { %v4018_v14 = vadd.f32 %v4017_v31, %v3849_v17  ;;  %v3683_v6 = vadd.f32 %v3682_v62, %v7607_v11  ;;  %v6552_v11 = vld [vmem:[%s7135_s11 + $0x3c4] sm:$0xf]  ;;  %v6557_v17 = vld [vmem:[%s7135_s11 + $0x3e8] sm:$0xf0]  ;;  %v5481_v62 = vor.u32 %v6551_v47, %v5478_v39 }
 0x36b   : > { %v4189_v22 = vpop.f32.mrf.mxu0  ;;  %v5489_v52 = vor.u32 %v6552_v11, %v5486_v45  ;;  %v6560_v39 = vld [vmem:[%s7135_s11 + $0x404] sm:$0xf]  ;;  %v6565_v11 = vld [vmem:[%s7135_s11 + $0x428] sm:$0xf0]  ;;  %v5522_v45 = vld [vmem:[%s7135_s11 + $0x42c] sm:$0xf0] }
 0x36c   : > { %v4187_v0 = vadd.f32 %v4186_v40, %v4018_v14  ;;  %3721 = vmatmul.bf16.gmra.mxu1 %v5445_v46  ;;  %3890 = vmatmul.bf16.gmra.mxu2 %v5449_v26  ;;  %v4666_v40 = vmax.f32 %v4602_v35, 0.0  ;;  %v5493_v14 = vor.u32 %v6557_v17, %v5492_v16  ;;  %v5528_v16 = vld [vmem:[%s7135_s11 + $0x410] sm:$0xf]  ;;  %v6566_v17 = vld [vmem:[%s7135_s11 + $0x430] sm:$0xf0] }
 0x36d   : > { %4059 = vmatmul.bf16.gmra.mxu3 %v5453_v59  ;;  %v5485_v59 = vor.u32 %v6556_v33, %v5484_v56  ;;  %v5514_v56 = vld [vmem:[%s7135_s11 + $0x424] sm:$0xf0] }
 0x36e   : > { %4228 = vmatmul.bf16.gmra.mxu0 %v5457_v8  ;;  %v4535_v29 = vmul.f32 %v8048_v20, %v4187_v0  ;;  %v5520_v33 = vld [vmem:[%s7135_s11 + $0x408] sm:$0xf] }
 0x36f   : > { %v3851_v63 = vpop.f32.mrf.mxu2 }
 0x370   : > { %v4603_v61 = vadd.f32 %v8063_v53, %v4535_v29  ;;  %v3852_v25 = vadd.f32 %v3851_v63, %v3683_v6  ;;  %v4020_v10 = vpop.f32.mrf.mxu3 }
 0x371   : > { %v3684_v4 = vpop.f32.mrf.mxu1 }
 0x372   : > { %v4667_v13 = vmax.f32 %v4603_v61, 0.0  ;;  %v4021_v23 = vadd.f32 %v4020_v10, %v3852_v25  ;;  %v3685_v19 = vadd.f32 %v3684_v4, %v7616_v3 }
 0x373   : > { %v4191_v43 = vpop.f32.mrf.mxu0 }
 0x374   : > { %v6810_v32 = vpack.c.bf16 %v4667_v13, %v4666_v40  ;;  %v4190_v58 = vadd.f32 %v4189_v22, %v4021_v23 }
 0x376   : > { %6954 = vst [vmem:[%s8073_s27 + $0x18] sm:$0xff] %v6810_v32   ;;  %v4536_v0 = vmul.f32 %v8048_v20, %v4190_v58 }
 0x377   : > { %v3853_v31 = vpop.f32.mrf.mxu2 }
 0x378   : > { %v3854_v46 = vadd.f32 %v3853_v31, %v3685_v19  ;;  %v4022_v26 = vpop.f32.mrf.mxu3  ;;  %v4604_v3 = vadd.f32 %v8063_v53, %v4536_v0 }
 0x379   : > { %v3687_v8 = vpop.f32.mrf.mxu1 }
 0x37a   : > { %v4023_v35 = vadd.f32 %v4022_v26, %v3854_v46  ;;  %v3688_v63 = vadd.f32 %v3687_v8, %v7621_v50  ;;  %v4668_v13 = vmax.f32 %v4604_v3, 0.0  ;;  %v6561_v50 = vld [vmem:[%s7135_s11 + $0x40c] sm:$0xf] }
 0x37b   : > { %v4194_v29 = vpop.f32.mrf.mxu0 }
 0x37c   : > { %v4192_v6 = vadd.f32 %v4191_v43, %v4023_v35  ;;  %3726 = vmatmul.bf16.gmra.mxu1 %v5481_v62  ;;  %3895 = vmatmul.bf16.gmra.mxu2 %v5485_v59  ;;  %v5517_v62 = vor.u32 %v6560_v39, %v5514_v56  ;;  %v5521_v59 = vor.u32 %v6565_v11, %v5520_v33  ;;  %v5550_v39 = vld [vmem:[%s7135_s11 + $0x46c] sm:$0xf0]  ;;  %v6574_v33 = vld [vmem:[%s7135_s11 + $0x470] sm:$0xf0]  ;;  %v5558_v11 = vld [vmem:[%s7135_s11 + $0x474] sm:$0xf0] }
 0x37d   : > { %4064 = vmatmul.bf16.gmra.mxu3 %v5489_v52  ;;  %v5525_v52 = vor.u32 %v6561_v50, %v5522_v45  ;;  %v5556_v56 = vld [vmem:[%s7135_s11 + $0x450] sm:$0xf] }
 0x37e   : > { %4233 = vmatmul.bf16.gmra.mxu0 %v5493_v14  ;;  %v4537_v22 = vmul.f32 %v8048_v20, %v4192_v6  ;;  %v5529_v14 = vor.u32 %v6566_v17, %v5528_v16 }
 0x37f   : > { %v3856_v61 = vpop.f32.mrf.mxu2 }
 0x380   : > { %v4605_v25 = vadd.f32 %v8063_v53, %v4537_v22  ;;  %v3857_v10 = vadd.f32 %v3856_v61, %v3688_v63  ;;  %v4025_v4 = vpop.f32.mrf.mxu3 }
 0x381   : > { %v3689_v40 = vpop.f32.mrf.mxu1 }
 0x382   : > { %v4669_v23 = vmax.f32 %v4605_v25, 0.0  ;;  %v4026_v43 = vadd.f32 %v4025_v4, %v3857_v10  ;;  %v3690_v19 = vadd.f32 %v3689_v40, %v7630_v15 }
 0x383   : > { %v4196_v32 = vpop.f32.mrf.mxu0 }
 0x384   : > { %v6815_v47 = vpack.c.bf16 %v4669_v23, %v4668_v13  ;;  %v4195_v58 = vadd.f32 %v4194_v29, %v4026_v43 }
 0x386   : > { %6955 = vst [vmem:[%s8073_s27 + $0x20] sm:$0xff] %v6815_v47   ;;  %v4538_v0 = vmul.f32 %v8048_v20, %v4195_v58  ;;  %v6569_v47 = vld [vmem:[%s7135_s11 + $0x44c] sm:$0xf]  ;;  %v5564_v58 = vld [vmem:[%s7135_s11 + $0x458] sm:$0xf] }
 0x387   : > { %v3858_v31 = vpop.f32.mrf.mxu2 }
 0x388   : > { %v3859_v46 = vadd.f32 %v3858_v31, %v3690_v19  ;;  %v4027_v26 = vpop.f32.mrf.mxu3  ;;  %v4606_v15 = vadd.f32 %v8063_v53, %v4538_v0  ;;  %v6575_v19 = vld [vmem:[%s7135_s11 + $0x478] sm:$0xf0] }
 0x389   : > { %v3692_v8 = vpop.f32.mrf.mxu1 }
 0x38a   : > { %v4028_v35 = vadd.f32 %v4027_v26, %v3859_v46  ;;  %v3693_v22 = vadd.f32 %v3692_v8, %v7647_v60  ;;  %v4670_v40 = vmax.f32 %v4606_v15, 0.0  ;;  %v6570_v60 = vld [vmem:[%s7135_s11 + $0x454] sm:$0xf]  ;;  %v5553_v46 = vor.u32 %v6569_v47, %v5550_v39  ;;  %v6583_v47 = vld [vmem:[%s7135_s11 + $0x4b8] sm:$0xf0] }
 0x38b   : > { %v4199_v6 = vpop.f32.mrf.mxu0  ;;  %v5557_v26 = vor.u32 %v6574_v33, %v5556_v56  ;;  %v5565_v8 = vor.u32 %v6575_v19, %v5564_v58  ;;  %v5594_v39 = vld [vmem:[%s7135_s11 + $0x4bc] sm:$0xf0] }
 0x38c   : > { %v4197_v3 = vadd.f32 %v4196_v32, %v4028_v35  ;;  %3731 = vmatmul.bf16.gmra.mxu1 %v5517_v62  ;;  %3900 = vmatmul.bf16.gmra.mxu2 %v5521_v59  ;;  %v5561_v59 = vor.u32 %v6570_v60, %v5558_v11  ;;  %v5600_v60 = vld [vmem:[%s7135_s11 + $0x4a0] sm:$0xf]  ;;  %v6584_v11 = vld [vmem:[%s7135_s11 + $0x4c0] sm:$0xf0] }
 0x38d   : > { %4069 = vmatmul.bf16.gmra.mxu3 %v5525_v52 }
 0x38e   : > { %4238 = vmatmul.bf16.gmra.mxu0 %v5529_v14  ;;  %v4539_v29 = vmul.f32 %v8048_v20, %v4197_v3 }
 0x38f   : > { %v3861_v63 = vpop.f32.mrf.mxu2 }
 0x390   : > { %v4607_v61 = vadd.f32 %v8063_v53, %v4539_v29  ;;  %v3862_v25 = vadd.f32 %v3861_v63, %v3693_v22  ;;  %v4030_v10 = vpop.f32.mrf.mxu3 }
 0x391   : > { %v3694_v4 = vpop.f32.mrf.mxu1 }
 0x392   : > { %v4671_v13 = vmax.f32 %v4607_v61, 0.0  ;;  %v4031_v23 = vadd.f32 %v4030_v10, %v3862_v25  ;;  %v3695_v45 = vadd.f32 %v3694_v4, %v7656_v55 }
 0x393   : > { %v4201_v43 = vpop.f32.mrf.mxu0 }
 0x394   : > { %v6820_v32 = vpack.c.bf16 %v4671_v13, %v4670_v40  ;;  %v4200_v50 = vadd.f32 %v4199_v6, %v4031_v23  ;;  %v6578_v23 = vld [vmem:[%s7135_s11 + $0x494] sm:$0xf] }
 0x396   : > { %6956 = vst [vmem:[%s8073_s27 + $0x28] sm:$0xff] %v6820_v32   ;;  %v4540_v52 = vmul.f32 %v8048_v20, %v4200_v50  ;;  %v5592_v32 = vld [vmem:[%s7135_s11 + $0x498] sm:$0xf] }
 0x397   : > { %v3863_v16 = vpop.f32.mrf.mxu2 }
 0x398   : > { %v3864_v17 = vadd.f32 %v3863_v16, %v3695_v45  ;;  %v4032_v31 = vpop.f32.mrf.mxu3  ;;  %v4608_v55 = vadd.f32 %v8063_v53, %v4540_v52  ;;  %v5593_v16 = vor.u32 %v6583_v47, %v5592_v32  ;;  %v5636_v32 = vld [vmem:[%s7135_s11 + $0x4e8] sm:$0xf]  ;;  %v6593_v47 = vld [vmem:[%s7135_s11 + $0x508] sm:$0xf0] }
 0x399   : > { %v3697_v62 = vpop.f32.mrf.mxu1 }
 0x39a   : > { %v4033_v14 = vadd.f32 %v4032_v31, %v3864_v17  ;;  %v3698_v3 = vadd.f32 %v3697_v62, %v7661_v27  ;;  %v4672_v25 = vmax.f32 %v4608_v55, 0.0  ;;  %v6579_v27 = vld [vmem:[%s7135_s11 + $0x49c] sm:$0xf] }
 0x39b   : > { %v4204_v0 = vpop.f32.mrf.mxu0  ;;  %v5597_v31 = vor.u32 %v6579_v27, %v5594_v39 }
 0x39c   : > { %v4202_v35 = vadd.f32 %v4201_v43, %v4033_v14  ;;  %3736 = vmatmul.bf16.gmra.mxu1 %v5553_v46  ;;  %3905 = vmatmul.bf16.gmra.mxu2 %v5557_v26  ;;  %v5586_v43 = vld [vmem:[%s7135_s11 + $0x4b4] sm:$0xf0]  ;;  %v5601_v46 = vor.u32 %v6584_v11, %v5600_v60 }
 0x39d   : > { %4074 = vmatmul.bf16.gmra.mxu3 %v5561_v59  ;;  %v5589_v19 = vor.u32 %v6578_v23, %v5586_v43 }
 0x39e   : > { %4243 = vmatmul.bf16.gmra.mxu0 %v5565_v8  ;;  %v4541_v6 = vmul.f32 %v8048_v20, %v4202_v35 }
 0x39f   : > { %v3866_v15 = vpop.f32.mrf.mxu2 }
 0x3a0   : > { %v4609_v29 = vadd.f32 %v8063_v53, %v4541_v6  ;;  %v3867_v22 = vadd.f32 %v3866_v15, %v3698_v3  ;;  %v4035_v63 = vpop.f32.mrf.mxu3 }
 0x3a1   : > { %v3699_v61 = vpop.f32.mrf.mxu1 }
 0x3a2   : > { %v4673_v10 = vmax.f32 %v4609_v29, 0.0  ;;  %v4036_v4 = vadd.f32 %v4035_v63, %v3867_v22  ;;  %v3700_v33 = vadd.f32 %v3699_v61, %v7670_v12 }
 0x3a3   : > { %v4206_v40 = vpop.f32.mrf.mxu0 }
 0x3a4   : > { %v6825_v13 = vpack.c.bf16 %v4673_v10, %v4672_v25  ;;  %v4205_v56 = vadd.f32 %v4204_v0, %v4036_v4  ;;  %v6587_v25 = vld [vmem:[%s7135_s11 + $0x4dc] sm:$0xf]  ;;  %v5622_v10 = vld [vmem:[%s7135_s11 + $0x4fc] sm:$0xf0] }
 0x3a5   : > { %v5628_v4 = vld [vmem:[%s7135_s11 + $0x4e0] sm:$0xf] }
 0x3a6   : > { %6957 = vst [vmem:[%s8073_s27 + $0x30] sm:$0xff] %v6825_v13   ;;  %v4542_v26 = vmul.f32 %v8048_v20, %v4205_v56  ;;  %v5630_v13 = vld [vmem:[%s7135_s11 + $0x504] sm:$0xf0] }
 0x3a7   : > { %v3868_v50 = vpop.f32.mrf.mxu2 }
 0x3a8   : > { %v3869_v45 = vadd.f32 %v3868_v50, %v3700_v33  ;;  %v4037_v58 = vpop.f32.mrf.mxu3  ;;  %v4610_v12 = vadd.f32 %v8063_v53, %v4542_v26  ;;  %v5625_v33 = vor.u32 %v6587_v25, %v5622_v10  ;;  %v5672_v25 = vld [vmem:[%s7135_s11 + $0x530] sm:$0xf]  ;;  %v6602_v10 = vld [vmem:[%s7135_s11 + $0x550] sm:$0xf0] }
 0x3a9   : > { %v3702_v17 = vpop.f32.mrf.mxu1 }
 0x3aa   : > { %v4038_v62 = vadd.f32 %v4037_v58, %v3869_v45  ;;  %v3703_v14 = vadd.f32 %v3702_v17, %v7675_v41  ;;  %v4674_v15 = vmax.f32 %v4610_v12, 0.0  ;;  %v6588_v41 = vld [vmem:[%s7135_s11 + $0x4e4] sm:$0xf]  ;;  %v5637_v45 = vor.u32 %v6593_v47, %v5636_v32 }
 0x3ab   : > { %v4209_v59 = vpop.f32.mrf.mxu0  ;;  %v5633_v50 = vor.u32 %v6588_v41, %v5630_v13  ;;  %v5673_v47 = vor.u32 %v6602_v10, %v5672_v25 }
 0x3ac   : > { %v4207_v8 = vadd.f32 %v4206_v40, %v4038_v62  ;;  %3741 = vmatmul.bf16.gmra.mxu1 %v5589_v19  ;;  %3910 = vmatmul.bf16.gmra.mxu2 %v5593_v16  ;;  %v6592_v40 = vld [vmem:[%s7135_s11 + $0x500] sm:$0xf0] }
 0x3ad   : > { %4079 = vmatmul.bf16.gmra.mxu3 %v5597_v31  ;;  %v5629_v60 = vor.u32 %v6592_v40, %v5628_v4 }
 0x3ae   : > { %4248 = vmatmul.bf16.gmra.mxu0 %v5601_v46  ;;  %v4543_v52 = vmul.f32 %v8048_v20, %v4207_v8 }
 0x3af   : > { %v3871_v0 = vpop.f32.mrf.mxu2 }
 0x3b0   : > { %v4611_v35 = vadd.f32 %v8063_v53, %v4543_v52  ;;  %v3872_v55 = vadd.f32 %v3871_v0, %v3703_v14  ;;  %v4040_v6 = vpop.f32.mrf.mxu3 }
 0x3b1   : > { %v3704_v3 = vpop.f32.mrf.mxu1 }
 0x3b2   : > { %v4675_v29 = vmax.f32 %v4611_v35, 0.0  ;;  %v4041_v22 = vadd.f32 %v4040_v6, %v3872_v55  ;;  %v3705_v43 = vadd.f32 %v3704_v3, %v7684_v28  ;;  %v6596_v6 = vld [vmem:[%s7135_s11 + $0x524] sm:$0xf]  ;;  %v5658_v3 = vld [vmem:[%s7135_s11 + $0x544] sm:$0xf0] }
 0x3b3   : > { %v4211_v63 = vpop.f32.mrf.mxu0  ;;  %v5661_v13 = vor.u32 %v6596_v6, %v5658_v3 }
 0x3b4   : > { %v6830_v61 = vpack.c.bf16 %v4675_v29, %v4674_v15  ;;  %v4210_v23 = vadd.f32 %v4209_v59, %v4041_v22  ;;  %v5664_v15 = vld [vmem:[%s7135_s11 + $0x528] sm:$0xf]  ;;  %v6601_v29 = vld [vmem:[%s7135_s11 + $0x548] sm:$0xf0]  ;;  %v5666_v22 = vld [vmem:[%s7135_s11 + $0x54c] sm:$0xf0] }
 0x3b6   : > { %6958 = vst [vmem:[%s8073_s27 + $0x38] sm:$0xff] %v6830_v61   ;;  %v4544_v58 = vmul.f32 %v8048_v20, %v4210_v23  ;;  %v5665_v23 = vor.u32 %v6601_v29, %v5664_v15 }
 0x3b7   : > { %v3873_v27 = vpop.f32.mrf.mxu2 }
 0x3b8   : > { %v3874_v39 = vadd.f32 %v3873_v27, %v3705_v43  ;;  %v4042_v56 = vpop.f32.mrf.mxu3  ;;  %v4612_v28 = vadd.f32 %v8063_v53, %v4544_v58 }
 0x3b9   : > { %v3707_v11 = vpop.f32.mrf.mxu1 }
 0x3ba   : > { %v4043_v19 = vadd.f32 %v4042_v56, %v3874_v39  ;;  %v3708_v46 = vadd.f32 %v3707_v11, %v7689_v49  ;;  %v4676_v52 = vmax.f32 %v4612_v28, 0.0  ;;  %v6597_v49 = vld [vmem:[%s7135_s11 + $0x52c] sm:$0xf] }
 0x3bb   : > { %v4214_v16 = vpop.f32.mrf.mxu0  ;;  %v5669_v32 = vor.u32 %v6597_v49, %v5666_v22 }
 0x3bc   : > { %v4212_v17 = vadd.f32 %v4211_v63, %v4043_v19  ;;  %3746 = vmatmul.bf16.gmra.mxu1 %v5625_v33  ;;  %3915 = vmatmul.bf16.gmra.mxu2 %v5629_v60 }
 0x3bd   : > { %4084 = vmatmul.bf16.gmra.mxu3 %v5633_v50 }
 0x3be   : > { %4253 = vmatmul.bf16.gmra.mxu0 %v5637_v45  ;;  %v4545_v31 = vmul.f32 %v8048_v20, %v4212_v17 }
 0x3bf   : > { %v3876_v26 = vpop.f32.mrf.mxu2 }
 0x3c0   : > { %v4613_v62 = vadd.f32 %v8063_v53, %v4545_v31  ;;  %v3877_v59 = vadd.f32 %v3876_v26, %v3708_v46  ;;  %v4045_v8 = vpop.f32.mrf.mxu3 }
 0x3c1   : > { %v3709_v12 = vpop.f32.mrf.mxu1 }
 0x3c2   : > { %v4677_v14 = vmax.f32 %v4613_v62, 0.0  ;;  %v4046_v0 = vadd.f32 %v4045_v8, %v3877_v59  ;;  %v3710_v61 = vadd.f32 %v3709_v12, %v7698_v37  ;;  %v6605_v62 = vld [vmem:[%s7135_s11 + $0x56c] sm:$0xf]  ;;  %v5694_v59 = vld [vmem:[%s7135_s11 + $0x58c] sm:$0xf0] }
 0x3c3   : > { %v4216_v35 = vpop.f32.mrf.mxu0  ;;  %v5700_v8 = vld [vmem:[%s7135_s11 + $0x570] sm:$0xf]  ;;  %v6610_v12 = vld [vmem:[%s7135_s11 + $0x590] sm:$0xf0]  ;;  %v5697_v29 = vor.u32 %v6605_v62, %v5694_v59 }
 0x3c4   : > { %v6835_v55 = vpack.c.bf16 %v4677_v14, %v4676_v52  ;;  %v4215_v63 = vadd.f32 %v4214_v16, %v4046_v0  ;;  %v5702_v52 = vld [vmem:[%s7135_s11 + $0x594] sm:$0xf0]  ;;  %v5701_v49 = vor.u32 %v6610_v12, %v5700_v8 }
 0x3c6   : > { %6959 = vst [vmem:[%s8073_s27 + $0x40] sm:$0xff] %v6835_v55   ;;  %v4546_v27 = vmul.f32 %v8048_v20, %v4215_v63  ;;  %v6611_v55 = vld [vmem:[%s7135_s11 + $0x598] sm:$0xf0] }
 0x3c7   : > { %v3878_v4 = vpop.f32.mrf.mxu2 }
 0x3c8   : > { %v3879_v40 = vadd.f32 %v3878_v4, %v3710_v61  ;;  %v4047_v41 = vpop.f32.mrf.mxu3  ;;  %v4614_v37 = vadd.f32 %v8063_v53, %v4546_v27 }
 0x3c9   : > { %v3712_v43 = vpop.f32.mrf.mxu1 }
 0x3ca   : > { %v4048_v39 = vadd.f32 %v4047_v41, %v3879_v40  ;;  %v3713_v11 = vadd.f32 %v3712_v43, %v7715_v57  ;;  %v4678_v17 = vmax.f32 %v4614_v37, 0.0  ;;  %v6606_v57 = vld [vmem:[%s7135_s11 + $0x574] sm:$0xf] }
 0x3cb   : > { %v4219_v56 = vpop.f32.mrf.mxu0  ;;  %v5705_v63 = vor.u32 %v6606_v57, %v5702_v52 }
 0x3cc   : > { %v4217_v33 = vadd.f32 %v4216_v35, %v4048_v39  ;;  %3751 = vmatmul.bf16.gmra.mxu1 %v5661_v13  ;;  %3920 = vmatmul.bf16.gmra.mxu2 %v5665_v23  ;;  %v5708_v35 = vld [vmem:[%s7135_s11 + $0x578] sm:$0xf] }
 0x3cd   : > { %4089 = vmatmul.bf16.gmra.mxu3 %v5669_v32  ;;  %v5709_v61 = vor.u32 %v6611_v55, %v5708_v35 }
 0x3ce   : > { %4258 = vmatmul.bf16.gmra.mxu0 %v5673_v47  ;;  %v4547_v60 = vmul.f32 %v8048_v20, %v4217_v33 }
 0x3cf   : > { %v3881_v50 = vpop.f32.mrf.mxu2 }
 0x3d0   : > { %v4615_v45 = vadd.f32 %v8063_v53, %v4547_v60  ;;  %v3882_v58 = vadd.f32 %v3881_v50, %v3713_v11  ;;  %v4050_v19 = vpop.f32.mrf.mxu3  ;;  %v6614_v11 = vld [vmem:[%s7135_s11 + $0x5b4] sm:$0xf]  ;;  %v5730_v50 = vld [vmem:[%s7135_s11 + $0x5d4] sm:$0xf0] }
 0x3d1   : > { %v3714_v16 = vpop.f32.mrf.mxu1  ;;  %v5733_v59 = vor.u32 %v6614_v11, %v5730_v50 }
 0x3d2   : > { %v4679_v28 = vmax.f32 %v4615_v45, 0.0  ;;  %v4051_v31 = vadd.f32 %v4050_v19, %v3882_v58  ;;  %v3715_v0 = vadd.f32 %v3714_v16, %v7724_v7  ;;  %v5736_v45 = vld [vmem:[%s7135_s11 + $0x5b8] sm:$0xf]  ;;  %v6619_v58 = vld [vmem:[%s7135_s11 + $0x5d8] sm:$0xf0] }
 0x3d3   : > { %v4221_v46 = vpop.f32.mrf.mxu0  ;;  %v5738_v19 = vld [vmem:[%s7135_s11 + $0x5dc] sm:$0xf0]  ;;  %v5737_v8 = vor.u32 %v6619_v58, %v5736_v45 }
 0x3d4   : > { %v6840_v26 = vpack.c.bf16 %v4679_v28, %v4678_v17  ;;  %v4220_v14 = vadd.f32 %v4219_v56, %v4051_v31  ;;  %v5744_v28 = vld [vmem:[%s7135_s11 + $0x5c0] sm:$0xf]  ;;  %v6620_v31 = vld [vmem:[%s7135_s11 + $0x5e0] sm:$0xf0] }
 0x3d5   : > { %v5745_v52 = vor.u32 %v6620_v31, %v5744_v28 }
 0x3d6   : > { %6960 = vst [vmem:[%s8073_s27 + $0x48] sm:$0xff] %v6840_v26   ;;  %v4548_v25 = vmul.f32 %v8048_v20, %v4220_v14 }
 0x3d7   : > { %v3883_v6 = vpop.f32.mrf.mxu2 }
 0x3d8   : > { %v3884_v3 = vadd.f32 %v3883_v6, %v3715_v0  ;;  %v4052_v15 = vpop.f32.mrf.mxu3  ;;  %v4616_v7 = vadd.f32 %v8063_v53, %v4548_v25 }
 0x3d9   : > { %v3717_v22 = vpop.f32.mrf.mxu1 }
 0x3da   : > { %v4053_v10 = vadd.f32 %v4052_v15, %v3884_v3  ;;  %v3718_v13 = vadd.f32 %v3717_v22, %v7729_v36  ;;  %v4680_v39 = vmax.f32 %v4616_v7, 0.0  ;;  %v6615_v36 = vld [vmem:[%s7135_s11 + $0x5bc] sm:$0xf] }
 0x3db   : > { %v4224_v4 = vpop.f32.mrf.mxu0  ;;  %v5741_v57 = vor.u32 %v6615_v36, %v5738_v19  ;;  %v6623_v7 = vld [vmem:[%s7135_s11 + $0x5fc] sm:$0xf] }
 0x3dc   : > { %v4222_v40 = vadd.f32 %v4221_v46, %v4053_v10  ;;  %3756 = vmatmul.bf16.gmra.mxu1 %v5697_v29  ;;  %3925 = vmatmul.bf16.gmra.mxu2 %v5701_v49 }
 0x3dd   : > { %4094 = vmatmul.bf16.gmra.mxu3 %v5705_v63 }
 0x3de   : > { %4263 = vmatmul.bf16.gmra.mxu0 %v5709_v61  ;;  %v4549_v41 = vmul.f32 %v8048_v20, %v4222_v40 }
 0x3df   : > { %v3886_v23 = vpop.f32.mrf.mxu2 }
 0x3e0   : > { %v4617_v43 = vadd.f32 %v8063_v53, %v4549_v41  ;;  %v3887_v32 = vadd.f32 %v3886_v23, %v3718_v13  ;;  %v4055_v47 = vpop.f32.mrf.mxu3  ;;  %v5766_v41 = vld [vmem:[%s7135_s11 + $0x61c] sm:$0xf0]  ;;  %v6628_v23 = vld [vmem:[%s7135_s11 + $0x620] sm:$0xf0] }
 0x3e1   : > { %v3719_v27 = vpop.f32.mrf.mxu1  ;;  %v5772_v13 = vld [vmem:[%s7135_s11 + $0x600] sm:$0xf] }
 0x3e2   : > { %v4681_v56 = vmax.f32 %v4617_v43, 0.0  ;;  %v4056_v33 = vadd.f32 %v4055_v47, %v3887_v32  ;;  %v3720_v17 = vadd.f32 %v3719_v27, %v7738_v34  ;;  %v5774_v43 = vld [vmem:[%s7135_s11 + $0x624] sm:$0xf0]  ;;  %v5773_v11 = vor.u32 %v6628_v23, %v5772_v13 }
 0x3e3   : > { %v4226_v37 = vpop.f32.mrf.mxu0  ;;  %v5780_v27 = vld [vmem:[%s7135_s11 + $0x608] sm:$0xf] }
 0x3e4   : > { %v6845_v60 = vpack.c.bf16 %v4681_v56, %v4680_v39  ;;  %v4225_v16 = vadd.f32 %v4224_v4, %v4056_v33  ;;  %v6629_v39 = vld [vmem:[%s7135_s11 + $0x628] sm:$0xf0] }
 0x3e5   : > { %v5781_v58 = vor.u32 %v6629_v39, %v5780_v27 }
 0x3e6   : > { %6961 = vst [vmem:[%s8073_s27 + $0x50] sm:$0xff] %v6845_v60   ;;  %v4550_v14 = vmul.f32 %v8048_v20, %v4225_v16  ;;  %v5769_v60 = vor.u32 %v6623_v7, %v5766_v41  ;;  %v8268_v7 = vld [vmem:[%s8491_s2] ss:$0 sm:$0xff] }
 0x3e7   : > { %v3888_v46 = vpop.f32.mrf.mxu2 }
 0x3e8   : > { %v3889_v26 = vadd.f32 %v3888_v46, %v3720_v17  ;;  %v4057_v62 = vpop.f32.mrf.mxu3  ;;  %v4618_v34 = vadd.f32 %v8063_v53, %v4550_v14 }
 0x3e9   : > { %v3722_v12 = vpop.f32.mrf.mxu1 }
 0x3ea   : > { %v4058_v0 = vadd.f32 %v4057_v62, %v3889_v26  ;;  %v3723_v3 = vadd.f32 %v3722_v12, %v7743_v1  ;;  %v4682_v61 = vmax.f32 %v4618_v34, 0.0  ;;  %v6624_v1 = vld [vmem:[%s7135_s11 + $0x604] sm:$0xf]  ;;  %v6637_v34 = vld [vmem:[%s7135_s11 + $0x668] sm:$0xf0] }
 0x3eb   : > { %v4229_v35 = vpop.f32.mrf.mxu0  ;;  %v5777_v45 = vor.u32 %v6624_v1, %v5774_v43  ;;  %v8274_v1 = vld [vmem:[%s8492_s3] ss:$0 sm:$0xff] }
 0x3ec   : > { %v4227_v55 = vadd.f32 %v4226_v37, %v4058_v0  ;;  %3761 = vmatmul.bf16.gmra.mxu1 %v5733_v59  ;;  %3930 = vmatmul.bf16.gmra.mxu2 %v5737_v8 }
 0x3ed   : > { %4099 = vmatmul.bf16.gmra.mxu3 %v5741_v57 }
 0x3ee   : > { %4268 = vmatmul.bf16.gmra.mxu0 %v5745_v52  ;;  %v4551_v6 = vmul.f32 %v8048_v20, %v4227_v55  ;;  %v5808_v55 = vld [vmem:[%s7135_s11 + $0x648] sm:$0xf] }
 0x3ef   : > { %v3891_v15 = vpop.f32.mrf.mxu2 }
 0x3f0   : > { %v4619_v29 = vadd.f32 %v8063_v53, %v4551_v6  ;;  %v3892_v49 = vadd.f32 %v3891_v15, %v3723_v3  ;;  %v4060_v22 = vpop.f32.mrf.mxu3  ;;  %v5810_v6 = vld [vmem:[%s7135_s11 + $0x66c] sm:$0xf0] }
 0x3f1   : > { %v3724_v63 = vpop.f32.mrf.mxu1  ;;  %v5816_v15 = vld [vmem:[%s7135_s11 + $0x650] sm:$0xf] }
 0x3f2   : > { %v4683_v25 = vmax.f32 %v4619_v29, 0.0  ;;  %v4061_v10 = vadd.f32 %v4060_v22, %v3892_v49  ;;  %v3725_v47 = vadd.f32 %v3724_v63, %v7752_v2  ;;  %v6638_v29 = vld [vmem:[%s7135_s11 + $0x670] sm:$0xf0] }
 0x3f3   : > { %v4231_v4 = vpop.f32.mrf.mxu0 }
 0x3f4   : > { %v6850_v40 = vpack.c.bf16 %v4683_v25, %v4682_v61  ;;  %v4230_v32 = vadd.f32 %v4229_v35, %v4061_v10  ;;  %v6632_v35 = vld [vmem:[%s7135_s11 + $0x644] sm:$0xf]  ;;  %v5809_v25 = vor.u32 %v6637_v34, %v5808_v55 }
 0x3f6   : > { %6962 = vst [vmem:[%s8073_s27 + $0x58] sm:$0xff] %v6850_v40   ;;  %v4552_v36 = vmul.f32 %v8048_v20, %v4230_v32  ;;  %v5817_v40 = vor.u32 %v6638_v29, %v5816_v15 }
 0x3f7   : > { %v3893_v56 = vpop.f32.mrf.mxu2 }
 0x3f8   : > { %v3894_v33 = vadd.f32 %v3893_v56, %v3725_v47  ;;  %v4062_v37 = vpop.f32.mrf.mxu3  ;;  %v4620_v2 = vadd.f32 %v8063_v53, %v4552_v36  ;;  %v6641_v36 = vld [vmem:[%s7135_s11 + $0x68c] sm:$0xf] }
 0x3f9   : > { %v3727_v50 = vpop.f32.mrf.mxu1 }
 0x3fa   : > { %v4063_v19 = vadd.f32 %v4062_v37, %v3894_v33  ;;  %v3728_v31 = vadd.f32 %v3727_v50, %v7757_v44  ;;  %v4684_v12 = vmax.f32 %v4620_v2, 0.0  ;;  %v6633_v44 = vld [vmem:[%s7135_s11 + $0x64c] sm:$0xf]  ;;  %v5846_v2 = vld [vmem:[%s7135_s11 + $0x6b4] sm:$0xf0] }
 0x3fb   : > { %v4234_v16 = vpop.f32.mrf.mxu0 }
 0x3fc   : > { %v4232_v17 = vadd.f32 %v4231_v4, %v4063_v19  ;;  %3766 = vmatmul.bf16.gmra.mxu1 %v5769_v60  ;;  %3935 = vmatmul.bf16.gmra.mxu2 %v5773_v11  ;;  %v5813_v4 = vor.u32 %v6633_v44, %v5810_v6  ;;  %v5838_v19 = vld [vmem:[%s7135_s11 + $0x6ac] sm:$0xf0] }
 0x3fd   : > { %4104 = vmatmul.bf16.gmra.mxu3 %v5777_v45 }
 0x3fe   : > { %4273 = vmatmul.bf16.gmra.mxu0 %v5781_v58  ;;  %v4553_v28 = vmul.f32 %v8048_v20, %v4232_v17  ;;  %v5802_v20 = vld [vmem:[%s7135_s11 + $0x664] sm:$0xf0]  ;;  %v6646_v17 = vld [vmem:[%s7135_s11 + $0x6b0] sm:$0xf0] }
 0x3ff   : > { %v3896_v46 = vpop.f32.mrf.mxu2  ;;  %v5805_v61 = vor.u32 %v6632_v35, %v5802_v20 }
 0x400   : > { %v4621_v26 = vadd.f32 %v8063_v53, %v4553_v28  ;;  %v3897_v62 = vadd.f32 %v3896_v46, %v3728_v31  ;;  %v4065_v59 = vpop.f32.mrf.mxu3  ;;  %v5852_v46 = vld [vmem:[%s7135_s11 + $0x698] sm:$0xf] }
 0x401   : > { %v3729_v8 = vpop.f32.mrf.mxu1 }
 0x402   : > { %v4685_v57 = vmax.f32 %v4621_v26, 0.0  ;;  %v4066_v52 = vadd.f32 %v4065_v59, %v3897_v62  ;;  %v3730_v53 = vadd.f32 %v3729_v8, %v7766_v42  ;;  %v6647_v26 = vld [vmem:[%s7135_s11 + $0x6b8] sm:$0xf0] }
 0x403   : > { %v4236_v14 = vpop.f32.mrf.mxu0 }
 0x404   : > { %v6855_v0 = vpack.c.bf16 %v4685_v57, %v4684_v12  ;;  %v4235_v3 = vadd.f32 %v4234_v16, %v4066_v52  ;;  %v5844_v16 = vld [vmem:[%s7135_s11 + $0x690] sm:$0xf]  ;;  %v5841_v12 = vor.u32 %v6641_v36, %v5838_v19 }
 0x405   : > { %v5845_v57 = vor.u32 %v6646_v17, %v5844_v16 }
 0x406   : > { %6963 = vst [vmem:[%s8073_s27 + $0x60] sm:$0xff] %v6855_v0   ;;  %v4554_v41 = vmul.f32 %v8268_v7, %v4235_v3  ;;  %v5853_v0 = vor.u32 %v6647_v26, %v5852_v46 }
 0x407   : > { %v3898_v49 = vpop.f32.mrf.mxu2 }
 0x408   : > { %v3899_v22 = vadd.f32 %v3898_v49, %v3730_v53  ;;  %v4067_v63 = vpop.f32.mrf.mxu3  ;;  %v4622_v43 = vadd.f32 %v8274_v1, %v4554_v41  ;;  %v5880_v41 = vld [vmem:[%s7135_s11 + $0x6d8] sm:$0xf] }
 0x409   : > { %v3732_v10 = vpop.f32.mrf.mxu1 }
 0x40a   : > { %v4068_v13 = vadd.f32 %v4067_v63, %v3899_v22  ;;  %v3733_v47 = vadd.f32 %v3732_v10, %v7783_v51  ;;  %v4686_v60 = vmax.f32 %v4622_v43, 0.0  ;;  %v6642_v51 = vld [vmem:[%s7135_s11 + $0x694] sm:$0xf] }
 0x40b   : > { %v4239_v23 = vpop.f32.mrf.mxu0 }
 0x40c   : > { %v4237_v42 = vadd.f32 %v4236_v14, %v4068_v13  ;;  %3771 = vmatmul.bf16.gmra.mxu1 %v5805_v61  ;;  %3940 = vmatmul.bf16.gmra.mxu2 %v5809_v25  ;;  %v5849_v14 = vor.u32 %v6642_v51, %v5846_v2  ;;  %v6655_v13 = vld [vmem:[%s7135_s11 + $0x6f8] sm:$0xf0] }
 0x40d   : > { %4109 = vmatmul.bf16.gmra.mxu3 %v5813_v4  ;;  %v6650_v4 = vld [vmem:[%s7135_s11 + $0x6d4] sm:$0xf] }
 0x40e   : > { %4278 = vmatmul.bf16.gmra.mxu0 %v5817_v40  ;;  %v4555_v32 = vmul.f32 %v8268_v7, %v4237_v42  ;;  %v5874_v40 = vld [vmem:[%s7135_s11 + $0x6f4] sm:$0xf0] }
 0x40f   : > { %v3901_v27 = vpop.f32.mrf.mxu2 }
 0x410   : > { %v4623_v39 = vadd.f32 %v8274_v1, %v4555_v32  ;;  %v3902_v56 = vadd.f32 %v3901_v27, %v3733_v47  ;;  %v4070_v33 = vpop.f32.mrf.mxu3  ;;  %v5888_v32 = vld [vmem:[%s7135_s11 + $0x6e0] sm:$0xf]  ;;  %v6656_v47 = vld [vmem:[%s7135_s11 + $0x700] sm:$0xf0] }
 0x411   : > { %v3734_v37 = vpop.f32.mrf.mxu1 }
 0x412   : > { %v4687_v11 = vmax.f32 %v4623_v39, 0.0  ;;  %v4071_v50 = vadd.f32 %v4070_v33, %v3902_v56  ;;  %v3735_v31 = vadd.f32 %v3734_v37, %v7792_v54  ;;  %v5877_v33 = vor.u32 %v6650_v4, %v5874_v40 }
 0x413   : > { %v4241_v45 = vpop.f32.mrf.mxu0  ;;  %v5881_v37 = vor.u32 %v6655_v13, %v5880_v41 }
 0x414   : > { %v6860_v58 = vpack.c.bf16 %v4687_v11, %v4686_v60  ;;  %v4240_v28 = vadd.f32 %v4239_v23, %v4071_v50  ;;  %v5882_v23 = vld [vmem:[%s7135_s11 + $0x6fc] sm:$0xf0]  ;;  %v5889_v50 = vor.u32 %v6656_v47, %v5888_v32 }
 0x416   : > { %6964 = vst [vmem:[%s8073_s27 + $0x68] sm:$0xff] %v6860_v58   ;;  %v4556_v35 = vmul.f32 %v8268_v7, %v4240_v28 }
 0x417   : > { %v3903_v62 = vpop.f32.mrf.mxu2 }
 0x418   : > { %v3904_v59 = vadd.f32 %v3903_v62, %v3735_v31  ;;  %v4072_v8 = vpop.f32.mrf.mxu3  ;;  %v4624_v54 = vadd.f32 %v8274_v1, %v4556_v35  ;;  %v5918_v35 = vld [vmem:[%s7135_s11 + $0x744] sm:$0xf0] }
 0x419   : > { %v3737_v52 = vpop.f32.mrf.mxu1 }
 0x41a   : > { %v4073_v20 = vadd.f32 %v4072_v8, %v3904_v59  ;;  %v3738_v6 = vadd.f32 %v3737_v52, %v7797_v30  ;;  %v4688_v22 = vmax.f32 %v4624_v54, 0.0  ;;  %v6651_v30 = vld [vmem:[%s7135_s11 + $0x6dc] sm:$0xf]  ;;  %v5910_v52 = vld [vmem:[%s7135_s11 + $0x73c] sm:$0xf0] }
 0x41b   : > { %v4244_v55 = vpop.f32.mrf.mxu0  ;;  %v5885_v11 = vor.u32 %v6651_v30, %v5882_v23  ;;  %v6665_v54 = vld [vmem:[%s7135_s11 + $0x748] sm:$0xf0] }
 0x41c   : > { %v4242_v34 = vadd.f32 %v4241_v45, %v4073_v20  ;;  %3776 = vmatmul.bf16.gmra.mxu1 %v5841_v12  ;;  %3945 = vmatmul.bf16.gmra.mxu2 %v5845_v57  ;;  %v6659_v57 = vld [vmem:[%s7135_s11 + $0x71c] sm:$0xf] }
 0x41d   : > { %4114 = vmatmul.bf16.gmra.mxu3 %v5849_v14  ;;  %v5916_v14 = vld [vmem:[%s7135_s11 + $0x720] sm:$0xf] }
 0x41e   : > { %4283 = vmatmul.bf16.gmra.mxu0 %v5853_v0  ;;  %v4557_v44 = vmul.f32 %v8268_v7, %v4242_v34  ;;  %v6664_v0 = vld [vmem:[%s7135_s11 + $0x740] sm:$0xf0]  ;;  %v5924_v34 = vld [vmem:[%s7135_s11 + $0x728] sm:$0xf] }
 0x41f   : > { %v3906_v3 = vpop.f32.mrf.mxu2 }
 0x420   : > { %v4625_v53 = vadd.f32 %v8274_v1, %v4557_v44  ;;  %v3907_v15 = vadd.f32 %v3906_v3, %v3738_v6  ;;  %v4075_v29 = vpop.f32.mrf.mxu3 }
 0x421   : > { %v3739_v49 = vpop.f32.mrf.mxu1 }
 0x422   : > { %v4689_v63 = vmax.f32 %v4625_v53, 0.0  ;;  %v4076_v61 = vadd.f32 %v4075_v29, %v3907_v15  ;;  %v3740_v43 = vadd.f32 %v3739_v49, %v7806_v9  ;;  %v5913_v53 = vor.u32 %v6659_v57, %v5910_v52 }
 0x423   : > { %v4246_v25 = vpop.f32.mrf.mxu0  ;;  %v5917_v15 = vor.u32 %v6664_v0, %v5916_v14 }
 0x424   : > { %v6865_v10 = vpack.c.bf16 %v4689_v63, %v4688_v22  ;;  %v4245_v42 = vadd.f32 %v4244_v55, %v4076_v61  ;;  %v5925_v22 = vor.u32 %v6665_v54, %v5924_v34 }
 0x426   : > { %6965 = vst [vmem:[%s8073_s27 + $0x70] sm:$0xff] %v6865_v10   ;;  %v4558_v45 = vmul.f32 %v8268_v7, %v4245_v42 }
 0x427   : > { %v3908_v27 = vpop.f32.mrf.mxu2 }
 0x428   : > { %v3909_v39 = vadd.f32 %v3908_v27, %v3740_v43  ;;  %v4077_v56 = vpop.f32.mrf.mxu3  ;;  %v4626_v9 = vadd.f32 %v8274_v1, %v4558_v45 }
 0x429   : > { %v3742_v60 = vpop.f32.mrf.mxu1 }
 0x42a   : > { %v4078_v58 = vadd.f32 %v4077_v56, %v3909_v39  ;;  %v3743_v17 = vadd.f32 %v3742_v60, %v7811_v21  ;;  %v4690_v26 = vmax.f32 %v4626_v9, 0.0  ;;  %v6660_v21 = vld [vmem:[%s7135_s11 + $0x724] sm:$0xf]  ;;  %v6673_v60 = vld [vmem:[%s7135_s11 + $0x788] sm:$0xf0] }
 0x42b   : > { %v4249_v36 = vpop.f32.mrf.mxu0  ;;  %v5921_v49 = vor.u32 %v6660_v21, %v5918_v35  ;;  %v6668_v56 = vld [vmem:[%s7135_s11 + $0x764] sm:$0xf] }
 0x42c   : > { %v4247_v19 = vadd.f32 %v4246_v25, %v4078_v58  ;;  %3781 = vmatmul.bf16.gmra.mxu1 %v5877_v33  ;;  %3950 = vmatmul.bf16.gmra.mxu2 %v5881_v37  ;;  %v5946_v33 = vld [vmem:[%s7135_s11 + $0x784] sm:$0xf0]  ;;  %v5960_v58 = vld [vmem:[%s7135_s11 + $0x770] sm:$0xf] }
 0x42d   : > { %4119 = vmatmul.bf16.gmra.mxu3 %v5885_v11  ;;  %v5952_v37 = vld [vmem:[%s7135_s11 + $0x768] sm:$0xf]  ;;  %v5954_v11 = vld [vmem:[%s7135_s11 + $0x78c] sm:$0xf0] }
 0x42e   : > { %4288 = vmatmul.bf16.gmra.mxu0 %v5889_v50  ;;  %v4559_v16 = vmul.f32 %v8268_v7, %v4247_v19 }
 0x42f   : > { %v3911_v51 = vpop.f32.mrf.mxu2 }
 0x430   : > { %v4627_v2 = vadd.f32 %v8274_v1, %v4559_v16  ;;  %v3912_v28 = vadd.f32 %v3911_v51, %v3743_v17  ;;  %v4080_v31 = vpop.f32.mrf.mxu3  ;;  %v5949_v17 = vor.u32 %v6668_v56, %v5946_v33  ;;  %v5953_v51 = vor.u32 %v6673_v60, %v5952_v37 }
 0x431   : > { %v3744_v46 = vpop.f32.mrf.mxu1 }
 0x432   : > { %v4691_v62 = vmax.f32 %v4627_v2, 0.0  ;;  %v4081_v59 = vadd.f32 %v4080_v31, %v3912_v28  ;;  %v3745_v55 = vadd.f32 %v3744_v46, %v7820_v38 }
 0x433   : > { %v4251_v8 = vpop.f32.mrf.mxu0 }
 0x434   : > { %v6870_v12 = vpack.c.bf16 %v4691_v62, %v4690_v26  ;;  %v4250_v20 = vadd.f32 %v4249_v36, %v4081_v59  ;;  %v6674_v36 = vld [vmem:[%s7135_s11 + $0x790] sm:$0xf0] }
 0x435   : > { %v5961_v31 = vor.u32 %v6674_v36, %v5960_v58  ;;  %v6686_v36 = vld [vmem:[%s7135_s11 + $0x7f4] sm:$0xf] }
 0x436   : > { %6966 = vst [vmem:[%s8073_s27 + $0x78] sm:$0xff] %v6870_v12   ;;  %v4560_v63 = vmul.f32 %v8268_v7, %v4250_v20 }
 0x437   : > { %v3913_v44 = vpop.f32.mrf.mxu2 }
 0x438   : > { %v3914_v6 = vadd.f32 %v3913_v44, %v3745_v55  ;;  %v4082_v3 = vpop.f32.mrf.mxu3  ;;  %v4628_v38 = vadd.f32 %v8274_v1, %v4560_v63  ;;  %v6677_v44 = vld [vmem:[%s7135_s11 + $0x7ac] sm:$0xf]  ;;  %v6683_v63 = vld [vmem:[%s7135_s11 + $0x7d8] sm:$0xf0] }
 0x439   : > { %v3747_v29 = vpop.f32.mrf.mxu1 }
 0x43a   : > { %v4083_v61 = vadd.f32 %v4082_v3, %v3914_v6  ;;  %v3748_v40 = vadd.f32 %v3747_v29, %v7825_v48  ;;  %v4692_v43 = vmax.f32 %v4628_v38, 0.0  ;;  %v6669_v48 = vld [vmem:[%s7135_s11 + $0x76c] sm:$0xf]  ;;  %v5982_v6 = vld [vmem:[%s7135_s11 + $0x7cc] sm:$0xf0] }
 0x43b   : > { %v4254_v25 = vpop.f32.mrf.mxu0  ;;  %v5957_v28 = vor.u32 %v6669_v48, %v5954_v11  ;;  %v5988_v3 = vld [vmem:[%s7135_s11 + $0x7b0] sm:$0xf]  ;;  %v5985_v38 = vor.u32 %v6677_v44, %v5982_v6 }
 0x43c   : > { %v4252_v10 = vadd.f32 %v4251_v8, %v4083_v61  ;;  %3786 = vmatmul.bf16.gmra.mxu1 %v5913_v53  ;;  %3955 = vmatmul.bf16.gmra.mxu2 %v5917_v15  ;;  %v6682_v53 = vld [vmem:[%s7135_s11 + $0x7d0] sm:$0xf0]  ;;  %v5990_v15 = vld [vmem:[%s7135_s11 + $0x7d4] sm:$0xf0] }
 0x43d   : > { %4124 = vmatmul.bf16.gmra.mxu3 %v5921_v49 }
 0x43e   : > { %4293 = vmatmul.bf16.gmra.mxu0 %v5925_v22  ;;  %v4561_v4 = vmul.f32 %v8268_v7, %v4252_v10  ;;  %v5996_v22 = vld [vmem:[%s7135_s11 + $0x7b8] sm:$0xf] }
 0x43f   : > { %v3916_v41 = vpop.f32.mrf.mxu2 }
 0x440   : > { %v4629_v13 = vadd.f32 %v8274_v1, %v4561_v4  ;;  %v3917_v30 = vadd.f32 %v3916_v41, %v3748_v40  ;;  %v4085_v23 = vpop.f32.mrf.mxu3  ;;  %v5989_v4 = vor.u32 %v6682_v53, %v5988_v3 }
 0x441   : > { %v3749_v42 = vpop.f32.mrf.mxu1 }
 0x442   : > { %v4693_v32 = vmax.f32 %v4629_v13, 0.0  ;;  %v4086_v47 = vadd.f32 %v4085_v23, %v3917_v30  ;;  %v3750_v45 = vadd.f32 %v3749_v42, %v7834_v24  ;;  %v5997_v13 = vor.u32 %v6683_v63, %v5996_v22 }
 0x443   : > { %v4256_v27 = vpop.f32.mrf.mxu0 }
 0x444   : > { %v6875_v39 = vpack.c.bf16 %v4693_v32, %v4692_v43  ;;  %v4255_v50 = vadd.f32 %v4254_v25, %v4086_v47  ;;  %v8566_v47 = vld [vmem:[#allocation26_spill] sm:$0xff] }
 0x446   : > { %6967 = vst [vmem:[%s8073_s27 + $0x80] sm:$0xff] %v6875_v39   ;;  %v4562_v46 = vmul.f32 %v8268_v7, %v4255_v50 }
 0x447   : > { %v3918_v19 = vpop.f32.mrf.mxu2 }
 0x448   : > { %v3919_v9 = vadd.f32 %v3918_v19, %v3750_v45  ;;  %v4087_v16 = vpop.f32.mrf.mxu3  ;;  %v4630_v24 = vadd.f32 %v8274_v1, %v4562_v46  ;;  %v6018_v19 = vld [vmem:[%s7135_s11 + $0x814] sm:$0xf0]  ;;  %v6032_v46 = vld [vmem:[%s7135_s11 + $0x800] sm:$0xf] }
 0x449   : > { %v3752_v2 = vpop.f32.mrf.mxu1 }
 0x44a   : > { %v4088_v26 = vadd.f32 %v4087_v16, %v3919_v9  ;;  %v3753_v12 = vadd.f32 %v3752_v2, %v7851_v5  ;;  %v4694_v35 = vmax.f32 %v4630_v24, 0.0  ;;  %v6678_v5 = vld [vmem:[%s7135_s11 + $0x7b4] sm:$0xf]  ;;  %v6024_v9 = vld [vmem:[%s7135_s11 + $0x7f8] sm:$0xf] }
 0x44b   : > { %v4259_v62 = vpop.f32.mrf.mxu0  ;;  %v5993_v41 = vor.u32 %v6678_v5, %v5990_v15  ;;  %v6691_v16 = vld [vmem:[%s7135_s11 + $0x818] sm:$0xf0] }
 0x44c   : > { %v4257_v59 = vadd.f32 %v4256_v27, %v4088_v26  ;;  %3791 = vmatmul.bf16.gmra.mxu1 %v5949_v17  ;;  %3960 = vmatmul.bf16.gmra.mxu2 %v5953_v51  ;;  %v6687_v17 = vld [vmem:[%s7135_s11 + $0x7fc] sm:$0xf]  ;;  %v6026_v51 = vld [vmem:[%s7135_s11 + $0x81c] sm:$0xf0]  ;;  %v6692_v26 = vld [vmem:[%s7135_s11 + $0x820] sm:$0xf0] }
 0x44d   : > { %4129 = vmatmul.bf16.gmra.mxu3 %v5957_v28  ;;  %v8567_v28 = vld [vmem:[#allocation27_spill] sm:$0xff] }
 0x44e   : > { %4298 = vmatmul.bf16.gmra.mxu0 %v5961_v31  ;;  %v4563_v8 = vmul.f32 %v8268_v7, %v4257_v59 }
 0x44f   : > { %v3921_v57 = vpop.f32.mrf.mxu2 }
 0x450   : > { %v4631_v52 = vadd.f32 %v8274_v1, %v4563_v8  ;;  %v3922_v14 = vadd.f32 %v3921_v57, %v3753_v12  ;;  %v4090_v0 = vpop.f32.mrf.mxu3  ;;  %v6021_v8 = vor.u32 %v6686_v36, %v6018_v19  ;;  %v6025_v12 = vor.u32 %v6691_v16, %v6024_v9  ;;  %v8570_v36 = vld [vmem:[#allocation30_spill] sm:$0xff] }
 0x451   : > { %v3754_v21 = vpop.f32.mrf.mxu1 }
 0x452   : > { %v4695_v20 = vmax.f32 %v4631_v52, 0.0  ;;  %v4091_v55 = vadd.f32 %v4090_v0, %v3922_v14  ;;  %v3755_v49 = vadd.f32 %v3754_v21, %v7860_v18  ;;  %v6029_v52 = vor.u32 %v6687_v17, %v6026_v51 }
 0x453   : > { %v4261_v34 = vpop.f32.mrf.mxu0  ;;  %v6033_v14 = vor.u32 %v6692_v26, %v6032_v46 }
 0x454   : > { %v6880_v54 = vpack.c.bf16 %v4695_v20, %v4694_v35  ;;  %v4260_v29 = vadd.f32 %v4259_v62, %v4091_v55 }
 0x456   : > { %6968 = vst [vmem:[%s8073_s27 + $0x88] sm:$0xff] %v6880_v54   ;;  %v4564_v30 = vmul.f32 %v8268_v7, %v4260_v29  ;;  %v8568_v54 = vld [vmem:[#allocation28_spill] sm:$0xff] }
 0x457   : > { %v3923_v61 = vpop.f32.mrf.mxu2 }
 0x458   : > { %v3924_v25 = vadd.f32 %v3923_v61, %v3755_v49  ;;  %v4092_v10 = vpop.f32.mrf.mxu3  ;;  %v4632_v18 = vadd.f32 %v8274_v1, %v4564_v30  ;;  %v8569_v30 = vld [vmem:[#allocation29_spill] sm:$0xff] }
 0x459   : > { %v3757_v40 = vpop.f32.mrf.mxu1 }
 0x45a   : > { %v4093_v23 = vadd.f32 %v4092_v10, %v3924_v25  ;;  %v3758_v27 = vadd.f32 %v3757_v40, %v8566_v47  ;;  %v4696_v48 = vmax.f32 %v4632_v18, 0.0  ;;  %v6695_v25 = vld [vmem:[%s7135_s11 + $0x83c] sm:$0xf]  ;;  %v6054_v10 = vld [vmem:[%s7135_s11 + $0x85c] sm:$0xf0] }
 0x45b   : > { %v4264_v42 = vpop.f32.mrf.mxu0  ;;  %v6696_v40 = vld [vmem:[%s7135_s11 + $0x844] sm:$0xf] }
 0x45c   : > { %v4262_v43 = vadd.f32 %v4261_v34, %v4093_v23  ;;  %3796 = vmatmul.bf16.gmra.mxu1 %v5985_v38  ;;  %3965 = vmatmul.bf16.gmra.mxu2 %v5989_v4  ;;  %v6060_v38 = vld [vmem:[%s7135_s11 + $0x840] sm:$0xf]  ;;  %v6700_v4 = vld [vmem:[%s7135_s11 + $0x860] sm:$0xf0] }
 0x45d   : > { %4134 = vmatmul.bf16.gmra.mxu3 %v5993_v41  ;;  %v6062_v41 = vld [vmem:[%s7135_s11 + $0x864] sm:$0xf0] }
 0x45e   : > { %4303 = vmatmul.bf16.gmra.mxu0 %v5997_v13  ;;  %v4565_v32 = vmul.f32 %v8268_v7, %v4262_v43  ;;  %v6701_v43 = vld [vmem:[%s7135_s11 + $0x868] sm:$0xf0] }
 0x45f   : > { %v3926_v39 = vpop.f32.mrf.mxu2 }
 0x460   : > { %v4633_v56 = vadd.f32 %v8274_v1, %v4565_v32  ;;  %v3927_v33 = vadd.f32 %v3926_v39, %v3758_v27  ;;  %v4095_v37 = vpop.f32.mrf.mxu3  ;;  %v6057_v27 = vor.u32 %v6695_v25, %v6054_v10  ;;  %v6061_v39 = vor.u32 %v6700_v4, %v6060_v38  ;;  %v8572_v25 = vld [vmem:[#allocation16_spill] sm:$0xff] }
 0x461   : > { %v3759_v60 = vpop.f32.mrf.mxu1 }
 0x462   : > { %v4697_v11 = vmax.f32 %v4633_v56, 0.0  ;;  %v4096_v50 = vadd.f32 %v4095_v37, %v3927_v33  ;;  %v3760_v31 = vadd.f32 %v3759_v60, %v8567_v28  ;;  %v6065_v33 = vor.u32 %v6696_v40, %v6062_v41 }
 0x463   : > { %v4266_v45 = vpop.f32.mrf.mxu0 }
 0x464   : > { %v6885_v58 = vpack.c.bf16 %v4697_v11, %v4696_v48  ;;  %v4265_v2 = vadd.f32 %v4264_v42, %v4096_v50  ;;  %v6068_v42 = vld [vmem:[%s7135_s11 + $0x848] sm:$0xf] }
 0x465   : > { %v6069_v37 = vor.u32 %v6701_v43, %v6068_v42 }
 0x466   : > { %6969 = vst [vmem:[%s8073_s27 + $0x90] sm:$0xff] %v6885_v58   ;;  %v4566_v0 = vmul.f32 %v8268_v7, %v4265_v2 }
 0x467   : > { %v3928_v62 = vpop.f32.mrf.mxu2 }
 0x468   : > { %v3929_v59 = vadd.f32 %v3928_v62, %v3760_v31  ;;  %v4097_v24 = vpop.f32.mrf.mxu3  ;;  %v4634_v55 = vadd.f32 %v8274_v1, %v4566_v0  ;;  %v8571_v0 = vld [vmem:[#allocation14_spill] sm:$0xff] }
 0x469   : > { %v3762_v57 = vpop.f32.mrf.mxu1 }
 0x46a   : > { %v4098_v21 = vadd.f32 %v4097_v24, %v3929_v59  ;;  %v3763_v44 = vadd.f32 %v3762_v57, %v8568_v54  ;;  %v4698_v29 = vmax.f32 %v4634_v55, 0.0  ;;  %v6704_v59 = vld [vmem:[%s7135_s11 + $0x884] sm:$0xf]  ;;  %v6090_v24 = vld [vmem:[%s7135_s11 + $0x8a4] sm:$0xf0] }
 0x46b   : > { %v4269_v35 = vpop.f32.mrf.mxu0  ;;  %v6705_v57 = vld [vmem:[%s7135_s11 + $0x88c] sm:$0xf] }
 0x46c   : > { %v4267_v20 = vadd.f32 %v4266_v45, %v4098_v21  ;;  %3801 = vmatmul.bf16.gmra.mxu1 %v6021_v8  ;;  %3970 = vmatmul.bf16.gmra.mxu2 %v6025_v12  ;;  %v6096_v8 = vld [vmem:[%s7135_s11 + $0x888] sm:$0xf]  ;;  %v6709_v12 = vld [vmem:[%s7135_s11 + $0x8a8] sm:$0xf0] }
 0x46d   : > { %4139 = vmatmul.bf16.gmra.mxu3 %v6029_v52  ;;  %v6098_v52 = vld [vmem:[%s7135_s11 + $0x8ac] sm:$0xf0] }
 0x46e   : > { %4308 = vmatmul.bf16.gmra.mxu0 %v6033_v14  ;;  %v4567_v34 = vmul.f32 %v8268_v7, %v4267_v20  ;;  %v6710_v20 = vld [vmem:[%s7135_s11 + $0x8b0] sm:$0xf0] }
 0x46f   : > { %v3931_v6 = vpop.f32.mrf.mxu2 }
 0x470   : > { %v4635_v3 = vadd.f32 %v8274_v1, %v4567_v34  ;;  %v3932_v53 = vadd.f32 %v3931_v6, %v3763_v44  ;;  %v4100_v5 = vpop.f32.mrf.mxu3  ;;  %v6093_v44 = vor.u32 %v6704_v59, %v6090_v24  ;;  %v6097_v6 = vor.u32 %v6709_v12, %v6096_v8  ;;  %v8574_v59 = vld [vmem:[#allocation20_spill] sm:$0xff] }
 0x471   : > { %v3764_v15 = vpop.f32.mrf.mxu1 }
 0x472   : > { %v4699_v49 = vmax.f32 %v4635_v3, 0.0  ;;  %v4101_v22 = vadd.f32 %v4100_v5, %v3932_v53  ;;  %v3765_v23 = vadd.f32 %v3764_v15, %v8569_v30  ;;  %v6101_v53 = vor.u32 %v6705_v57, %v6098_v52 }
 0x473   : > { %v4271_v63 = vpop.f32.mrf.mxu0 }
 0x474   : > { %v6890_v61 = vpack.c.bf16 %v4699_v49, %v4698_v29  ;;  %v4270_v13 = vadd.f32 %v4269_v35, %v4101_v22  ;;  %v6104_v35 = vld [vmem:[%s7135_s11 + $0x890] sm:$0xf] }
 0x475   : > { %v6105_v5 = vor.u32 %v6710_v20, %v6104_v35 }
 0x476   : > { %6970 = vst [vmem:[%s8073_s27 + $0x98] sm:$0xff] %v6890_v61   ;;  %v4568_v60 = vmul.f32 %v8268_v7, %v4270_v13 }
 0x477   : > { %v3933_v18 = vpop.f32.mrf.mxu2 }
 0x478   : > { %v3934_v32 = vadd.f32 %v3933_v18, %v3765_v23  ;;  %v4102_v47 = vpop.f32.mrf.mxu3  ;;  %v4636_v45 = vadd.f32 %v8274_v1, %v4568_v60  ;;  %v8573_v60 = vld [vmem:[#allocation18_spill] sm:$0xff] }
 0x479   : > { %v3767_v56 = vpop.f32.mrf.mxu1 }
 0x47a   : > { %v4103_v48 = vadd.f32 %v4102_v47, %v3934_v32  ;;  %v3768_v19 = vadd.f32 %v3767_v56, %v8570_v36  ;;  %v4700_v28 = vmax.f32 %v4636_v45, 0.0  ;;  %v6713_v32 = vld [vmem:[%s7135_s11 + $0x8cc] sm:$0xf]  ;;  %v6126_v47 = vld [vmem:[%s7135_s11 + $0x8ec] sm:$0xf0] }
 0x47b   : > { %v4274_v11 = vpop.f32.mrf.mxu0  ;;  %v6714_v56 = vld [vmem:[%s7135_s11 + $0x8d4] sm:$0xf] }
 0x47c   : > { %v4272_v50 = vadd.f32 %v4271_v63, %v4103_v48  ;;  %3806 = vmatmul.bf16.gmra.mxu1 %v6057_v27  ;;  %3975 = vmatmul.bf16.gmra.mxu2 %v6061_v39  ;;  %v6132_v27 = vld [vmem:[%s7135_s11 + $0x8d0] sm:$0xf]  ;;  %v6718_v39 = vld [vmem:[%s7135_s11 + $0x8f0] sm:$0xf0] }
 0x47d   : > { %4144 = vmatmul.bf16.gmra.mxu3 %v6065_v33  ;;  %v6134_v33 = vld [vmem:[%s7135_s11 + $0x8f4] sm:$0xf0] }
 0x47e   : > { %4313 = vmatmul.bf16.gmra.mxu0 %v6069_v37  ;;  %v4569_v58 = vmul.f32 %v8268_v7, %v4272_v50  ;;  %v6719_v50 = vld [vmem:[%s7135_s11 + $0x8f8] sm:$0xf0] }
 0x47f   : > { %v3936_v9 = vpop.f32.mrf.mxu2 }
 0x480   : > { %v4637_v16 = vadd.f32 %v8274_v1, %v4569_v58  ;;  %v3937_v17 = vadd.f32 %v3936_v9, %v3768_v19  ;;  %v4105_v51 = vpop.f32.mrf.mxu3  ;;  %v6129_v19 = vor.u32 %v6713_v32, %v6126_v47  ;;  %v6133_v9 = vor.u32 %v6718_v39, %v6132_v27  ;;  %v8577_v47 = vld [vmem:[#allocation4_spill] sm:$0xff] }
 0x481   : > { %v3769_v2 = vpop.f32.mrf.mxu1 }
 0x482   : > { %v4701_v31 = vmax.f32 %v4637_v16, 0.0  ;;  %v4106_v46 = vadd.f32 %v4105_v51, %v3937_v17  ;;  %v3770_v21 = vadd.f32 %v3769_v2, %v8571_v0  ;;  %v6137_v17 = vor.u32 %v6714_v56, %v6134_v33 }
 0x483   : > { %v4276_v26 = vpop.f32.mrf.mxu0 }
 0x484   : > { %v6895_v62 = vpack.c.bf16 %v4701_v31, %v4700_v28  ;;  %v4275_v14 = vadd.f32 %v4274_v11, %v4106_v46  ;;  %v6140_v11 = vld [vmem:[%s7135_s11 + $0x8d8] sm:$0xf] }
 0x485   : > { %v6141_v51 = vor.u32 %v6719_v50, %v6140_v11 }
 0x486   : > { %6971 = vst [vmem:[%s8073_s27 + $0xa0] sm:$0xff] %v6895_v62   ;;  %v4570_v15 = vmul.f32 %v8268_v7, %v4275_v14 }
 0x487   : > { %v3938_v55 = vpop.f32.mrf.mxu2 }
 0x488   : > { %v3939_v34 = vadd.f32 %v3938_v55, %v3770_v21  ;;  %v4107_v54 = vpop.f32.mrf.mxu3  ;;  %v4638_v63 = vadd.f32 %v8274_v1, %v4570_v15 }
 0x489   : > { %v3772_v3 = vpop.f32.mrf.mxu1 }
 0x48a   : > { %v4108_v29 = vadd.f32 %v4107_v54, %v3939_v34  ;;  %v3773_v10 = vadd.f32 %v3772_v3, %v8572_v25  ;;  %v4702_v30 = vmax.f32 %v4638_v63, 0.0  ;;  %v8575_v54 = vld [vmem:[#allocation22_spill] sm:$0xff]  ;;  %v8576_v25 = vld [vmem:[#allocation3_spill] sm:$0xff] }
 0x48b   : > { %v4279_v49 = vpop.f32.mrf.mxu0 }
 0x48c   : > { %v4277_v22 = vadd.f32 %v4276_v26, %v4108_v29  ;;  %3811 = vmatmul.bf16.gmra.mxu1 %v6093_v44  ;;  %3980 = vmatmul.bf16.gmra.mxu2 %v6097_v6 }
 0x48d   : > { %4149 = vmatmul.bf16.gmra.mxu3 %v6101_v53 }
 0x48e   : > { %4318 = vmatmul.bf16.gmra.mxu0 %v6105_v5  ;;  %v4571_v61 = vmul.f32 %v8268_v7, %v4277_v22 }
 0x48f   : > { %v3941_v38 = vpop.f32.mrf.mxu2 }
 0x490   : > { %v4639_v4 = vadd.f32 %v8274_v1, %v4571_v61  ;;  %v3942_v40 = vadd.f32 %v3941_v38, %v3773_v10  ;;  %v4110_v41 = vpop.f32.mrf.mxu3 }
 0x491   : > { %v3774_v13 = vpop.f32.mrf.mxu1 }
 0x492   : > { %v4703_v23 = vmax.f32 %v4639_v4, 0.0  ;;  %v4111_v42 = vadd.f32 %v4110_v41, %v3942_v40  ;;  %v3775_v48 = vadd.f32 %v3774_v13, %v8573_v60 }
 0x493   : > { %v4281_v43 = vpop.f32.mrf.mxu0 }
 0x494   : > { %v6900_v18 = vpack.c.bf16 %v4703_v23, %v4702_v30  ;;  %v4280_v37 = vadd.f32 %v4279_v49, %v4111_v42 }
 0x496   : > { %6972 = vst [vmem:[%s8073_s27 + $0xa8] sm:$0xff] %v6900_v18   ;;  %v4572_v2 = vmul.f32 %v8268_v7, %v4280_v37 }
 0x497   : > { %v3943_v45 = vpop.f32.mrf.mxu2 }
 0x498   : > { %v3944_v58 = vadd.f32 %v3943_v45, %v3775_v48  ;;  %v4112_v36 = vpop.f32.mrf.mxu3  ;;  %v4640_v26 = vadd.f32 %v8274_v1, %v4572_v2 }
 0x499   : > { %v3777_v16 = vpop.f32.mrf.mxu1 }
 0x49a   : > { %v4113_v28 = vadd.f32 %v4112_v36, %v3944_v58  ;;  %v3778_v24 = vadd.f32 %v3777_v16, %v8574_v59  ;;  %v4704_v0 = vmax.f32 %v4640_v26, 0.0  ;;  %v8578_v36 = vld [vmem:[#allocation5_spill] sm:$0xff] }
 0x49b   : > { %v4284_v31 = vpop.f32.mrf.mxu0 }
 0x49c   : > { %v4282_v46 = vadd.f32 %v4281_v43, %v4113_v28  ;;  %3816 = vmatmul.bf16.gmra.mxu1 %v6129_v19  ;;  %3985 = vmatmul.bf16.gmra.mxu2 %v6133_v9 }
 0x49d   : > { %4154 = vmatmul.bf16.gmra.mxu3 %v6137_v17 }
 0x49e   : > { %4323 = vmatmul.bf16.gmra.mxu0 %v6141_v51  ;;  %v4573_v62 = vmul.f32 %v8268_v7, %v4282_v46 }
 0x49f   : > { %v3946_v8 = vpop.f32.mrf.mxu2 }
 0x4a0   : > { %v4641_v12 = vadd.f32 %v8274_v1, %v4573_v62  ;;  %v3947_v57 = vadd.f32 %v3946_v8, %v3778_v24  ;;  %v4115_v52 = vpop.f32.mrf.mxu3  ;;  %v8579_v24 = vld [vmem:[#allocation6_spill] sm:$0xff] }
 0x4a1   : > { %v3779_v14 = vpop.f32.mrf.mxu1 }
 0x4a2   : > { %v4705_v21 = vmax.f32 %v4641_v12, 0.0  ;;  %v4116_v35 = vadd.f32 %v4115_v52, %v3947_v57  ;;  %v3780_v44 = vadd.f32 %v3779_v14, %v8575_v54  ;;  %v8580_v54 = vld [vmem:[#allocation7_spill] sm:$0xff] }
 0x4a3   : > { %v4286_v20 = vpop.f32.mrf.mxu0 }
 0x4a4   : > { %v6905_v55 = vpack.c.bf16 %v4705_v21, %v4704_v0  ;;  %v4285_v34 = vadd.f32 %v4284_v31, %v4116_v35 }
 0x4a6   : > { %6973 = vst [vmem:[%s8073_s27 + $0xb0] sm:$0xff] %v6905_v55   ;;  %v4574_v15 = vmul.f32 %v8268_v7, %v4285_v34 }
 0x4a7   : > { %v3948_v6 = vpop.f32.mrf.mxu2 }
 0x4a8   : > { %v3949_v3 = vadd.f32 %v3948_v6, %v3780_v44  ;;  %v4117_v53 = vpop.f32.mrf.mxu3  ;;  %v4642_v63 = vadd.f32 %v8274_v1, %v4574_v15 }
 0x4a9   : > { %v3782_v5 = vpop.f32.mrf.mxu1 }
 0x4aa   : > { %v4118_v29 = vadd.f32 %v4117_v53, %v3949_v3  ;;  %v3783_v10 = vadd.f32 %v3782_v5, %v8576_v25  ;;  %v4706_v30 = vmax.f32 %v4642_v63, 0.0 }
 0x4ab   : > { %v4289_v49 = vpop.f32.mrf.mxu0 }
 0x4ac   : > { %v4287_v22 = vadd.f32 %v4286_v20, %v4118_v29 }
 0x4ae   : > { %v4575_v61 = vmul.f32 %v8268_v7, %v4287_v22 }
 0x4af   : > { %v3951_v38 = vpop.f32.mrf.mxu2 }
 0x4b0   : > { %v4643_v4 = vadd.f32 %v8274_v1, %v4575_v61  ;;  %v3952_v40 = vadd.f32 %v3951_v38, %v3783_v10  ;;  %v4120_v41 = vpop.f32.mrf.mxu3  ;;  %v8581_v10 = vld [vmem:[#allocation8_spill] sm:$0xff] }
 0x4b1   : > { %v3784_v13 = vpop.f32.mrf.mxu1 }
 0x4b2   : > { %v4707_v23 = vmax.f32 %v4643_v4, 0.0  ;;  %v4121_v42 = vadd.f32 %v4120_v41, %v3952_v40  ;;  %v3785_v27 = vadd.f32 %v3784_v13, %v8577_v47  ;;  %v8582_v47 = vld [vmem:[#allocation9_spill] sm:$0xff] }
 0x4b3   : > { %v4291_v43 = vpop.f32.mrf.mxu0 }
 0x4b4   : > { %v6910_v18 = vpack.c.bf16 %v4707_v23, %v4706_v30  ;;  %v4290_v32 = vadd.f32 %v4289_v49, %v4121_v42 }
 0x4b6   : > { %6974 = vst [vmem:[%s8073_s27 + $0xb8] sm:$0xff] %v6910_v18   ;;  %v4576_v60 = vmul.f32 %v8268_v7, %v4290_v32 }
 0x4b7   : > { %v3953_v39 = vpop.f32.mrf.mxu2 }
 0x4b8   : > { %v3954_v56 = vadd.f32 %v3953_v39, %v3785_v27  ;;  %v4122_v33 = vpop.f32.mrf.mxu3  ;;  %v4644_v45 = vadd.f32 %v8274_v1, %v4576_v60 }
 0x4b9   : > { %v3787_v37 = vpop.f32.mrf.mxu1 }
 0x4ba   : > { %v4123_v48 = vadd.f32 %v4122_v33, %v3954_v56  ;;  %v3788_v19 = vadd.f32 %v3787_v37, %v8578_v36  ;;  %v4708_v28 = vmax.f32 %v4644_v45, 0.0 }
 0x4bb   : > { %v4294_v11 = vpop.f32.mrf.mxu0 }
 0x4bc   : > { %v4292_v50 = vadd.f32 %v4291_v43, %v4123_v48 }
 0x4be   : > { %v4577_v58 = vmul.f32 %v8268_v7, %v4292_v50 }
 0x4bf   : > { %v3956_v9 = vpop.f32.mrf.mxu2 }
 0x4c0   : > { %v4645_v16 = vadd.f32 %v8274_v1, %v4577_v58  ;;  %v3957_v17 = vadd.f32 %v3956_v9, %v3788_v19  ;;  %v4125_v51 = vpop.f32.mrf.mxu3  ;;  %v8583_v19 = vld [vmem:[#allocation10_spill] sm:$0xff] }
 0x4c1   : > { %v3789_v2 = vpop.f32.mrf.mxu1 }
 0x4c2   : > { %v4709_v31 = vmax.f32 %v4645_v16, 0.0  ;;  %v4126_v46 = vadd.f32 %v4125_v51, %v3957_v17  ;;  %v3790_v8 = vadd.f32 %v3789_v2, %v8579_v24  ;;  %v8584_v24 = vld [vmem:[#allocation11_spill] sm:$0xff] }
 0x4c3   : > { %v4296_v26 = vpop.f32.mrf.mxu0 }
 0x4c4   : > { %v6915_v62 = vpack.c.bf16 %v4709_v31, %v4708_v28  ;;  %v4295_v59 = vadd.f32 %v4294_v11, %v4126_v46 }
 0x4c6   : > { %6975 = vst [vmem:[%s8073_s27 + $0xc0] sm:$0xff] %v6915_v62   ;;  %v4578_v0 = vmul.f32 %v8268_v7, %v4295_v59 }
 0x4c7   : > { %v3958_v12 = vpop.f32.mrf.mxu2 }
 0x4c8   : > { %v3959_v57 = vadd.f32 %v3958_v12, %v3790_v8  ;;  %v4127_v52 = vpop.f32.mrf.mxu3  ;;  %v4646_v55 = vadd.f32 %v8274_v1, %v4578_v0 }
 0x4c9   : > { %v3792_v14 = vpop.f32.mrf.mxu1 }
 0x4ca   : > { %v4128_v21 = vadd.f32 %v4127_v52, %v3959_v57  ;;  %v3793_v44 = vadd.f32 %v3792_v14, %v8580_v54  ;;  %v4710_v29 = vmax.f32 %v4646_v55, 0.0 }
 0x4cb   : > { %v4299_v35 = vpop.f32.mrf.mxu0 }
 0x4cc   : > { %v4297_v20 = vadd.f32 %v4296_v26, %v4128_v21 }
 0x4ce   : > { %v4579_v34 = vmul.f32 %v8268_v7, %v4297_v20 }
 0x4cf   : > { %v3961_v6 = vpop.f32.mrf.mxu2 }
 0x4d0   : > { %v4647_v3 = vadd.f32 %v8274_v1, %v4579_v34  ;;  %v3962_v53 = vadd.f32 %v3961_v6, %v3793_v44  ;;  %v4130_v5 = vpop.f32.mrf.mxu3  ;;  %v8585_v44 = vld [vmem:[#allocation12_spill] sm:$0xff] }
 0x4d1   : > { %v3794_v15 = vpop.f32.mrf.mxu1 }
 0x4d2   : > { %v4711_v49 = vmax.f32 %v4647_v3, 0.0  ;;  %v4131_v22 = vadd.f32 %v4130_v5, %v3962_v53  ;;  %v3795_v38 = vadd.f32 %v3794_v15, %v8581_v10 }
 0x4d3   : > { %v4301_v63 = vpop.f32.mrf.mxu0 }
 0x4d4   : > { %v6920_v61 = vpack.c.bf16 %v4711_v49, %v4710_v29  ;;  %v4300_v25 = vadd.f32 %v4299_v35, %v4131_v22 }
 0x4d6   : > { %6976 = vst [vmem:[%s8073_s27 + $0xc8] sm:$0xff] %v6920_v61   ;;  %v4580_v30 = vmul.f32 %v8268_v7, %v4300_v25  ;;  %v8457_v25 = vld [vmem:[%s8491_s2] ss:$0 sm:$0xff] }
 0x4d7   : > { %v3963_v4 = vpop.f32.mrf.mxu2 }
 0x4d8   : > { %v3964_v40 = vadd.f32 %v3963_v4, %v3795_v38  ;;  %v4132_v41 = vpop.f32.mrf.mxu3  ;;  %v4648_v18 = vadd.f32 %v8274_v1, %v4580_v30  ;;  %v8586_v38 = vld [vmem:[#allocation13_spill] sm:$0xff] }
 0x4d9   : > { %v3797_v13 = vpop.f32.mrf.mxu1 }
 0x4da   : > { %v4133_v23 = vadd.f32 %v4132_v41, %v3964_v40  ;;  %v3798_v27 = vadd.f32 %v3797_v13, %v8582_v47  ;;  %v4712_v48 = vmax.f32 %v4648_v18, 0.0 }
 0x4db   : > { %v4304_v42 = vpop.f32.mrf.mxu0 }
 0x4dc   : > { %v4302_v43 = vadd.f32 %v4301_v63, %v4133_v23 }
 0x4de   : > { %v4581_v32 = vmul.f32 %v8268_v7, %v4302_v43 }
 0x4df   : > { %v3966_v39 = vpop.f32.mrf.mxu2 }
 0x4e0   : > { %v4649_v56 = vadd.f32 %v8274_v1, %v4581_v32  ;;  %v3967_v33 = vadd.f32 %v3966_v39, %v3798_v27  ;;  %v4135_v37 = vpop.f32.mrf.mxu3  ;;  %v8587_v27 = vld [vmem:[#allocation15_spill] sm:$0xff] }
 0x4e1   : > { %v3799_v60 = vpop.f32.mrf.mxu1 }
 0x4e2   : > { %v4713_v11 = vmax.f32 %v4649_v56, 0.0  ;;  %v4136_v50 = vadd.f32 %v4135_v37, %v3967_v33  ;;  %v3800_v9 = vadd.f32 %v3799_v60, %v8583_v19  ;;  %v8588_v19 = vld [vmem:[#allocation17_spill] sm:$0xff] }
 0x4e3   : > { %v4306_v45 = vpop.f32.mrf.mxu0 }
 0x4e4   : > { %v6925_v58 = vpack.c.bf16 %v4713_v11, %v4712_v48  ;;  %v4305_v36 = vadd.f32 %v4304_v42, %v4136_v50 }
 0x4e6   : > { %6977 = vst [vmem:[%s8073_s27 + $0xd0] sm:$0xff] %v6925_v58   ;;  %v4582_v28 = vmul.f32 %v8268_v7, %v4305_v36 }
 0x4e7   : > { %v3968_v16 = vpop.f32.mrf.mxu2 }
 0x4e8   : > { %v3969_v17 = vadd.f32 %v3968_v16, %v3800_v9  ;;  %v4137_v51 = vpop.f32.mrf.mxu3  ;;  %v4650_v62 = vadd.f32 %v8274_v1, %v4582_v28 }
 0x4e9   : > { %v3802_v2 = vpop.f32.mrf.mxu1 }
 0x4ea   : > { %v4138_v31 = vadd.f32 %v4137_v51, %v3969_v17  ;;  %v3803_v8 = vadd.f32 %v3802_v2, %v8584_v24  ;;  %v4714_v21 = vmax.f32 %v4650_v62, 0.0  ;;  %v8589_v24 = vld [vmem:[#allocation19_spill] sm:$0xff] }
 0x4eb   : > { %v4309_v46 = vpop.f32.mrf.mxu0 }
 0x4ec   : > { %v4307_v26 = vadd.f32 %v4306_v45, %v4138_v31  ;;  %v7037_v45 = vld [vmem:[%s8492_s3] ss:$0 sm:$0xff] }
 0x4ee   : > { %v4583_v59 = vmul.f32 %v8268_v7, %v4307_v26 }
 0x4ef   : > { %v3971_v12 = vpop.f32.mrf.mxu2 }
 0x4f0   : > { %v4651_v57 = vadd.f32 %v8274_v1, %v4583_v59  ;;  %v3972_v52 = vadd.f32 %v3971_v12, %v3803_v8  ;;  %v4140_v14 = vpop.f32.mrf.mxu3 }
 0x4f1   : > { %v3804_v0 = vpop.f32.mrf.mxu1 }
 0x4f2   : > { %v4715_v35 = vmax.f32 %v4651_v57, 0.0  ;;  %v4141_v20 = vadd.f32 %v4140_v14, %v3972_v52  ;;  %v3805_v6 = vadd.f32 %v3804_v0, %v8585_v44 }
 0x4f3   : > { %v4311_v55 = vpop.f32.mrf.mxu0 }
 0x4f4   : > { %v6930_v34 = vpack.c.bf16 %v4715_v35, %v4714_v21  ;;  %v4310_v54 = vadd.f32 %v4309_v46, %v4141_v20 }
 0x4f6   : > { %6978 = vst [vmem:[%s8073_s27 + $0xd8] sm:$0xff] %v6930_v34   ;;  %v4584_v29 = vmul.f32 %v8268_v7, %v4310_v54  ;;  %v8590_v54 = vld [vmem:[#allocation21_spill] sm:$0xff] }
 0x4f7   : > { %v3973_v3 = vpop.f32.mrf.mxu2 }
 0x4f8   : > { %v3974_v53 = vadd.f32 %v3973_v3, %v3805_v6  ;;  %v4142_v5 = vpop.f32.mrf.mxu3  ;;  %v4652_v61 = vadd.f32 %v8274_v1, %v4584_v29 }
 0x4f9   : > { %v3807_v15 = vpop.f32.mrf.mxu1 }
 0x4fa   : > { %v4143_v49 = vadd.f32 %v4142_v5, %v3974_v53  ;;  %v3808_v4 = vadd.f32 %v3807_v15, %v8586_v38  ;;  %v4716_v23 = vmax.f32 %v4652_v61, 0.0  ;;  %v8591_v38 = vld [vmem:[#allocation23_spill] sm:$0xff] }
 0x4fb   : > { %v4314_v22 = vpop.f32.mrf.mxu0 }
 0x4fc   : > { %v4312_v63 = vadd.f32 %v4311_v55, %v4143_v49 }
 0x4fe   : > { %v4585_v10 = vmul.f32 %v8457_v25, %v4312_v63 }
 0x4ff   : > { %v3976_v40 = vpop.f32.mrf.mxu2 }
 0x500   : > { %v4653_v41 = vadd.f32 %v8274_v1, %v4585_v10  ;;  %v3977_v13 = vadd.f32 %v3976_v40, %v3808_v4  ;;  %v4145_v7 = vpop.f32.mrf.mxu3 }
 0x501   : > { %v3809_v30 = vpop.f32.mrf.mxu1 }
 0x502   : > { %v4717_v42 = vmax.f32 %v4653_v41, 0.0  ;;  %v4146_v43 = vadd.f32 %v4145_v7, %v3977_v13  ;;  %v3810_v39 = vadd.f32 %v3809_v30, %v8587_v27 }
 0x503   : > { %v4316_v18 = vpop.f32.mrf.mxu0 }
 0x504   : > { %v6935_v32 = vpack.c.bf16 %v4717_v42, %v4716_v23  ;;  %v4315_v47 = vadd.f32 %v4314_v22, %v4146_v43 }
 0x506   : > { %6979 = vst [vmem:[%s8073_s27 + $0xe0] sm:$0xff] %v6935_v32   ;;  %v4586_v48 = vmul.f32 %v8457_v25, %v4315_v47 }
 0x507   : > { %v3978_v56 = vpop.f32.mrf.mxu2 }
 0x508   : > { %v3979_v33 = vadd.f32 %v3978_v56, %v3810_v39  ;;  %v4147_v37 = vpop.f32.mrf.mxu3  ;;  %v4654_v58 = vadd.f32 %v7037_v45, %v4586_v48 }
 0x509   : > { %v3812_v60 = vpop.f32.mrf.mxu1 }
 0x50a   : > { %v4148_v11 = vadd.f32 %v4147_v37, %v3979_v33  ;;  %v3813_v9 = vadd.f32 %v3812_v60, %v8588_v19  ;;  %v4718_v31 = vmax.f32 %v4654_v58, 0.0 }
 0x50b   : > { %v4319_v50 = vpop.f32.mrf.mxu0 }
 0x50c   : > { %v4317_v1 = vadd.f32 %v4316_v18, %v4148_v11 }
 0x50e   : > { %v4587_v36 = vmul.f32 %v8457_v25, %v4317_v1 }
 0x50f   : > { %v3981_v16 = vpop.f32.mrf.mxu2 }
 0x510   : > { %v4655_v17 = vadd.f32 %v7037_v45, %v4587_v36  ;;  %v3982_v51 = vadd.f32 %v3981_v16, %v3813_v9  ;;  %v4150_v2 = vpop.f32.mrf.mxu3 }
 0x511   : > { %v3814_v28 = vpop.f32.mrf.mxu1 }
 0x512   : > { %v4719_v46 = vmax.f32 %v4655_v17, 0.0  ;;  %v4151_v26 = vadd.f32 %v4150_v2, %v3982_v51  ;;  %v3815_v8 = vadd.f32 %v3814_v28, %v8589_v24 }
 0x513   : > { %v4321_v12 = vpop.f32.mrf.mxu0 }
 0x514   : > { %v6940_v62 = vpack.c.bf16 %v4719_v46, %v4718_v31  ;;  %v4320_v59 = vadd.f32 %v4319_v50, %v4151_v26 }
 0x516   : > { %6980 = vst [vmem:[%s8073_s27 + $0xe8] sm:$0xff] %v6940_v62   ;;  %v4588_v21 = vmul.f32 %v8457_v25, %v4320_v59 }
 0x517   : > { %v3983_v57 = vpop.f32.mrf.mxu2 }
 0x518   : > { %v3984_v52 = vadd.f32 %v3983_v57, %v3815_v8  ;;  %v4152_v14 = vpop.f32.mrf.mxu3  ;;  %v4656_v55 = vadd.f32 %v7037_v45, %v4588_v21 }
 0x519   : > { %v3817_v0 = vpop.f32.mrf.mxu1 }
 0x51a   : > { %v4153_v35 = vadd.f32 %v4152_v14, %v3984_v52  ;;  %v3818_v44 = vadd.f32 %v3817_v0, %v8590_v54  ;;  %v4720_v29 = vmax.f32 %v4656_v55, 0.0 }
 0x51b   : > { %v4324_v15 = vpop.f32.mrf.mxu0 }
 0x51c   : > { %v4322_v20 = vadd.f32 %v4321_v12, %v4153_v35 }
 0x51e   : > { %v4589_v34 = vmul.f32 %v8457_v25, %v4322_v20 }
 0x51f   : > { %v3986_v6 = vpop.f32.mrf.mxu2 }
 0x520   : > { %v4657_v3 = vadd.f32 %v7037_v45, %v4589_v34  ;;  %v3987_v53 = vadd.f32 %v3986_v6, %v3818_v44  ;;  %v4155_v5 = vpop.f32.mrf.mxu3 }
 0x521   : > { %v3819_v63 = vpop.f32.mrf.mxu1 }
 0x522   : > { %v4721_v49 = vmax.f32 %v4657_v3, 0.0  ;;  %v4156_v22 = vadd.f32 %v4155_v5, %v3987_v53  ;;  %v3820_v4 = vadd.f32 %v3819_v63, %v8591_v38 }
 0x523   : > { %v4326_v23 = vpop.f32.mrf.mxu0 }
 0x524   : > { %v6945_v61 = vpack.c.bf16 %v4721_v49, %v4720_v29  ;;  %v4325_v10 = vadd.f32 %v4324_v15, %v4156_v22 }
 0x526   : > { %6981 = vst [vmem:[%s8073_s27 + $0xf0] sm:$0xff] %v6945_v61   ;;  %v4590_v7 = vmul.f32 %v8457_v25, %v4325_v10 }
 0x527   : > { %v3988_v40 = vpop.f32.mrf.mxu2 }
 0x528   : > { %v3989_v41 = vadd.f32 %v3988_v40, %v3820_v4  ;;  %v4157_v13 = vpop.f32.mrf.mxu3  ;;  %v4658_v43 = vadd.f32 %v7037_v45, %v4590_v7 }
 0x52a   : > { %v4158_v30 = vadd.f32 %v4157_v13, %v3989_v41  ;;  %v4722_v47 = vmax.f32 %v4658_v43, 0.0 }
 0x52c   : > { %v4327_v42 = vadd.f32 %v4326_v23, %v4158_v30 }
 0x52e   : > { %v4591_v18 = vmul.f32 %v8457_v25, %v4327_v42 }
 0x530   : > { %v4659_v32 = vadd.f32 %v7037_v45, %v4591_v18 }
 0x532   : > { %v4723_v27 = vmax.f32 %v4659_v32, 0.0 }
 0x534   : > { %v6950_v39 = vpack.c.bf16 %v4723_v27, %v4722_v47 }
 0x536   : > { %6982 = vst [vmem:[%s8073_s27 + $0xf8] sm:$0xff] %v6950_v39  }
 0x537 PF: > { %s14_s17 = sadd.s32 1, %s7060_s17   ;;  %s8592_s15 = smov %s7056_s16 }
 0x538   : > { %p11_p5 = scmp.ge.s32.totalorder %s14_s17, 10   ;;  %s8593_s16 = smov %s8595_s18 }
 0x53a   :  { %13 = sbr.rel (!%p11_p5) target bundleno = 2 (0x2), region = 83 }

</bundles_post_ra>
